<compile_context>
chip_gen: v6e
topology: v6e:2x2x1
jax: 0.10.0
libtpu: 0.0.40
codegen_flags: <defaults>
</compile_context>

<pallas_src>
import numpy as np
import jax
import jax.numpy as jnp
from jax.experimental import pallas as pl
from jax.experimental.pallas import tpu as pltpu


# ----------------------------------------------------------------------------
# One-time parameter preparation (banded weight expansion) -- host/jit glue.
# ----------------------------------------------------------------------------
_CONV_SHAPES = [  # (KH, KW, Cin, Cout), HWIO
    (3, 3, 1, 10),   # convblock1
    (3, 3, 10, 10),  # convblock2
    (3, 3, 10, 20),  # convblock3
    (1, 1, 20, 10),  # convblock4 (1x1, applied right after the 2x2 pool)
    (3, 3, 10, 10),  # convblock5
    (3, 3, 10, 20),  # convblock6
    (1, 1, 20, 10),  # convblock7
    (7, 7, 10, 10),  # convblock8
]


def init_params(key):
    params = []
    for shp in _CONV_SHAPES:
        key, sub = jax.random.split(key)
        fan_in = shp[0] * shp[1] * shp[2]
        params.append(
            jax.random.normal(sub, shp, jnp.float32) * (2.0 / fan_in) ** 0.5)
    return params


def _banded_weights(w, W):
    """Expand (KH,KW,Cin,Cout) filter into KH banded (W*Cin, Wo*Cout) matrices.

    sum_kh x[kh+r, :] @ wb[kh] reproduces a VALID stride-1 conv on activations
    packed as (H, W*Cin).  Structure indices are numpy (static); values come
    from `w` (jit-friendly).
    """
    w = jnp.asarray(w, jnp.float32)
    KH, KW, Cin, Cout = w.shape
    Wo = W - KW + 1
    p = np.arange(W * Cin)[:, None]          # input column  -> (wpos, cin)
    q = np.arange(Wo * Cout)[None, :]        # output column -> (j, cout)
    j = q // Cout
    cout = q % Cout
    cin = p % Cin
    kw = p // Cin - j                        # = wpos - j
    valid = (kw >= 0) & (kw < KW)
    kw_c = np.clip(kw, 0, KW - 1)
    gathered = w[:, kw_c, cin, cout]         # (KH, W*Cin, Wo*Cout)
    return jnp.where(jnp.asarray(valid)[None, :, :], gathered, 0.0)


def _pool_select_1x1_weights(w, Wp):
    """1x1-conv weight that also selects the even-w 20-wide blocks of the
    pair-maxed (2*Wp-1)*Cin-wide pooled layout.  Shape: ((2*Wp-1)*Cin, Wp*Cout).
    """
    w2 = jnp.asarray(w, jnp.float32)[0, 0]   # (Cin, Cout)
    Cin, Cout = w2.shape
    in_cols = (2 * Wp - 1) * Cin
    out_cols = Wp * Cout
    p = np.arange(in_cols)[:, None]
    q = np.arange(out_cols)[None, :]
    i = q // Cout
    cout = q % Cout
    cin = p % Cin
    wpos = p // Cin
    valid = (wpos == 2 * i)
    gathered = w2[np.broadcast_to(cin, valid.shape),
                  np.broadcast_to(cout, valid.shape)]
    return jnp.where(jnp.asarray(valid), gathered, 0.0)


def prepare_params(params):
    """One-time setup: expand all conv filters into MXU-friendly banded mats."""
    w1, w2, w3, w4, w5, w6, w7, w8 = params
    wb1 = _banded_weights(w1, 28)            # (3,  28, 260)
    wb2 = _banded_weights(w2, 26)            # (3, 260, 240)
    wb3 = _banded_weights(w3, 24)            # (3, 240, 440)
    wb4 = _pool_select_1x1_weights(w4, 11)   # (420, 110) pool-select + 1x1
    wb5 = _banded_weights(w5, 11)            # (3, 110,  90)
    wb6 = _banded_weights(w6, 9)             # (3,  90, 140)
    wb7 = _banded_weights(w7, 7)             # (1, 140,  70)  (1x1, block-diag)
    wb8 = _banded_weights(w8, 7)             # (7,  70,  10)  (7x7 -> 1x1)
    # Exact 0/1 row-compaction matrix (picks rows 0,2,...,20 of a 21-row array)
    e = np.zeros((11, 21), np.float32)
    e[np.arange(11), 2 * np.arange(11)] = 1.0
    return (wb1, wb2, wb3, wb4, wb5, wb6, wb7, wb8, jnp.asarray(e))


# ----------------------------------------------------------------------------
# The fused kernel: conv1..conv8 + maxpool + log_softmax, one image per step.
# ----------------------------------------------------------------------------
def _fused_kernel(x_ref, w1_ref, w2_ref, w3_ref, w4_ref, w5_ref, w6_ref,
                  w7_ref, w8_ref, e_ref, o_ref):
    def bconv(x, w_ref, relu=True):
        # x: (H, W*Cin) value; w_ref: (KH, W*Cin, Wo*Cout) ref in VMEM.
        kh_n = w_ref.shape[0]
        ho = x.shape[0] - kh_n + 1
        acc = jnp.zeros((ho, w_ref.shape[2]), jnp.float32)
        for kh in range(kh_n):                      # static unroll
            acc = acc + jnp.dot(x[kh:kh + ho, :], w_ref[kh],
                                preferred_element_type=jnp.float32)
        return jnp.maximum(acc, 0.0) if relu else acc

    x0 = x_ref[0]                                   # (28, 28)  [H, W*Cin]
    y = bconv(x0, w1_ref)                           # (26, 260) 28 -> 26
    y = bconv(y, w2_ref)                            # (24, 240) 26 -> 24
    y = bconv(y, w3_ref)                            # (22, 440) 24 -> 22

    # --- MaxPool2d(2,2), fused, no strided indexing ---
    # H pairs: overlapping max; row 2j now holds the H-pooled pair j.
    ym = jnp.maximum(y[0:21, :], y[1:22, :])        # (21, 440)
    # Compact the 11 valid (even) rows with an exact 0/1 selection matmul.
    yr = jnp.dot(e_ref[...], ym,
                 precision=jax.lax.Precision.HIGHEST,
                 preferred_element_type=jnp.float32)          # (11, 440)
    # W pairs: overlapping max over 20-wide channel blocks; the even-w block
    # columns hold the pooled values and are selected by conv4's weight.
    yc = jnp.maximum(yr[:, 0:420], yr[:, 20:440])   # (11, 420)

    # conv4 (1x1) with the even-w-block selection folded into its weight.
    y = jnp.maximum(
        jnp.dot(yc, w4_ref[...], preferred_element_type=jnp.float32), 0.0)
    #                                               # (11, 110) 11x11x10
    y = bconv(y, w5_ref)                            # (9,   90) 11 -> 9
    y = bconv(y, w6_ref)                            # (7,  140)  9 -> 7
    y = bconv(y, w7_ref)                            # (7,   70) 1x1
    y = bconv(y, w8_ref, relu=False)                # (1,   10) 7x7 -> 1x1

    # log_softmax over the 10 classes.
    m = jnp.max(y, axis=-1, keepdims=True)
    s = y - m
    lse = jnp.log(jnp.sum(jnp.exp(s), axis=-1, keepdims=True))
    o_ref[0] = s - lse                              # block (1, 1, 10)


def session7_model3_forward(x_nchw, prep):
    """x_nchw: (B, 1, 28, 28) like PyTorch; prep: output of prepare_params."""
    B = x_nchw.shape[0]
    # NCHW -> packed (B, H, W*Cin) NHWC rows (Cin = 1).  Wrapper-side glue.
    x = jnp.transpose(x_nchw, (0, 2, 3, 1)).reshape(B, 28, 28)
    w1, w2, w3, w4, w5, w6, w7, w8, e = prep

    def full_spec(a):
        nd = a.ndim
        return pl.BlockSpec(a.shape, lambda b, _nd=nd: (0,) * _nd)

    out = pl.pallas_call(
        _fused_kernel,
        out_shape=jax.ShapeDtypeStruct((B, 1, 10), jnp.float32),
        grid=(B,),
        in_specs=[pl.BlockSpec((1, 28, 28), lambda b: (b, 0, 0))]
                 + [full_spec(a) for a in (w1, w2, w3, w4, w5, w6, w7, w8, e)],
        out_specs=pl.BlockSpec((1, 1, 10), lambda b: (b, 0, 0)),
        compiler_params=pltpu.CompilerParams(
            dimension_semantics=("parallel",)),   # v7x: both TensorCores
    )(x, w1, w2, w3, w4, w5, w6, w7, w8, e)
    return out.reshape(B, 10)


# ----------------------------------------------------------------------------
# Pure-JAX reference for validation
# ----------------------------------------------------------------------------
def reference_forward(x_nchw, params):
    x = jnp.transpose(x_nchw, (0, 2, 3, 1))

    def conv(x, w, relu=True):
        y = jax.lax.conv_general_dilated(
            x, w, window_strides=(1, 1), padding="VALID",
            dimension_numbers=("NHWC", "HWIO", "NHWC"))
        return jnp.maximum(y, 0.0) if relu else y

    x = conv(x, params[0])
    x = conv(x, params[1])
    x = conv(x, params[2])
    x = jax.lax.reduce_window(x, -jnp.inf, jax.lax.max,
                              (1, 2, 2, 1), (1, 2, 2, 1), "VALID")
    x = conv(x, params[3])
    x = conv(x, params[4])
    x = conv(x, params[5])
    x = conv(x, params[6])
    x = conv(x, params[7], relu=False)
    x = x.reshape(-1, 10)
    return jax.nn.log_softmax(x, axis=-1)


if __name__ == "__main__":
    key = jax.random.PRNGKey(0)
    kx, kp = jax.random.split(key)
    # The conv stack implies a 28x28 single-channel input; batch = 2, NCHW.
    x = jax.random.normal(kx, (2, 1, 28, 28), jnp.float32)
    params = init_params(kp)
    prep = prepare_params(params)          # one-time banded-weight setup

    fwd = jax.jit(session7_model3_forward)
    out = jax.block_until_ready(fwd(x, prep))
    assert out.shape == (2, 10), out.shape

    ref = jax.block_until_ready(reference_forward(x, params))
    # Loose tolerance: the kernel uses the default (fast) MXU precision rather
    # than Precision.HIGHEST; structural bugs would show up as O(1) errors.
    if not np.allclose(np.asarray(out), np.asarray(ref), atol=1e-1, rtol=1e-1):
        raise AssertionError("Pallas output does not match JAX reference")

    print("KERNEL_OK")
</pallas_src>

<mosaic_0001>
module attributes {stable_mosaic.version = 11 : i64} {
  func.func @_fused_kernel(%arg0: i32, %arg1: memref<1x28x28xf32, #tpu.memory_space<vmem>>, %arg2: memref<3x28x260xf32, #tpu.memory_space<vmem>>, %arg3: memref<3x260x240xf32, #tpu.memory_space<vmem>>, %arg4: memref<3x240x440xf32, #tpu.memory_space<vmem>>, %arg5: memref<420x110xf32, #tpu.memory_space<vmem>>, %arg6: memref<3x110x90xf32, #tpu.memory_space<vmem>>, %arg7: memref<3x90x140xf32, #tpu.memory_space<vmem>>, %arg8: memref<1x140x70xf32, #tpu.memory_space<vmem>>, %arg9: memref<7x70x10xf32, #tpu.memory_space<vmem>>, %arg10: memref<11x21xf32, #tpu.memory_space<vmem>>, %arg11: memref<1x1x10xf32, #tpu.memory_space<vmem>>) attributes {dimension_semantics = [#tpu.dimension_semantics<parallel>], iteration_bounds = array<i64: 2>, scalar_prefetch = 0 : i64, scratch_operands = 0 : i64, tpu.core_type = #tpu.core_type<tc>, window_params = [{transform_indices = @transform_0, window_bounds = array<i64: 1, 28, 28>}, {pipeline_mode = #tpu.pipeline_mode<synchronous>, transform_indices = @transform_1, window_bounds = array<i64: 3, 28, 260>}, {pipeline_mode = #tpu.pipeline_mode<synchronous>, transform_indices = @transform_2, window_bounds = array<i64: 3, 260, 240>}, {pipeline_mode = #tpu.pipeline_mode<synchronous>, transform_indices = @transform_3, window_bounds = array<i64: 3, 240, 440>}, {pipeline_mode = #tpu.pipeline_mode<synchronous>, transform_indices = @transform_4, window_bounds = array<i64: 420, 110>}, {pipeline_mode = #tpu.pipeline_mode<synchronous>, transform_indices = @transform_5, window_bounds = array<i64: 3, 110, 90>}, {pipeline_mode = #tpu.pipeline_mode<synchronous>, transform_indices = @transform_6, window_bounds = array<i64: 3, 90, 140>}, {pipeline_mode = #tpu.pipeline_mode<synchronous>, transform_indices = @transform_7, window_bounds = array<i64: 1, 140, 70>}, {pipeline_mode = #tpu.pipeline_mode<synchronous>, transform_indices = @transform_8, window_bounds = array<i64: 7, 70, 10>}, {pipeline_mode = #tpu.pipeline_mode<synchronous>, transform_indices = @transform_9, window_bounds = array<i64: 11, 21>}, {transform_indices = @transform_10, window_bounds = array<i64: 1, 1, 10>}]} {
    %c0 = arith.constant 0 : index
    %c0_0 = arith.constant 0 : index
    %c0_1 = arith.constant 0 : index
    %0 = vector.load %arg1[%c0, %c0_0, %c0_1] : memref<1x28x28xf32, #tpu.memory_space<vmem>>, vector<1x28x28xf32>
    %1 = vector.shape_cast %0 : vector<1x28x28xf32> to vector<28x28xf32>
    %cst = arith.constant 0.000000e+00 : f32
    %2 = vector.broadcast %cst : f32 to vector<26x260xf32>
    %3 = vector.extract_strided_slice %1 {offsets = [0, 0], sizes = [26, 28], strides = [1, 1]} : vector<28x28xf32> to vector<26x28xf32>
    %c0_2 = arith.constant 0 : index
    %c0_3 = arith.constant 0 : index
    %c0_4 = arith.constant 0 : index
    %4 = vector.load %arg2[%c0_2, %c0_3, %c0_4] : memref<3x28x260xf32, #tpu.memory_space<vmem>>, vector<1x28x260xf32>
    %5 = vector.shape_cast %4 : vector<1x28x260xf32> to vector<28x260xf32>
    %cst_5 = arith.constant dense<0.000000e+00> : vector<26x260xf32>
    %6 = tpu.matmul %3, %5, %cst_5 {dimension_numbers = #tpu.dot_dimension_numbers<[1], [0], [0], [1], [0, 0, 1, 1], [], []>} : vector<26x28xf32>, vector<28x260xf32>, vector<26x260xf32> -> vector<26x260xf32>
    %7 = arith.addf %2, %6 : vector<26x260xf32>
    %8 = vector.extract_strided_slice %1 {offsets = [1, 0], sizes = [26, 28], strides = [1, 1]} : vector<28x28xf32> to vector<26x28xf32>
    %c1 = arith.constant 1 : index
    %c0_6 = arith.constant 0 : index
    %c0_7 = arith.constant 0 : index
    %9 = vector.load %arg2[%c1, %c0_6, %c0_7] : memref<3x28x260xf32, #tpu.memory_space<vmem>>, vector<1x28x260xf32>
    %10 = vector.shape_cast %9 : vector<1x28x260xf32> to vector<28x260xf32>
    %cst_8 = arith.constant dense<0.000000e+00> : vector<26x260xf32>
    %11 = tpu.matmul %8, %10, %cst_8 {dimension_numbers = #tpu.dot_dimension_numbers<[1], [0], [0], [1], [0, 0, 1, 1], [], []>} : vector<26x28xf32>, vector<28x260xf32>, vector<26x260xf32> -> vector<26x260xf32>
    %12 = arith.addf %7, %11 : vector<26x260xf32>
    %13 = vector.extract_strided_slice %1 {offsets = [2, 0], sizes = [26, 28], strides = [1, 1]} : vector<28x28xf32> to vector<26x28xf32>
    %c2 = arith.constant 2 : index
    %c0_9 = arith.constant 0 : index
    %c0_10 = arith.constant 0 : index
    %14 = vector.load %arg2[%c2, %c0_9, %c0_10] : memref<3x28x260xf32, #tpu.memory_space<vmem>>, vector<1x28x260xf32>
    %15 = vector.shape_cast %14 : vector<1x28x260xf32> to vector<28x260xf32>
    %cst_11 = arith.constant dense<0.000000e+00> : vector<26x260xf32>
    %16 = tpu.matmul %13, %15, %cst_11 {dimension_numbers = #tpu.dot_dimension_numbers<[1], [0], [0], [1], [0, 0, 1, 1], [], []>} : vector<26x28xf32>, vector<28x260xf32>, vector<26x260xf32> -> vector<26x260xf32>
    %17 = arith.addf %12, %16 : vector<26x260xf32>
    %cst_12 = arith.constant 0.000000e+00 : f32
    %18 = vector.broadcast %cst_12 : f32 to vector<26x260xf32>
    %19 = arith.maximumf %17, %18 : vector<26x260xf32>
    %cst_13 = arith.constant 0.000000e+00 : f32
    %20 = vector.broadcast %cst_13 : f32 to vector<24x240xf32>
    %21 = vector.extract_strided_slice %19 {offsets = [0, 0], sizes = [24, 260], strides = [1, 1]} : vector<26x260xf32> to vector<24x260xf32>
    %c0_14 = arith.constant 0 : index
    %c0_15 = arith.constant 0 : index
    %c0_16 = arith.constant 0 : index
    %22 = vector.load %arg3[%c0_14, %c0_15, %c0_16] : memref<3x260x240xf32, #tpu.memory_space<vmem>>, vector<1x260x240xf32>
    %23 = vector.shape_cast %22 : vector<1x260x240xf32> to vector<260x240xf32>
    %cst_17 = arith.constant dense<0.000000e+00> : vector<24x240xf32>
    %24 = tpu.matmul %21, %23, %cst_17 {dimension_numbers = #tpu.dot_dimension_numbers<[1], [0], [0], [1], [0, 0, 1, 1], [], []>} : vector<24x260xf32>, vector<260x240xf32>, vector<24x240xf32> -> vector<24x240xf32>
    %25 = arith.addf %20, %24 : vector<24x240xf32>
    %26 = vector.extract_strided_slice %19 {offsets = [1, 0], sizes = [24, 260], strides = [1, 1]} : vector<26x260xf32> to vector<24x260xf32>
    %c1_18 = arith.constant 1 : index
    %c0_19 = arith.constant 0 : index
    %c0_20 = arith.constant 0 : index
    %27 = vector.load %arg3[%c1_18, %c0_19, %c0_20] : memref<3x260x240xf32, #tpu.memory_space<vmem>>, vector<1x260x240xf32>
    %28 = vector.shape_cast %27 : vector<1x260x240xf32> to vector<260x240xf32>
    %cst_21 = arith.constant dense<0.000000e+00> : vector<24x240xf32>
    %29 = tpu.matmul %26, %28, %cst_21 {dimension_numbers = #tpu.dot_dimension_numbers<[1], [0], [0], [1], [0, 0, 1, 1], [], []>} : vector<24x260xf32>, vector<260x240xf32>, vector<24x240xf32> -> vector<24x240xf32>
    %30 = arith.addf %25, %29 : vector<24x240xf32>
    %31 = vector.extract_strided_slice %19 {offsets = [2, 0], sizes = [24, 260], strides = [1, 1]} : vector<26x260xf32> to vector<24x260xf32>
    %c2_22 = arith.constant 2 : index
    %c0_23 = arith.constant 0 : index
    %c0_24 = arith.constant 0 : index
    %32 = vector.load %arg3[%c2_22, %c0_23, %c0_24] : memref<3x260x240xf32, #tpu.memory_space<vmem>>, vector<1x260x240xf32>
    %33 = vector.shape_cast %32 : vector<1x260x240xf32> to vector<260x240xf32>
    %cst_25 = arith.constant dense<0.000000e+00> : vector<24x240xf32>
    %34 = tpu.matmul %31, %33, %cst_25 {dimension_numbers = #tpu.dot_dimension_numbers<[1], [0], [0], [1], [0, 0, 1, 1], [], []>} : vector<24x260xf32>, vector<260x240xf32>, vector<24x240xf32> -> vector<24x240xf32>
    %35 = arith.addf %30, %34 : vector<24x240xf32>
    %cst_26 = arith.constant 0.000000e+00 : f32
    %36 = vector.broadcast %cst_26 : f32 to vector<24x240xf32>
    %37 = arith.maximumf %35, %36 : vector<24x240xf32>
    %cst_27 = arith.constant 0.000000e+00 : f32
    %38 = vector.broadcast %cst_27 : f32 to vector<22x440xf32>
    %39 = vector.extract_strided_slice %37 {offsets = [0, 0], sizes = [22, 240], strides = [1, 1]} : vector<24x240xf32> to vector<22x240xf32>
    %c0_28 = arith.constant 0 : index
    %c0_29 = arith.constant 0 : index
    %c0_30 = arith.constant 0 : index
    %40 = vector.load %arg4[%c0_28, %c0_29, %c0_30] : memref<3x240x440xf32, #tpu.memory_space<vmem>>, vector<1x240x440xf32>
    %41 = vector.shape_cast %40 : vector<1x240x440xf32> to vector<240x440xf32>
    %cst_31 = arith.constant dense<0.000000e+00> : vector<22x440xf32>
    %42 = tpu.matmul %39, %41, %cst_31 {dimension_numbers = #tpu.dot_dimension_numbers<[1], [0], [0], [1], [0, 0, 1, 1], [], []>} : vector<22x240xf32>, vector<240x440xf32>, vector<22x440xf32> -> vector<22x440xf32>
    %43 = arith.addf %38, %42 : vector<22x440xf32>
    %44 = vector.extract_strided_slice %37 {offsets = [1, 0], sizes = [22, 240], strides = [1, 1]} : vector<24x240xf32> to vector<22x240xf32>
    %c1_32 = arith.constant 1 : index
    %c0_33 = arith.constant 0 : index
    %c0_34 = arith.constant 0 : index
    %45 = vector.load %arg4[%c1_32, %c0_33, %c0_34] : memref<3x240x440xf32, #tpu.memory_space<vmem>>, vector<1x240x440xf32>
    %46 = vector.shape_cast %45 : vector<1x240x440xf32> to vector<240x440xf32>
    %cst_35 = arith.constant dense<0.000000e+00> : vector<22x440xf32>
    %47 = tpu.matmul %44, %46, %cst_35 {dimension_numbers = #tpu.dot_dimension_numbers<[1], [0], [0], [1], [0, 0, 1, 1], [], []>} : vector<22x240xf32>, vector<240x440xf32>, vector<22x440xf32> -> vector<22x440xf32>
    %48 = arith.addf %43, %47 : vector<22x440xf32>
    %49 = vector.extract_strided_slice %37 {offsets = [2, 0], sizes = [22, 240], strides = [1, 1]} : vector<24x240xf32> to vector<22x240xf32>
    %c2_36 = arith.constant 2 : index
    %c0_37 = arith.constant 0 : index
    %c0_38 = arith.constant 0 : index
    %50 = vector.load %arg4[%c2_36, %c0_37, %c0_38] : memref<3x240x440xf32, #tpu.memory_space<vmem>>, vector<1x240x440xf32>
    %51 = vector.shape_cast %50 : vector<1x240x440xf32> to vector<240x440xf32>
    %cst_39 = arith.constant dense<0.000000e+00> : vector<22x440xf32>
    %52 = tpu.matmul %49, %51, %cst_39 {dimension_numbers = #tpu.dot_dimension_numbers<[1], [0], [0], [1], [0, 0, 1, 1], [], []>} : vector<22x240xf32>, vector<240x440xf32>, vector<22x440xf32> -> vector<22x440xf32>
    %53 = arith.addf %48, %52 : vector<22x440xf32>
    %cst_40 = arith.constant 0.000000e+00 : f32
    %54 = vector.broadcast %cst_40 : f32 to vector<22x440xf32>
    %55 = arith.maximumf %53, %54 : vector<22x440xf32>
    %56 = vector.extract_strided_slice %55 {offsets = [0, 0], sizes = [21, 440], strides = [1, 1]} : vector<22x440xf32> to vector<21x440xf32>
    %57 = vector.extract_strided_slice %55 {offsets = [1, 0], sizes = [21, 440], strides = [1, 1]} : vector<22x440xf32> to vector<21x440xf32>
    %58 = arith.maximumf %56, %57 : vector<21x440xf32>
    %c0_41 = arith.constant 0 : index
    %c0_42 = arith.constant 0 : index
    %59 = vector.load %arg10[%c0_41, %c0_42] : memref<11x21xf32, #tpu.memory_space<vmem>>, vector<11x21xf32>
    %cst_43 = arith.constant dense<0.000000e+00> : vector<11x440xf32>
    %60 = tpu.matmul %59, %58, %cst_43 {dimension_numbers = #tpu.dot_dimension_numbers<[1], [0], [0], [1], [0, 0, 1, 1], [], []>, precision = #tpu.contract_precision<fp32>} : vector<11x21xf32>, vector<21x440xf32>, vector<11x440xf32> -> vector<11x440xf32>
    %61 = vector.extract_strided_slice %60 {offsets = [0, 0], sizes = [11, 420], strides = [1, 1]} : vector<11x440xf32> to vector<11x420xf32>
    %62 = vector.extract_strided_slice %60 {offsets = [0, 20], sizes = [11, 420], strides = [1, 1]} : vector<11x440xf32> to vector<11x420xf32>
    %63 = arith.maximumf %61, %62 : vector<11x420xf32>
    %c0_44 = arith.constant 0 : index
    %c0_45 = arith.constant 0 : index
    %64 = vector.load %arg5[%c0_44, %c0_45] : memref<420x110xf32, #tpu.memory_space<vmem>>, vector<420x110xf32>
    %cst_46 = arith.constant dense<0.000000e+00> : vector<11x110xf32>
    %65 = tpu.matmul %63, %64, %cst_46 {dimension_numbers = #tpu.dot_dimension_numbers<[1], [0], [0], [1], [0, 0, 1, 1], [], []>} : vector<11x420xf32>, vector<420x110xf32>, vector<11x110xf32> -> vector<11x110xf32>
    %cst_47 = arith.constant 0.000000e+00 : f32
    %66 = vector.broadcast %cst_47 : f32 to vector<11x110xf32>
    %67 = arith.maximumf %65, %66 : vector<11x110xf32>
    %cst_48 = arith.constant 0.000000e+00 : f32
    %68 = vector.broadcast %cst_48 : f32 to vector<9x90xf32>
    %69 = vector.extract_strided_slice %67 {offsets = [0, 0], sizes = [9, 110], strides = [1, 1]} : vector<11x110xf32> to vector<9x110xf32>
    %c0_49 = arith.constant 0 : index
    %c0_50 = arith.constant 0 : index
    %c0_51 = arith.constant 0 : index
    %70 = vector.load %arg6[%c0_49, %c0_50, %c0_51] : memref<3x110x90xf32, #tpu.memory_space<vmem>>, vector<1x110x90xf32>
    %71 = vector.shape_cast %70 : vector<1x110x90xf32> to vector<110x90xf32>
    %cst_52 = arith.constant dense<0.000000e+00> : vector<9x90xf32>
    %72 = tpu.matmul %69, %71, %cst_52 {dimension_numbers = #tpu.dot_dimension_numbers<[1], [0], [0], [1], [0, 0, 1, 1], [], []>} : vector<9x110xf32>, vector<110x90xf32>, vector<9x90xf32> -> vector<9x90xf32>
    %73 = arith.addf %68, %72 : vector<9x90xf32>
    %74 = vector.extract_strided_slice %67 {offsets = [1, 0], sizes = [9, 110], strides = [1, 1]} : vector<11x110xf32> to vector<9x110xf32>
    %c1_53 = arith.constant 1 : index
    %c0_54 = arith.constant 0 : index
    %c0_55 = arith.constant 0 : index
    %75 = vector.load %arg6[%c1_53, %c0_54, %c0_55] : memref<3x110x90xf32, #tpu.memory_space<vmem>>, vector<1x110x90xf32>
    %76 = vector.shape_cast %75 : vector<1x110x90xf32> to vector<110x90xf32>
    %cst_56 = arith.constant dense<0.000000e+00> : vector<9x90xf32>
    %77 = tpu.matmul %74, %76, %cst_56 {dimension_numbers = #tpu.dot_dimension_numbers<[1], [0], [0], [1], [0, 0, 1, 1], [], []>} : vector<9x110xf32>, vector<110x90xf32>, vector<9x90xf32> -> vector<9x90xf32>
    %78 = arith.addf %73, %77 : vector<9x90xf32>
    %79 = vector.extract_strided_slice %67 {offsets = [2, 0], sizes = [9, 110], strides = [1, 1]} : vector<11x110xf32> to vector<9x110xf32>
    %c2_57 = arith.constant 2 : index
    %c0_58 = arith.constant 0 : index
    %c0_59 = arith.constant 0 : index
    %80 = vector.load %arg6[%c2_57, %c0_58, %c0_59] : memref<3x110x90xf32, #tpu.memory_space<vmem>>, vector<1x110x90xf32>
    %81 = vector.shape_cast %80 : vector<1x110x90xf32> to vector<110x90xf32>
    %cst_60 = arith.constant dense<0.000000e+00> : vector<9x90xf32>
    %82 = tpu.matmul %79, %81, %cst_60 {dimension_numbers = #tpu.dot_dimension_numbers<[1], [0], [0], [1], [0, 0, 1, 1], [], []>} : vector<9x110xf32>, vector<110x90xf32>, vector<9x90xf32> -> vector<9x90xf32>
    %83 = arith.addf %78, %82 : vector<9x90xf32>
    %cst_61 = arith.constant 0.000000e+00 : f32
    %84 = vector.broadcast %cst_61 : f32 to vector<9x90xf32>
    %85 = arith.maximumf %83, %84 : vector<9x90xf32>
    %cst_62 = arith.constant 0.000000e+00 : f32
    %86 = vector.broadcast %cst_62 : f32 to vector<7x140xf32>
    %87 = vector.extract_strided_slice %85 {offsets = [0, 0], sizes = [7, 90], strides = [1, 1]} : vector<9x90xf32> to vector<7x90xf32>
    %c0_63 = arith.constant 0 : index
    %c0_64 = arith.constant 0 : index
    %c0_65 = arith.constant 0 : index
    %88 = vector.load %arg7[%c0_63, %c0_64, %c0_65] : memref<3x90x140xf32, #tpu.memory_space<vmem>>, vector<1x90x140xf32>
    %89 = vector.shape_cast %88 : vector<1x90x140xf32> to vector<90x140xf32>
    %cst_66 = arith.constant dense<0.000000e+00> : vector<7x140xf32>
    %90 = tpu.matmul %87, %89, %cst_66 {dimension_numbers = #tpu.dot_dimension_numbers<[1], [0], [0], [1], [0, 0, 1, 1], [], []>} : vector<7x90xf32>, vector<90x140xf32>, vector<7x140xf32> -> vector<7x140xf32>
    %91 = arith.addf %86, %90 : vector<7x140xf32>
    %92 = vector.extract_strided_slice %85 {offsets = [1, 0], sizes = [7, 90], strides = [1, 1]} : vector<9x90xf32> to vector<7x90xf32>
    %c1_67 = arith.constant 1 : index
    %c0_68 = arith.constant 0 : index
    %c0_69 = arith.constant 0 : index
    %93 = vector.load %arg7[%c1_67, %c0_68, %c0_69] : memref<3x90x140xf32, #tpu.memory_space<vmem>>, vector<1x90x140xf32>
    %94 = vector.shape_cast %93 : vector<1x90x140xf32> to vector<90x140xf32>
    %cst_70 = arith.constant dense<0.000000e+00> : vector<7x140xf32>
    %95 = tpu.matmul %92, %94, %cst_70 {dimension_numbers = #tpu.dot_dimension_numbers<[1], [0], [0], [1], [0, 0, 1, 1], [], []>} : vector<7x90xf32>, vector<90x140xf32>, vector<7x140xf32> -> vector<7x140xf32>
    %96 = arith.addf %91, %95 : vector<7x140xf32>
    %97 = vector.extract_strided_slice %85 {offsets = [2, 0], sizes = [7, 90], strides = [1, 1]} : vector<9x90xf32> to vector<7x90xf32>
    %c2_71 = arith.constant 2 : index
    %c0_72 = arith.constant 0 : index
    %c0_73 = arith.constant 0 : index
    %98 = vector.load %arg7[%c2_71, %c0_72, %c0_73] : memref<3x90x140xf32, #tpu.memory_space<vmem>>, vector<1x90x140xf32>
    %99 = vector.shape_cast %98 : vector<1x90x140xf32> to vector<90x140xf32>
    %cst_74 = arith.constant dense<0.000000e+00> : vector<7x140xf32>
    %100 = tpu.matmul %97, %99, %cst_74 {dimension_numbers = #tpu.dot_dimension_numbers<[1], [0], [0], [1], [0, 0, 1, 1], [], []>} : vector<7x90xf32>, vector<90x140xf32>, vector<7x140xf32> -> vector<7x140xf32>
    %101 = arith.addf %96, %100 : vector<7x140xf32>
    %cst_75 = arith.constant 0.000000e+00 : f32
    %102 = vector.broadcast %cst_75 : f32 to vector<7x140xf32>
    %103 = arith.maximumf %101, %102 : vector<7x140xf32>
    %cst_76 = arith.constant 0.000000e+00 : f32
    %104 = vector.broadcast %cst_76 : f32 to vector<7x70xf32>
    %c0_77 = arith.constant 0 : index
    %c0_78 = arith.constant 0 : index
    %c0_79 = arith.constant 0 : index
    %105 = vector.load %arg8[%c0_77, %c0_78, %c0_79] : memref<1x140x70xf32, #tpu.memory_space<vmem>>, vector<1x140x70xf32>
    %106 = vector.shape_cast %105 : vector<1x140x70xf32> to vector<140x70xf32>
    %cst_80 = arith.constant dense<0.000000e+00> : vector<7x70xf32>
    %107 = tpu.matmul %103, %106, %cst_80 {dimension_numbers = #tpu.dot_dimension_numbers<[1], [0], [0], [1], [0, 0, 1, 1], [], []>} : vector<7x140xf32>, vector<140x70xf32>, vector<7x70xf32> -> vector<7x70xf32>
    %108 = arith.addf %104, %107 : vector<7x70xf32>
    %cst_81 = arith.constant 0.000000e+00 : f32
    %109 = vector.broadcast %cst_81 : f32 to vector<7x70xf32>
    %110 = arith.maximumf %108, %109 : vector<7x70xf32>
    %cst_82 = arith.constant 0.000000e+00 : f32
    %111 = vector.broadcast %cst_82 : f32 to vector<1x10xf32>
    %112 = vector.extract_strided_slice %110 {offsets = [0, 0], sizes = [1, 70], strides = [1, 1]} : vector<7x70xf32> to vector<1x70xf32>
    %c0_83 = arith.constant 0 : index
    %c0_84 = arith.constant 0 : index
    %c0_85 = arith.constant 0 : index
    %113 = vector.load %arg9[%c0_83, %c0_84, %c0_85] : memref<7x70x10xf32, #tpu.memory_space<vmem>>, vector<1x70x10xf32>
    %114 = vector.shape_cast %113 : vector<1x70x10xf32> to vector<70x10xf32>
    %cst_86 = arith.constant dense<0.000000e+00> : vector<1x10xf32>
    %115 = tpu.matmul %112, %114, %cst_86 {dimension_numbers = #tpu.dot_dimension_numbers<[1], [0], [0], [1], [0, 0, 1, 1], [], []>} : vector<1x70xf32>, vector<70x10xf32>, vector<1x10xf32> -> vector<1x10xf32>
    %116 = arith.addf %111, %115 : vector<1x10xf32>
    %117 = vector.extract_strided_slice %110 {offsets = [1, 0], sizes = [1, 70], strides = [1, 1]} : vector<7x70xf32> to vector<1x70xf32>
    %c1_87 = arith.constant 1 : index
    %c0_88 = arith.constant 0 : index
    %c0_89 = arith.constant 0 : index
    %118 = vector.load %arg9[%c1_87, %c0_88, %c0_89] : memref<7x70x10xf32, #tpu.memory_space<vmem>>, vector<1x70x10xf32>
    %119 = vector.shape_cast %118 : vector<1x70x10xf32> to vector<70x10xf32>
    %cst_90 = arith.constant dense<0.000000e+00> : vector<1x10xf32>
    %120 = tpu.matmul %117, %119, %cst_90 {dimension_numbers = #tpu.dot_dimension_numbers<[1], [0], [0], [1], [0, 0, 1, 1], [], []>} : vector<1x70xf32>, vector<70x10xf32>, vector<1x10xf32> -> vector<1x10xf32>
    %121 = arith.addf %116, %120 : vector<1x10xf32>
    %122 = vector.extract_strided_slice %110 {offsets = [2, 0], sizes = [1, 70], strides = [1, 1]} : vector<7x70xf32> to vector<1x70xf32>
    %c2_91 = arith.constant 2 : index
    %c0_92 = arith.constant 0 : index
    %c0_93 = arith.constant 0 : index
    %123 = vector.load %arg9[%c2_91, %c0_92, %c0_93] : memref<7x70x10xf32, #tpu.memory_space<vmem>>, vector<1x70x10xf32>
    %124 = vector.shape_cast %123 : vector<1x70x10xf32> to vector<70x10xf32>
    %cst_94 = arith.constant dense<0.000000e+00> : vector<1x10xf32>
    %125 = tpu.matmul %122, %124, %cst_94 {dimension_numbers = #tpu.dot_dimension_numbers<[1], [0], [0], [1], [0, 0, 1, 1], [], []>} : vector<1x70xf32>, vector<70x10xf32>, vector<1x10xf32> -> vector<1x10xf32>
    %126 = arith.addf %121, %125 : vector<1x10xf32>
    %127 = vector.extract_strided_slice %110 {offsets = [3, 0], sizes = [1, 70], strides = [1, 1]} : vector<7x70xf32> to vector<1x70xf32>
    %c3 = arith.constant 3 : index
    %c0_95 = arith.constant 0 : index
    %c0_96 = arith.constant 0 : index
    %128 = vector.load %arg9[%c3, %c0_95, %c0_96] : memref<7x70x10xf32, #tpu.memory_space<vmem>>, vector<1x70x10xf32>
    %129 = vector.shape_cast %128 : vector<1x70x10xf32> to vector<70x10xf32>
    %cst_97 = arith.constant dense<0.000000e+00> : vector<1x10xf32>
    %130 = tpu.matmul %127, %129, %cst_97 {dimension_numbers = #tpu.dot_dimension_numbers<[1], [0], [0], [1], [0, 0, 1, 1], [], []>} : vector<1x70xf32>, vector<70x10xf32>, vector<1x10xf32> -> vector<1x10xf32>
    %131 = arith.addf %126, %130 : vector<1x10xf32>
    %132 = vector.extract_strided_slice %110 {offsets = [4, 0], sizes = [1, 70], strides = [1, 1]} : vector<7x70xf32> to vector<1x70xf32>
    %c4 = arith.constant 4 : index
    %c0_98 = arith.constant 0 : index
    %c0_99 = arith.constant 0 : index
    %133 = vector.load %arg9[%c4, %c0_98, %c0_99] : memref<7x70x10xf32, #tpu.memory_space<vmem>>, vector<1x70x10xf32>
    %134 = vector.shape_cast %133 : vector<1x70x10xf32> to vector<70x10xf32>
    %cst_100 = arith.constant dense<0.000000e+00> : vector<1x10xf32>
    %135 = tpu.matmul %132, %134, %cst_100 {dimension_numbers = #tpu.dot_dimension_numbers<[1], [0], [0], [1], [0, 0, 1, 1], [], []>} : vector<1x70xf32>, vector<70x10xf32>, vector<1x10xf32> -> vector<1x10xf32>
    %136 = arith.addf %131, %135 : vector<1x10xf32>
    %137 = vector.extract_strided_slice %110 {offsets = [5, 0], sizes = [1, 70], strides = [1, 1]} : vector<7x70xf32> to vector<1x70xf32>
    %c5 = arith.constant 5 : index
    %c0_101 = arith.constant 0 : index
    %c0_102 = arith.constant 0 : index
    %138 = vector.load %arg9[%c5, %c0_101, %c0_102] : memref<7x70x10xf32, #tpu.memory_space<vmem>>, vector<1x70x10xf32>
    %139 = vector.shape_cast %138 : vector<1x70x10xf32> to vector<70x10xf32>
    %cst_103 = arith.constant dense<0.000000e+00> : vector<1x10xf32>
    %140 = tpu.matmul %137, %139, %cst_103 {dimension_numbers = #tpu.dot_dimension_numbers<[1], [0], [0], [1], [0, 0, 1, 1], [], []>} : vector<1x70xf32>, vector<70x10xf32>, vector<1x10xf32> -> vector<1x10xf32>
    %141 = arith.addf %136, %140 : vector<1x10xf32>
    %142 = vector.extract_strided_slice %110 {offsets = [6, 0], sizes = [1, 70], strides = [1, 1]} : vector<7x70xf32> to vector<1x70xf32>
    %c6 = arith.constant 6 : index
    %c0_104 = arith.constant 0 : index
    %c0_105 = arith.constant 0 : index
    %143 = vector.load %arg9[%c6, %c0_104, %c0_105] : memref<7x70x10xf32, #tpu.memory_space<vmem>>, vector<1x70x10xf32>
    %144 = vector.shape_cast %143 : vector<1x70x10xf32> to vector<70x10xf32>
    %cst_106 = arith.constant dense<0.000000e+00> : vector<1x10xf32>
    %145 = tpu.matmul %142, %144, %cst_106 {dimension_numbers = #tpu.dot_dimension_numbers<[1], [0], [0], [1], [0, 0, 1, 1], [], []>} : vector<1x70xf32>, vector<70x10xf32>, vector<1x10xf32> -> vector<1x10xf32>
    %146 = arith.addf %141, %145 : vector<1x10xf32>
    %cst_107 = arith.constant dense<0xFF800000> : vector<1xf32>
    %147 = vector.multi_reduction <maximumf>, %146, %cst_107 [1] : vector<1x10xf32> to vector<1xf32>
    %148 = vector.shape_cast %147 : vector<1xf32> to vector<1x1xf32>
    %149 = vector.broadcast %148 : vector<1x1xf32> to vector<1x10xf32>
    %150 = arith.subf %146, %149 : vector<1x10xf32>
    %151 = math.exp %150 : vector<1x10xf32>
    %cst_108 = arith.constant dense<0.000000e+00> : vector<1xf32>
    %152 = vector.multi_reduction <add>, %151, %cst_108 [1] : vector<1x10xf32> to vector<1xf32>
    %153 = vector.shape_cast %152 : vector<1xf32> to vector<1x1xf32>
    %154 = math.log %153 : vector<1x1xf32>
    %155 = vector.broadcast %154 : vector<1x1xf32> to vector<1x10xf32>
    %156 = arith.subf %150, %155 : vector<1x10xf32>
    %c0_109 = arith.constant 0 : index
    %c0_110 = arith.constant 0 : index
    %c0_111 = arith.constant 0 : index
    %157 = vector.load %arg11[%c0_109, %c0_110, %c0_111] : memref<1x1x10xf32, #tpu.memory_space<vmem>>, vector<1x1x10xf32>
    %158 = vector.shape_cast %157 : vector<1x1x10xf32> to vector<1x10xf32>
    %159 = vector.shape_cast %156 : vector<1x10xf32> to vector<1x1x10xf32>
    tpu.vector_store %arg11[%c0_109, %c0_110, %c0_111], %159 {strides = array<i32>} : memref<1x1x10xf32, #tpu.memory_space<vmem>>, vector<1x1x10xf32>,
    return
  }
  func.func @transform_0(%arg0: i32) -> (i32, i32, i32) {
    %c0_i32 = arith.constant 0 : i32
    %c0_i32_0 = arith.constant 0 : i32
    %c0_i32_1 = arith.constant 0 : i32
    return %arg0, %c0_i32, %c0_i32_0 : i32, i32, i32
  }
  func.func @transform_1(%arg0: i32) -> (i32, i32, i32) {
    %c0_i32 = arith.constant 0 : i32
    %c0_i32_0 = arith.constant 0 : i32
    %c0_i32_1 = arith.constant 0 : i32
    %c0_i32_2 = arith.constant 0 : i32
    return %c0_i32, %c0_i32_0, %c0_i32_1 : i32, i32, i32
  }
  func.func @transform_2(%arg0: i32) -> (i32, i32, i32) {
    %c0_i32 = arith.constant 0 : i32
    %c0_i32_0 = arith.constant 0 : i32
    %c0_i32_1 = arith.constant 0 : i32
    %c0_i32_2 = arith.constant 0 : i32
    return %c0_i32, %c0_i32_0, %c0_i32_1 : i32, i32, i32
  }
  func.func @transform_3(%arg0: i32) -> (i32, i32, i32) {
    %c0_i32 = arith.constant 0 : i32
    %c0_i32_0 = arith.constant 0 : i32
    %c0_i32_1 = arith.constant 0 : i32
    %c0_i32_2 = arith.constant 0 : i32
    return %c0_i32, %c0_i32_0, %c0_i32_1 : i32, i32, i32
  }
  func.func @transform_4(%arg0: i32) -> (i32, i32) {
    %c0_i32 = arith.constant 0 : i32
    %c0_i32_0 = arith.constant 0 : i32
    %c0_i32_1 = arith.constant 0 : i32
    return %c0_i32, %c0_i32_0 : i32, i32
  }
  func.func @transform_5(%arg0: i32) -> (i32, i32, i32) {
    %c0_i32 = arith.constant 0 : i32
    %c0_i32_0 = arith.constant 0 : i32
    %c0_i32_1 = arith.constant 0 : i32
    %c0_i32_2 = arith.constant 0 : i32
    return %c0_i32, %c0_i32_0, %c0_i32_1 : i32, i32, i32
  }
  func.func @transform_6(%arg0: i32) -> (i32, i32, i32) {
    %c0_i32 = arith.constant 0 : i32
    %c0_i32_0 = arith.constant 0 : i32
    %c0_i32_1 = arith.constant 0 : i32
    %c0_i32_2 = arith.constant 0 : i32
    return %c0_i32, %c0_i32_0, %c0_i32_1 : i32, i32, i32
  }
  func.func @transform_7(%arg0: i32) -> (i32, i32, i32) {
    %c0_i32 = arith.constant 0 : i32
    %c0_i32_0 = arith.constant 0 : i32
    %c0_i32_1 = arith.constant 0 : i32
    %c0_i32_2 = arith.constant 0 : i32
    return %c0_i32, %c0_i32_0, %c0_i32_1 : i32, i32, i32
  }
  func.func @transform_8(%arg0: i32) -> (i32, i32, i32) {
    %c0_i32 = arith.constant 0 : i32
    %c0_i32_0 = arith.constant 0 : i32
    %c0_i32_1 = arith.constant 0 : i32
    %c0_i32_2 = arith.constant 0 : i32
    return %c0_i32, %c0_i32_0, %c0_i32_1 : i32, i32, i32
  }
  func.func @transform_9(%arg0: i32) -> (i32, i32) {
    %c0_i32 = arith.constant 0 : i32
    %c0_i32_0 = arith.constant 0 : i32
    %c0_i32_1 = arith.constant 0 : i32
    return %c0_i32, %c0_i32_0 : i32, i32
  }
  func.func @transform_10(%arg0: i32) -> (i32, i32, i32) {
    %c0_i32 = arith.constant 0 : i32
    %c0_i32_0 = arith.constant 0 : i32
    %c0_i32_1 = arith.constant 0 : i32
    return %arg0, %c0_i32, %c0_i32_0 : i32, i32, i32
  }
}

</mosaic_0001>

<bundles_post_ra>
// kernel: session7_model3_forward.1
= control target key start
LH: loop header
LB: loop body
LE: loop exit
PB: predicated region body
PF: predicated region fallthrough
CT: control target
= control target key end

     0   :  { %15 = vsyncpa [#allocation3], 0  ;;  %s10307_s0 = inlined_call_operand.vmem [shape: f32[2,28,28], index: 0, kind: input, shape index: {}]   ;;  %s10308_s1 = inlined_call_operand.vmem [shape: f32[3,28,260], index: 1, kind: input, shape index: {}]   ;;  %s10309_s2 = inlined_call_operand.vmem [shape: f32[3,260,240], index: 2, kind: input, shape index: {}]   ;;  %s10310_s3 = inlined_call_operand.vmem [shape: f32[3,240,440], index: 3, kind: input, shape index: {}]   ;;  %s10311_s4 = inlined_call_operand.vmem [shape: f32[420,110], index: 4, kind: input, shape index: {}]   ;;  %s10312_s5 = inlined_call_operand.vmem [shape: f32[3,110,90], index: 5, kind: input, shape index: {}]   ;;  %s10313_s6 = inlined_call_operand.vmem [shape: f32[3,90,140], index: 6, kind: input, shape index: {}]   ;;  %s10314_s7 = inlined_call_operand.vmem [shape: f32[1,140,70], index: 7, kind: input, shape index: {}]   ;;  %s10315_s8 = inlined_call_operand.vmem [shape: f32[7,70,10], index: 8, kind: input, shape index: {}]   ;;  %s10316_s9 = inlined_call_operand.vmem [shape: f32[11,21], index: 9, kind: input, shape index: {}]   ;;  %s10317_s10 = inlined_call_operand.hbm [shape: f32[2,1,10], index: 10, kind: output, shape index: {}]  }
   0x1   :  { %17 = vsyncpa [#allocation3 + $0x1], 0  ;;  %s6940_s13 = smov 0   ;;  %s6942_s14 = smov 0  }
   0x2   :  { %s6944_s15 = smov 0   ;;  %s6946_s16 = smov 0  }
   0x3 LB: > { %s6961_s17 = sadd.s32 4294967295, %s6879_s16   ;;  %s5649_s18 = sadd.s32 4294967294, %s6879_s16   ;;  %s6879_s16 = sphi %s6946_s16, %s10325_s16   ;;  %s6875_s15 = sphi %s6944_s15, %s10324_s15   ;;  %s6871_s14 = sphi %s6942_s14, %s10323_s14   ;;  %s6867_s13 = sphi %s6940_s13, %s10322_s13  }
   0x4   : > { %s6965_s19 = sadd.s32 1, %s6879_s16   ;;  %s245_s20 = sadd.s32 1, %s6875_s15 }
   0x5   : > { %s242_s21 = ssub.s32 %s6879_s16, %s6965_s19  ;;  %p255_p0 = scmp.ne.s32.totalorder %s6875_s15, %s6871_s14 }
   0x6   : > { %p243_p1 = scmp.eq.s32.totalorder %s242_s21, 0  ;;  %p256_p2 = scmp.eq.s32.totalorder %s6961_s17, 1 }
   0x7   : > { %p261_p3 = scmp.ne.s32.totalorder %s6871_s14, %s6867_s13  ;;  %p262_p4 = scmp.eq.s32.totalorder %s5649_s18, 1 }
   0x8   : > { %s6976_s22 = scalar_select %p243_p1, %s6875_s15, %s245_s20  }
   0x9   : > { %p6978_p5 = por %p256_p2, %p255_p0  ;;  %p6982_p6 = por %p262_p4, %p261_p3 }
   0xa   : > { %10318 = sst [smem:[#allocation5_spill]] %s6976_s22  ;;  %p5652_p7 = scmp.ge.s32.totalorder %s6879_s16, 1 }
   0xb   : > { %p315_p8 = scmp.lt.s32.totalorder %s6879_s16, 3 }
   0xd   : > { %p316_p9 = pnand %p5652_p7, %p315_p8 }
   0xe   : > { %p352_p10 = scmp.lt.s32.totalorder (!%p316_p9), %s6961_s17, 1  ;;  %s6882_s12 = smov (!%p316_p9), 108  }
   0xf   : > { %319 = sbr.rel (%p316_p9) target bundleno = 2794 (0xaea), region = 60  ;;  %s6284_s28 = sshll.u32 (!%p316_p9), %s6961_s17, 4 }
  0x10   : > { %s5592_s18 = scalar_lea.hbm (!%p316_p9), %s10317_s10, %s6284_s28  ;;  %s6884_s25 = smov (!%p316_p9), [#allocation2]  }
  0x11   : > { %s6823_s27 = sshll.u32 (!%p316_p9), %s6884_s25, 4  ;;  %s6824_s27 = int_to_ptr.vmem [resolvable:$false] %s6823_s27 }
  0x14   : > { %v5665_v0 = vld [vmem:[%s10308_s1 + $0xb0] sm:$0xf]  ;;  %vm407_vm0 = vcmask 1043456   ;;  %v5664_v1 = vld [vmem:[%s10308_s1 + $0xa8] sm:$0xf]  ;;  %v5662_v2 = vld [vmem:[%s10308_s1 + $0x98] sm:$0xff] }
  0x15   : > { %5667 = vmatprep.subr.msk.mxu0 %vm407_vm0, %v5665_v0  ;;  %6750 = vmatprep.subr.msk.mxu1 %vm407_vm0, %v5665_v0  ;;  %v5661_v3 = vld [vmem:[%s10308_s1 + $0x90] sm:$0xff]  ;;  %v5659_v4 = vld [vmem:[%s10308_s1 + $0x80] sm:$0xff]  ;;  %v5658_v5 = vld [vmem:[%s10308_s1 + $0x78] sm:$0xff]  ;;  %s353_s26 = scalar_select %p352_p10, %s6961_s17, 1  ;;  %vm390_vm1 = vcmask 1046528   ;;  %vm398_vm2 = vcmask 228352  }
  0x16   : > { %5668 = vmatpush1.msk.msra.mxu0 %vm407_vm0, %v5664_v1  ;;  %6754 = vmatpush1.msk.msra.mxu1 %vm407_vm0, %v5664_v1  ;;  %v5656_v6 = vld [vmem:[%s10308_s1 + $0x68] sm:$0xff]  ;;  %v5655_v7 = vld [vmem:[%s10308_s1 + $0x60] sm:$0xff]  ;;  %v5666_v8 = vld [vmem:[%s10308_s1 + $0xb8] sm:$0xf]  ;;  %v6881_v17 = vmov 0.0   ;;  %vm795_vm3 = vcmask 1045504  }
  0x17   : > { %443 = vmatprep.subr.mxu0 %v5662_v2  ;;  %6751 = vmatprep.subr.mxu1 %v5662_v2  ;;  %s6287_s11 = sshll.u32 %s353_s26, 5  ;;  %v372_v9 = vld [vmem:[%s10308_s1 + $0x58] sm:$0xf]  ;;  %v369_v20 = vld [vmem:[%s10308_s1 + $0x40] sm:$0xff]  ;;  %v5660_v24 = vld [vmem:[%s10308_s1 + $0x88] sm:$0xff]  ;;  %vm1190_vm4 = vcmask 31744  }
  0x18   : > { %444 = vmatpush1.msra.mxu0 %v5661_v3  ;;  %6755 = vmatpush1.msra.mxu1 %v5661_v3  ;;  %s356_s20 = scalar_lea.vmem %s10307_s0, %s6287_s11  ;;  %v5663_v22 = vld [vmem:[%s10308_s1 + $0xa0] sm:$0xff]  ;;  %v366_v25 = vld [vmem:[%s10308_s1 + $0x28] sm:$0xff]  ;;  %v5657_v26 = vld [vmem:[%s10308_s1 + $0x70] sm:$0xff]  ;;  %vm2091_vm5 = vcmask 916480   ;;  %vm2824_vm6 = vcmask 171008   ;;  %vm2831_vm7 = vcmask 1044480  }
  0x19   : > { %445 = vmatprep.subr.mxu0 %v5659_v4  ;;  %6752 = vmatprep.subr.mxu1 %v5659_v4  ;;  %v7027_v10 = vld [vmem:[%s356_s20] sm:$0xff]  ;;  %v7029_v11 = vld [vmem:[%s356_s20 + $0x8] sm:$0xff]  ;;  %v7031_v12 = vld [vmem:[%s356_s20 + $0x10] sm:$0xff]  ;;  %vm4000_vm8 = vcmask 883712   ;;  %vm4076_vm9 = vcmask 293888   ;;  %vm4272_vm10 = vcmask 900096  }
  0x1a   : > { %446 = vmatpush1.msra.mxu0 %v5658_v5  ;;  %6756 = vmatpush1.msra.mxu1 %v5658_v5  ;;  %v391_v13 = vrot.slane %v7027_v10, 1  ;;  %v392_v14 = vrot.slane %v7029_v11, 1  ;;  %v7035_v15 = vld [vmem:[%s356_s20 + $0x18] sm:$0xf]  ;;  %v394_v16 = vrot.slane %v7031_v12, 1  ;;  %v363_v27 = vld [vmem:[%s10308_s1 + $0x10] sm:$0xff] }
  0x1b   : > { %447 = vmatprep.subr.mxu0 %v5656_v6  ;;  %6753 = vmatprep.subr.mxu1 %v5656_v6  ;;  %v396_v18 = vrot.slane %v7035_v15, 1  ;;  %v371_v28 = vld [vmem:[%s10308_s1 + $0x50] sm:$0xf]  ;;  %v370_v29 = vld [vmem:[%s10308_s1 + $0x48] sm:$0xf]  ;;  %v368_v31 = vld [vmem:[%s10308_s1 + $0x38] sm:$0xff] }
  0x1c   : > { %448 = vmatpush1.msra.mxu0 %v5655_v7  ;;  %6757 = vmatpush1.msra.mxu1 %v5655_v7  ;;  %v393_v19 = vsel %vm390_vm1, %v391_v13, %v392_v14  ;;  %v395_v23 = vsel %vm390_vm1, %v392_v14, %v394_v16  ;;  %v5699_v30 = vld [vmem:[%s10308_s1 + $0x110] sm:$0xf]  ;;  %v5698_v33 = vld [vmem:[%s10308_s1 + $0x108] sm:$0xf]  ;;  %v365_v34 = vld [vmem:[%s10308_s1 + $0x20] sm:$0xff]  ;;  %v796_v41 = vrot.slane %v7027_v10, 2 }
  0x1d   : > { %481 = vmatprep.mubr.f32.mxu0 %v6881_v17  ;;  %493 = vmatprep.mubr.f32.mxu1 %v6881_v17  ;;  %v397_v21 = vsel %vm390_vm1, %v394_v16, %v396_v18  ;;  %v367_v32 = vld [vmem:[%s10308_s1 + $0x30] sm:$0xff]  ;;  %v5696_v35 = vld [vmem:[%s10308_s1 + $0xf8] sm:$0xff]  ;;  %v362_v38 = vld [vmem:[%s10308_s1 + $0x8] sm:$0xff]  ;;  %v797_v42 = vrot.slane %v7029_v11, 2  ;;  %v799_v47 = vrot.slane %v7031_v12, 2  ;;  %v801_v51 = vrot.slane %v7035_v15, 2 }
  0x1e   : > { %6468 = vmatprep.subr.msk.mxu1 %vm407_vm0, %v5666_v8  ;;  %6482 = vmatprep.subr.msk.mxu0 %vm407_vm0, %v372_v9  ;;  %v364_v36 = vld [vmem:[%s10308_s1 + $0x18] sm:$0xff]  ;;  %v5695_v37 = vld [vmem:[%s10308_s1 + $0xf0] sm:$0xff]  ;;  %v5693_v39 = vld [vmem:[%s10308_s1 + $0xe0] sm:$0xff]  ;;  %vm4595_vm11 = vcmask 1041408   ;;  %vm4592_vm12 = vcmask 736256   ;;  %vm4882_vm13 = vcmask 97280  }
  0x1f   : > { %5669 = vmatmul.mubr.msk.f32.vlgmr.msra.gmra.mxu0 %vm398_vm2, %v393_v19  ;;  %5671 = vmatmul.mubr.msk.f32.vlgmr.msra.gmra.mxu1 %vm398_vm2, %v397_v21  ;;  %v361_v40 = vld [vmem:[%s10308_s1] sm:$0xff]  ;;  %v5692_v43 = vld [vmem:[%s10308_s1 + $0xd8] sm:$0xff]  ;;  %v5690_v44 = vld [vmem:[%s10308_s1 + $0xc8] sm:$0xff]  ;;  %v798_v46 = vsel %vm795_vm3, %v796_v41, %v797_v42  ;;  %v800_v50 = vsel %vm795_vm3, %v797_v42, %v799_v47  ;;  %v802_v54 = vsel %vm795_vm3, %v799_v47, %v801_v51  ;;  %vm6883_vm14 = vmmov 0   ;;  %s350_s26 = sand.u32 1, %s6871_s14   ;;  %s6825_s17 = scalar_lea.vmem %s6824_s27, 32 }
  0x20   : > { %6483 = vmatpush3.msk.msra.mxu0 %vm407_vm0, %v372_v9  ;;  %6469 = vmatpush3.msk.msra.mxu1 %vm407_vm0, %v5666_v8  ;;  %v5689_v45 = vld [vmem:[%s10308_s1 + $0xc0] sm:$0xff]  ;;  %v5700_v48 = vld [vmem:[%s10308_s1 + $0x118] sm:$0xf]  ;;  %v5743_v49 = vld [vmem:[%s10309_s2 + $0x308] sm:$0xff]  ;;  %vm4981_vm15 = vcmask 572416   ;;  %s351_s29 = scalar_lea.vmem [#allocation2], %s350_s26 }
  0x21   : > { %6484 = vmatprep.subr.mxu0 %v369_v20  ;;  %6470 = vmatprep.subr.mxu1 %v5663_v22  ;;  %v5697_v52 = vld [vmem:[%s10308_s1 + $0x100] sm:$0xff]  ;;  %v5694_v53 = vld [vmem:[%s10308_s1 + $0xe8] sm:$0xff]  ;;  %v5691_v55 = vld [vmem:[%s10308_s1 + $0xd0] sm:$0xff]  ;;  %s5594_s30 = sshll.u32 %s351_s29, 4  ;;  %s5582_s20 = scalar_lea.sflag [#allocation3], %s350_s26  ;;  %s5595_s30 = int_to_ptr.vmem [resolvable:$true] %s5594_s30 }
  0x22   : > { %487 = vmatprep.mubr.f32.mxu0 %v6881_v17  ;;  %499 = vmatprep.mubr.f32.mxu1 %v6881_v17  ;;  %v5742_v56 = vld [vmem:[%s10309_s2 + $0x300] sm:$0xff]  ;;  %v5741_v57 = vld [vmem:[%s10309_s2 + $0x2f8] sm:$0xff]  ;;  %v5740_v58 = vld [vmem:[%s10309_s2 + $0x2f0] sm:$0xff]  ;;  %s6819_s21 = scalar_lea.vmem %s5595_s30, 16  ;;  %p6826_p0 = scmp.lt.s32.totalorder %s5595_s30, %s6824_s27 }
  0x23   : > { %6471 = vmatpush3.msra.mxu1 %v5663_v22  ;;  %6485 = vmatpush3.msra.mxu0 %v369_v20  ;;  %v5739_v59 = vld [vmem:[%s10309_s2 + $0x2e8] sm:$0xff]  ;;  %v5738_v60 = vld [vmem:[%s10309_s2 + $0x2e0] sm:$0xff]  ;;  %v5737_v61 = vld [vmem:[%s10309_s2 + $0x2d8] sm:$0xff]  ;;  %p6820_p11 = scmp.ne.s32.totalorder %s5595_s30, %s6819_s21  ;;  %p6827_p1 = scmp.lt.s32.totalorder %s6825_s17, %s6819_s21 }
  0x24   : > { %5672 = vmatmul.mubr.msk.f32.gmra.mxu1 %vm398_vm2, %v396_v18  ;;  %5670 = vmatmul.mubr.msk.f32.gmra.mxu0 %vm398_vm2, %v395_v23  ;;  %v5736_v62 = vld [vmem:[%s10309_s2 + $0x2d0] sm:$0xff]  ;;  %v5735_v63 = vld [vmem:[%s10309_s2 + $0x2c8] sm:$0xff]  ;;  %v5734_v0 = vld [vmem:[%s10309_s2 + $0x2c0] sm:$0xff] }
  0x25   : > { %6472 = vmatprep.subr.mxu1 %v5660_v24  ;;  %6486 = vmatprep.subr.mxu0 %v366_v25  ;;  %v5733_v1 = vld [vmem:[%s10309_s2 + $0x2b8] sm:$0xff]  ;;  %v5732_v2 = vld [vmem:[%s10309_s2 + $0x2b0] sm:$0xff]  ;;  %v5731_v3 = vld [vmem:[%s10309_s2 + $0x2a8] sm:$0xff]  ;;  %p6821_p12 = pnand %p6820_p11, %p6978_p5  ;;  %p6828_p2 = por %p6827_p1, %p6826_p0 }
  0x26   : > { %6473 = vmatpush3.msra.mxu1 %v5660_v24  ;;  %6487 = vmatpush3.msra.mxu0 %v366_v25  ;;  %v5730_v4 = vld [vmem:[%s10309_s2 + $0x2a0] sm:$0xff]  ;;  %v5729_v5 = vld [vmem:[%s10309_s2 + $0x298] sm:$0xff]  ;;  %v5728_v6 = vld [vmem:[%s10309_s2 + $0x290] sm:$0xff] }
  0x27   : > { %6474 = vmatprep.subr.mxu1 %v5657_v26  ;;  %6488 = vmatprep.subr.mxu0 %v363_v27  ;;  %v5727_v7 = vld [vmem:[%s10309_s2 + $0x288] sm:$0xff]  ;;  %v5726_v8 = vld [vmem:[%s10309_s2 + $0x280] sm:$0xff]  ;;  %v5725_v9 = vld [vmem:[%s10309_s2 + $0x278] sm:$0xff]  ;;  %p6822_p13 = pneg %p6821_p12 }
  0x28   : > { %6475 = vmatpush3.msra.mxu1 %v5657_v26  ;;  %6476 = vmatprep.mubr.msk.f32.mxu1 %vm398_vm2, %v393_v19  ;;  %v5721_v13 = vld [vmem:[%s10309_s2 + $0x258] sm:$0xff]  ;;  %v5720_v14 = vld [vmem:[%s10309_s2 + $0x250] sm:$0xff]  ;;  %v5718_v16 = vld [vmem:[%s10309_s2 + $0x240] sm:$0xff] }
  0x29   : > { %6489 = vmatpush3.msra.mxu0 %v363_v27  ;;  %6490 = vmatprep.mubr.msk.f32.mxu0 %vm398_vm2, %v7027_v10  ;;  %v5716_v19 = vld [vmem:[%s10309_s2 + $0x230] sm:$0xff]  ;;  %v5715_v20 = vld [vmem:[%s10309_s2 + $0x228] sm:$0xff]  ;;  %v5713_v22 = vld [vmem:[%s10309_s2 + $0x218] sm:$0xff]  ;;  %p6829_p3 = pnand %p6828_p2, %p6822_p13 }
  0x2a   : > { %6477 = vmatmul.mubr.msk.f32.vlgmr.msra.gmra.mxu1 %vm398_vm2, %v395_v23  ;;  %5678 = vmatprep.subr.msk.mxu1 %vm407_vm0, %v371_v28  ;;  %v5712_v23 = vld [vmem:[%s10309_s2 + $0x210] sm:$0xff]  ;;  %v5775_v24 = vld [vmem:[%s10309_s2 + $0x408] sm:$0xff]  ;;  %v5774_v25 = vld [vmem:[%s10309_s2 + $0x400] sm:$0xff] }
  0x2b   : > { %6491 = vmatmul.mubr.msk.f32.vlgmr.msra.gmra.mxu0 %vm398_vm2, %v7029_v11  ;;  %5679 = vmatpush1.msk.msra.mxu1 %vm407_vm0, %v370_v29  ;;  %v5773_v26 = vld [vmem:[%s10309_s2 + $0x3f8] sm:$0xff]  ;;  %v5772_v27 = vld [vmem:[%s10309_s2 + $0x3f0] sm:$0xff]  ;;  %v5771_v28 = vld [vmem:[%s10309_s2 + $0x3e8] sm:$0xff] }
  0x2c   : > { %5701 = vmatprep.subr.msk.mxu0 %vm407_vm0, %v5699_v30  ;;  %634 = vmatprep.subr.mxu1 %v368_v31  ;;  %v5770_v29 = vld [vmem:[%s10309_s2 + $0x3e0] sm:$0xff]  ;;  %v5769_v30 = vld [vmem:[%s10309_s2 + $0x3d8] sm:$0xff]  ;;  %v5768_v31 = vld [vmem:[%s10309_s2 + $0x3d0] sm:$0xff] }
  0x2d   : > { %6479 = vmatprep.mubr.msk.f32.mxu1 %vm398_vm2, %v397_v21  ;;  %635 = vmatpush1.msra.mxu1 %v367_v32  ;;  %v5714_v21 = vld [vmem:[%s10309_s2 + $0x220] sm:$0xff]  ;;  %v5767_v32 = vld [vmem:[%s10309_s2 + $0x3c8] sm:$0xff]  ;;  %v5757_v42 = vld [vmem:[%s10309_s2 + $0x378] sm:$0xff] }
  0x2e   : > { %6493 = vmatprep.mubr.msk.f32.mxu0 %vm398_vm2, %v7031_v12  ;;  %5702 = vmatpush1.msk.msra.mxu0 %vm407_vm0, %v5698_v33  ;;  %v5766_v33 = vld [vmem:[%s10309_s2 + $0x3c0] sm:$0xff]  ;;  %v5752_v47 = vld [vmem:[%s10309_s2 + $0x350] sm:$0xff] }
  0x2f   : > { %6480 = vmatmul.mubr.msk.f32.gmra.mxu1 %vm398_vm2, %v396_v18  ;;  %636 = vmatprep.subr.mxu1 %v365_v34  ;;  %v5717_v18 = vld [vmem:[%s10309_s2 + $0x238] sm:$0xff]  ;;  %v5758_v41 = vld [vmem:[%s10309_s2 + $0x380] sm:$0xff] }
  0x30   : > { %6494 = vmatmul.mubr.msk.f32.gmra.mxu0 %vm398_vm2, %v7035_v15  ;;  %846 = vmatprep.subr.mxu0 %v5696_v35  ;;  %v5765_v34 = vld [vmem:[%s10309_s2 + $0x3b8] sm:$0xff]  ;;  %v5764_v35 = vld [vmem:[%s10309_s2 + $0x3b0] sm:$0xff] }
  0x31   : > { %637 = vmatpush1.msra.mxu1 %v364_v36  ;;  %847 = vmatpush1.msra.mxu0 %v5695_v37  ;;  %v5763_v36 = vld [vmem:[%s10309_s2 + $0x3a8] sm:$0xff]  ;;  %v5762_v37 = vld [vmem:[%s10309_s2 + $0x3a0] sm:$0xff] }
  0x32   : > { %638 = vmatprep.subr.mxu1 %v362_v38  ;;  %848 = vmatprep.subr.mxu0 %v5693_v39  ;;  %v5761_v38 = vld [vmem:[%s10309_s2 + $0x398] sm:$0xff]  ;;  %v5760_v39 = vld [vmem:[%s10309_s2 + $0x390] sm:$0xff] }
  0x33   : > { %639 = vmatpush1.msra.mxu1 %v361_v40  ;;  %672 = vmatprep.mubr.f32.mxu1 %v6881_v17  ;;  %v5759_v40 = vld [vmem:[%s10309_s2 + $0x388] sm:$0xff] }
  0x34   : > { %849 = vmatpush1.msra.mxu0 %v5692_v43  ;;  %5680 = vmatmul.mubr.msk.f32.vlgmr.msra.gmra.mxu1 %vm398_vm2, %v7027_v10  ;;  %v5724_v10 = vld [vmem:[%s10309_s2 + $0x270] sm:$0xff] }
  0x35   : > { %850 = vmatprep.subr.mxu0 %v5690_v44  ;;  %884 = vmatprep.mubr.f32.mxu0 %v6881_v17  ;;  %v5756_v43 = vld [vmem:[%s10309_s2 + $0x370] sm:$0xff]  ;;  %v5755_v44 = vld [vmem:[%s10309_s2 + $0x368] sm:$0xff] }
  0x36   : > { %851 = vmatpush1.msra.mxu0 %v5689_v45  ;;  %678 = vmatprep.mubr.f32.mxu1 %v6881_v17  ;;  %v5754_v45 = vld [vmem:[%s10309_s2 + $0x360] sm:$0xff] }
  0x37   : > { %5703 = vmatmul.mubr.msk.f32.vlgmr.msra.gmra.mxu0 %vm398_vm2, %v798_v46  ;;  %6496 = vmatprep.subr.msk.mxu1 %vm407_vm0, %v5700_v48 }
  0x38   : > { %890 = vmatprep.mubr.f32.mxu0 %v6881_v17  ;;  %5681 = vmatmul.mubr.msk.f32.gmra.mxu1 %vm398_vm2, %v7029_v11  ;;  %v5723_v11 = vld [vmem:[%s10309_s2 + $0x268] sm:$0xff] }
  0x39   : > { %1203 = vmatprep.subr.mxu0 %v5743_v49  ;;  %684 = vmatprep.mubr.f32.mxu1 %v6881_v17  ;;  %v5750_v49 = vld [vmem:[%s10309_s2 + $0x340] sm:$0xff] }
  0x3a   : > { %6497 = vmatpush3.msk.msra.mxu1 %vm407_vm0, %v5700_v48  ;;  %1204 = vmatpush1.msra.mxu0 %v5742_v56  ;;  %v5751_v48 = vld [vmem:[%s10309_s2 + $0x348] sm:$0xff]  ;;  %v5777_v56 = vld [vmem:[%s10309_s2 + $0x418] sm:$0xf] }
  0x3b   : > { %5704 = vmatmul.mubr.msk.f32.gmra.mxu0 %vm398_vm2, %v800_v50  ;;  %6498 = vmatprep.subr.mxu1 %v5697_v52 }
  0x3c   : > { %896 = vmatprep.mubr.f32.mxu0 %v6881_v17  ;;  %6499 = vmatpush3.msra.mxu1 %v5697_v52  ;;  %v5747_v52 = vld [vmem:[%s10309_s2 + $0x328] sm:$0xff] }
  0x3d   : > { %5682 = vmatmul.mubr.msk.f32.gmra.mxu1 %vm398_vm2, %v7031_v12  ;;  %6500 = vmatprep.subr.mxu1 %v5694_v53  ;;  %v5722_v12 = vld [vmem:[%s10309_s2 + $0x260] sm:$0xff] }
  0x3e   : > { %690 = vmatprep.mubr.f32.mxu1 %v6881_v17  ;;  %6501 = vmatpush3.msra.mxu1 %v5694_v53  ;;  %v5746_v53 = vld [vmem:[%s10309_s2 + $0x320] sm:$0xff] }
  0x3f   : > { %5705 = vmatmul.mubr.msk.f32.gmra.mxu0 %vm398_vm2, %v802_v54  ;;  %6502 = vmatprep.subr.mxu1 %v5691_v55 }
  0x40   : > { %902 = vmatprep.mubr.f32.mxu0 %v6881_v17  ;;  %6503 = vmatpush3.msra.mxu1 %v5691_v55  ;;  %v5744_v55 = vld [vmem:[%s10309_s2 + $0x310] sm:$0xff] }
  0x41   : > { %5683 = vmatmul.mubr.msk.f32.gmra.mxu1 %vm398_vm2, %v7035_v15  ;;  %1205 = vmatprep.subr.mxu0 %v5741_v57  ;;  %v5719_v15 = vld [vmem:[%s10309_s2 + $0x248] sm:$0xff]  ;;  %v5776_v57 = vld [vmem:[%s10309_s2 + $0x410] sm:$0xf] }
  0x42   : > { %6504 = vmatprep.mubr.msk.f32.mxu1 %vm398_vm2, %v798_v46  ;;  %1206 = vmatpush1.msra.mxu0 %v5740_v58  ;;  %v5753_v46 = vld [vmem:[%s10309_s2 + $0x358] sm:$0xff] }
  0x43   : > { %5706 = vmatmul.mubr.msk.f32.gmra.mxu0 %vm398_vm2, %v801_v51  ;;  %1207 = vmatprep.subr.mxu0 %v5739_v59  ;;  %v1049_v58 = vld [vmem:[%s10309_s2 + $0xf8] sm:$0xff]  ;;  %v1083_v59 = vld [vmem:[%s10309_s2 + $0x208] sm:$0xf] }
  0x44   : > { %1208 = vmatpush1.msra.mxu0 %v5738_v60  ;;  %5778 = vmatprep.subr.msk.mxu1 %vm407_vm0, %v5777_v56 }
  0x45   : > { %6505 = vmatmul.mubr.msk.f32.vlgmr.msra.gmra.mxu1 %vm398_vm2, %v800_v50  ;;  %1209 = vmatprep.subr.mxu0 %v5737_v61  ;;  %v5749_v50 = vld [vmem:[%s10309_s2 + $0x338] sm:$0xff] }
  0x46   : > { %6507 = vmatprep.mubr.msk.f32.mxu1 %vm398_vm2, %v802_v54  ;;  %1210 = vmatpush1.msra.mxu0 %v5736_v62  ;;  %v5745_v54 = vld [vmem:[%s10309_s2 + $0x318] sm:$0xff] }
  0x47   : > { %1211 = vmatprep.subr.mxu0 %v5735_v63  ;;  %5779 = vmatpush1.msk.msra.mxu1 %vm407_vm0, %v5776_v57 }
  0x48   : > { %1212 = vmatpush1.msra.mxu0 %v5734_v0  ;;  %1381 = vmatprep.subr.mxu1 %v1049_v58  ;;  %v1082_v58 = vld [vmem:[%s10309_s2 + $0x200] sm:$0xf] }
  0x49   : > { %6508 = vmatmul.mubr.msk.f32.gmra.mxu1 %vm398_vm2, %v801_v51  ;;  %1213 = vmatprep.subr.mxu0 %v5733_v1  ;;  %v5748_v51 = vld [vmem:[%s10309_s2 + $0x330] sm:$0xff] }
  0x4a   : > { %1350 = vmatprep.mubr.f32.mxu1 %v6881_v17  ;;  %1214 = vmatpush1.msra.mxu0 %v5732_v2 }
  0x4b   : > { %1215 = vmatprep.subr.mxu0 %v5731_v3 }
  0x4c   : > { %1216 = vmatpush1.msra.mxu0 %v5730_v4 }
  0x4d   : > { %1217 = vmatprep.subr.mxu0 %v5729_v5 }
  0x4e   : > { %1218 = vmatpush1.msra.mxu0 %v5728_v6 }
  0x4f   : > { %1219 = vmatprep.subr.mxu0 %v5727_v7 }
  0x50   : > { %1220 = vmatpush1.msra.mxu0 %v5726_v8 }
  0x51   : > { %1221 = vmatprep.subr.mxu0 %v5725_v9 }
  0x52   : > { %1222 = vmatpush1.msra.mxu0 %v5724_v10 }
  0x53   : > { %1223 = vmatprep.subr.mxu0 %v5723_v11 }
  0x54   : > { %1224 = vmatpush1.msra.mxu0 %v5722_v12 }
  0x55   : > { %1225 = vmatprep.subr.mxu0 %v5721_v13 }
  0x56   : > { %1226 = vmatpush1.msra.mxu0 %v5720_v14 }
  0x57   : > { %1227 = vmatprep.subr.mxu0 %v5719_v15 }
  0x58   : > { %1228 = vmatpush1.msra.mxu0 %v5718_v16 }
  0x59   : > { %1229 = vmatprep.subr.mxu0 %v5717_v18 }
  0x5a   : > { %1230 = vmatpush1.msra.mxu0 %v5716_v19 }
  0x5b   : > { %1231 = vmatprep.subr.mxu0 %v5715_v20 }
  0x5c   : > { %1232 = vmatpush1.msra.mxu0 %v5714_v21 }
  0x5d   : > { %1233 = vmatprep.subr.mxu0 %v5713_v22 }
  0x5e   : > { %1234 = vmatpush1.msra.mxu0 %v5712_v23 }
  0x5f   : > { %1235 = vmatprep.subr.mxu0 %v5775_v24 }
  0x60   : > { %1236 = vmatpush2.msra.mxu0 %v5774_v25 }
  0x61   : > { %1237 = vmatprep.subr.mxu0 %v5773_v26 }
  0x62   : > { %1238 = vmatpush2.msra.mxu0 %v5772_v27 }
  0x63   : > { %1239 = vmatprep.subr.mxu0 %v5771_v28 }
  0x64   : > { %1240 = vmatpush2.msra.mxu0 %v5770_v29 }
  0x65   : > { %1241 = vmatprep.subr.mxu0 %v5769_v30 }
  0x66   : > { %1242 = vmatpush2.msra.mxu0 %v5768_v31 }
  0x67   : > { %1243 = vmatprep.subr.mxu0 %v5767_v32 }
  0x68   : > { %1244 = vmatpush2.msra.mxu0 %v5766_v33 }
  0x69   : > { %1245 = vmatprep.subr.mxu0 %v5765_v34 }
  0x6a   : > { %1246 = vmatpush2.msra.mxu0 %v5764_v35 }
  0x6b   : > { %1247 = vmatprep.subr.mxu0 %v5763_v36 }
  0x6c   : > { %1248 = vmatpush2.msra.mxu0 %v5762_v37 }
  0x6d   : > { %1249 = vmatprep.subr.mxu0 %v5761_v38 }
  0x6e   : > { %1250 = vmatpush2.msra.mxu0 %v5760_v39 }
  0x6f   : > { %1251 = vmatprep.subr.mxu0 %v5759_v40 }
  0x70   : > { %1252 = vmatpush2.msra.mxu0 %v5758_v41 }
  0x71   : > { %1253 = vmatprep.subr.mxu0 %v5757_v42 }
  0x72   : > { %1254 = vmatpush2.msra.mxu0 %v5756_v43 }
  0x73   : > { %1255 = vmatprep.subr.mxu0 %v5755_v44 }
  0x74   : > { %1256 = vmatpush2.msra.mxu0 %v5754_v45 }
  0x75   : > { %1257 = vmatprep.subr.mxu0 %v5753_v46 }
  0x76   : > { %1258 = vmatpush2.msra.mxu0 %v5752_v47 }
  0x77   : > { %1259 = vmatprep.subr.mxu0 %v5751_v48 }
  0x78   : > { %1260 = vmatpush2.msra.mxu0 %v5750_v49 }
  0x79   : > { %1261 = vmatprep.subr.mxu0 %v5749_v50 }
  0x7a   : > { %1262 = vmatpush2.msra.mxu0 %v5748_v51 }
  0x7b   : > { %1263 = vmatprep.subr.mxu0 %v5747_v52 }
  0x7c   : > { %1264 = vmatpush2.msra.mxu0 %v5746_v53 }
  0x7d   : > { %1265 = vmatprep.subr.mxu0 %v5745_v54 }
  0x7e   : > { %1266 = vmatpush2.msra.mxu0 %v5744_v55 }
  0x7f   : > { %5783 = vmatprep.subr.msk.mxu0 %vm407_vm0, %v1083_v59 }
  0xdf   : > { %v483_v60 = vpop.f32.mrf.mxu0  ;;  %v495_v61 = vpop.f32.mrf.mxu1 }
  0xe1   : > { %v485_v62 = vpop.f32.mrf.mxu0  ;;  %v497_v63 = vpop.f32.mrf.mxu1 }
  0xe4   : > { %v501_v0 = vpop.f32.mrf.mxu1  ;;  %v489_v1 = vpop.f32.mrf.mxu0 }
  0xe6   : > { %v503_v2 = vpop.f32.mrf.mxu1  ;;  %v491_v3 = vpop.f32.mrf.mxu0 }
  0xea   : > { %v6478_v4 = vpop.f32.mrf.mxu1 }
  0xeb   : > { %v6492_v5 = vpop.f32.mrf.mxu0 }
  0xec   : > { %v572_v6 = vpop.f32.mrf.mxu1  ;;  %v769_v50 = vadd.f32 %v6492_v5, %v6478_v4 }
  0xed   : > { %v763_v7 = vpop.f32.mrf.mxu0 }
  0xef   : > { %v7389_v8 = vpop.f32.mrf.mxu1 }
  0xf0   : > { %v7391_v9 = vpop.f32.mrf.mxu0 }
  0xf1   : > { %v7393_v10 = vpop.f32.mrf.mxu1 }
  0xf2   : > { %v7395_v11 = vpop.f32.mrf.mxu0 }
  0xf4   : > { %v674_v12 = vpop.f32.mrf.mxu1 }
  0xf5   : > { %v675_v13 = vadd.f32 %v674_v12, %v483_v60 }
  0xf6   : > { %v676_v14 = vpop.f32.mrf.mxu1 }
  0xf7   : > { %v886_v15 = vpop.f32.mrf.mxu0  ;;  %v677_v16 = vadd.f32 %v676_v14, %v485_v62  ;;  %v774_v14 = vadd.f32 %v7395_v11, %v7393_v10 }
  0xf8   : > { %v680_v18 = vpop.f32.mrf.mxu1  ;;  %v994_v21 = vadd.f32 %v886_v15, %v675_v13 }
  0xf9   : > { %v888_v19 = vpop.f32.mrf.mxu0  ;;  %v681_v20 = vadd.f32 %v680_v18, %v489_v1 }
  0xfa   : > { %v995_v22 = vadd.f32 %v888_v19, %v677_v16  ;;  %v682_v23 = vpop.f32.mrf.mxu1  ;;  %v7397_v31 = vmax.f32 %v994_v21, 0.0  ;;  %v779_v16 = vadd.f32 %v7391_v9, %v7389_v8  ;;  %v1048_v8 = vld [vmem:[%s10309_s2 + $0xf0] sm:$0xff] }
  0xfb   : > { %v892_v24 = vpop.f32.mrf.mxu0  ;;  %v683_v25 = vadd.f32 %v682_v23, %v491_v3 }
  0xfc   : > { %v997_v26 = vadd.f32 %v892_v24, %v681_v20  ;;  %v7399_v32 = vmax.f32 %v995_v22, 0.0  ;;  %v1163_v45 = vrot.slane %v7397_v31, 1 }
  0xfd   : > { %v686_v27 = vpop.f32.mrf.mxu1  ;;  %v894_v28 = vpop.f32.mrf.mxu0 }
  0xfe   : > { %v687_v29 = vadd.f32 %v686_v27, %v495_v61  ;;  %v998_v30 = vadd.f32 %v894_v28, %v683_v25  ;;  %v7401_v33 = vmax.f32 %v997_v26, 0.0  ;;  %v1166_v46 = vrot.slane %v7399_v32, 1  ;;  %v1047_v25 = vld [vmem:[%s10309_s2 + $0xe8] sm:$0xff]  ;;  %v1046_v27 = vld [vmem:[%s10309_s2 + $0xe0] sm:$0xff] }
  0xff   : > { %v688_v34 = vpop.f32.mrf.mxu1  ;;  %v898_v35 = vpop.f32.mrf.mxu0 }
 0x100   : > { %v7403_v36 = vmax.f32 %v998_v30, 0.0  ;;  %v689_v37 = vadd.f32 %v688_v34, %v497_v63  ;;  %v1000_v38 = vadd.f32 %v898_v35, %v687_v29  ;;  %v1164_v39 = vrot.slane %v7401_v33, 1  ;;  %v5853_v63 = vld [vmem:[%s10309_s2 + $0x628] sm:$0xf]  ;;  %v1045_v29 = vld [vmem:[%s10309_s2 + $0xd8] sm:$0xff]  ;;  %v1044_v34 = vld [vmem:[%s10309_s2 + $0xd0] sm:$0xff] }
 0x101   : > { %v692_v40 = vpop.f32.mrf.mxu1  ;;  %v900_v41 = vpop.f32.mrf.mxu0  ;;  %v1043_v35 = vld [vmem:[%s10309_s2 + $0xc8] sm:$0xff] }
 0x102   : > { %v1167_v42 = vrot.slane %v7403_v36, 1  ;;  %v7407_v43 = vmax.f32 %v1000_v38, 0.0  ;;  %v693_v44 = vadd.f32 %v692_v40, %v501_v0  ;;  %v1001_v47 = vadd.f32 %v900_v41, %v689_v37  ;;  %v1042_v37 = vld [vmem:[%s10309_s2 + $0xc0] sm:$0xff]  ;;  %v1040_v40 = vld [vmem:[%s10309_s2 + $0xb0] sm:$0xff] }
 0x103   : > { %v694_v48 = vpop.f32.mrf.mxu1  ;;  %v904_v49 = vpop.f32.mrf.mxu0  ;;  %v1165_v57 = vsel %vm390_vm1, %v1163_v45, %v1164_v39  ;;  %v764_v0 = vadd.f32 %v763_v7, %v572_v6  ;;  %v1037_v45 = vld [vmem:[%s10309_s2 + $0x98] sm:$0xff] }
 0x104   : > { %v695_v51 = vadd.f32 %v694_v48, %v503_v2  ;;  %v7411_v52 = vadd.f32 %v904_v49, %v693_v44  ;;  %v7413_v53 = vmax.f32 %v1001_v47, 0.0  ;;  %v1168_v56 = vsel %vm390_vm1, %v1166_v46, %v1167_v42  ;;  %v1038_v44 = vld [vmem:[%s10309_s2 + $0xa0] sm:$0xff]  ;;  %v1036_v48 = vld [vmem:[%s10309_s2 + $0x90] sm:$0xff]  ;;  %v1035_v49 = vld [vmem:[%s10309_s2 + $0x88] sm:$0xff] }
 0x105   : > { %v906_v54 = vpop.f32.mrf.mxu0  ;;  %v6506_v55 = vpop.f32.mrf.mxu1  ;;  %v1172_v59 = vrot.slane %v7407_v43, 1  ;;  %1267 = vmatprep.mubr.f32.mxu0 %v1168_v56  ;;  %v5852_v46 = vld [vmem:[%s10309_s2 + $0x620] sm:$0xf] }
 0x106   : > { %v1015_v60 = vmax.f32 %v7411_v52, 0.0  ;;  %v7422_v61 = vadd.f32 %v906_v54, %v695_v51  ;;  %v999_v62 = vadd.f32 %v6506_v55, %v769_v50  ;;  %v1174_v1 = vrot.slane %v7413_v53, 1  ;;  %1268 = vmatmul.mubr.f32.vlgmr.msra.gmra.mxu0 %v1165_v57  ;;  %v1034_v51 = vld [vmem:[%s10309_s2 + $0x80] sm:$0xff]  ;;  %v1033_v54 = vld [vmem:[%s10309_s2 + $0x78] sm:$0xff]  ;;  %v1032_v57 = vld [vmem:[%s10309_s2 + $0x70] sm:$0xff] }
 0x107   : > { %v975_v2 = vpop.f32.mrf.mxu1  ;;  %5784 = vmatpush1.msk.msra.mxu0 %vm407_vm0, %v1082_v58  ;;  %v1173_v15 = vsel %vm390_vm1, %v1164_v39, %v1172_v59  ;;  %v1041_v39 = vld [vmem:[%s10309_s2 + $0xb8] sm:$0xff]  ;;  %v1031_v58 = vld [vmem:[%s10309_s2 + $0x68] sm:$0xff]  ;;  %v5919_v52 = vld [vmem:[%s10310_s3 + $0x5a0] sm:$0xff] }
 0x108   : > { %v1016_v3 = vmax.f32 %v7422_v61, 0.0  ;;  %v7430_v4 = vmax.f32 %v999_v62, 0.0  ;;  %v996_v5 = vadd.f32 %v975_v2, %v764_v0  ;;  %v1175_v13 = vsel %vm390_vm1, %v1167_v42, %v1174_v1  ;;  %5854 = vmatprep.subr.msk.mxu0 %vm407_vm0, %v5853_v63  ;;  %v1039_v42 = vld [vmem:[%s10309_s2 + $0xa8] sm:$0xff]  ;;  %v1029_v62 = vld [vmem:[%s10309_s2 + $0x58] sm:$0xff]  ;;  %v1028_v0 = vld [vmem:[%s10309_s2 + $0x50] sm:$0xff] }
 0x109   : > { %v6509_v12 = vpop.f32.mrf.mxu1  ;;  %v1178_v6 = vrot.slane %v1015_v60, 1  ;;  %1273 = vmatprep.mubr.f32.mxu0 %v1175_v13  ;;  %v1024_v13 = vld [vmem:[%s10309_s2 + $0x30] sm:$0xff]  ;;  %v5920_v61 = vld [vmem:[%s10310_s3 + $0x5a8] sm:$0xff] }
 0x10a   : > { %v1180_v7 = vrot.slane %v1016_v3, 1  ;;  %v7443_v18 = vmax.f32 %v996_v5, 0.0  ;;  %1274 = vmatmul.mubr.f32.gmra.mxu0 %v1173_v15  ;;  %v1170_v10 = vrot.slane %v7430_v4, 1  ;;  %v7448_v22 = vadd.f32 %v6509_v12, %v779_v16  ;;  %v1025_v5 = vld [vmem:[%s10309_s2 + $0x38] sm:$0xff]  ;;  %v1020_v15 = vld [vmem:[%s10309_s2 + $0x10] sm:$0xff]  ;;  %v1019_v16 = vld [vmem:[%s10309_s2 + $0x8] sm:$0xff] }
 0x10b   : > { %v985_v19 = vpop.f32.mrf.mxu1  ;;  %v1179_v24 = vsel %vm390_vm1, %v1172_v59, %v1178_v6  ;;  %v1621_v50 = vrot.slane %v7430_v4, 2  ;;  %v1030_v59 = vld [vmem:[%s10309_s2 + $0x60] sm:$0xff] }
 0x10c   : > { %v1002_v20 = vadd.f32 %v985_v19, %v774_v14  ;;  %v1181_v21 = vsel %vm390_vm1, %v1174_v1, %v1180_v7  ;;  %v1169_v11 = vrot.slane %v7443_v18, 1  ;;  %v1017_v28 = vmax.f32 %v7448_v22, 0.0  ;;  %v1027_v1 = vld [vmem:[%s10309_s2 + $0x48] sm:$0xff]  ;;  %v1022_v6 = vld [vmem:[%s10309_s2 + $0x20] sm:$0xff]  ;;  %v1021_v7 = vld [vmem:[%s10309_s2 + $0x18] sm:$0xff] }
 0x10d   : > { %1279 = vmatprep.mubr.f32.mxu0 %v1181_v21  ;;  %v1620_v47 = vrot.slane %v7443_v18, 2  ;;  %v1023_v14 = vld [vmem:[%s10309_s2 + $0x28] sm:$0xff]  ;;  %v1081_v19 = vld [vmem:[%s10309_s2 + $0x1f8] sm:$0xff]  ;;  %v1076_v22 = vld [vmem:[%s10309_s2 + $0x1d0] sm:$0xff] }
 0x10e   : > { %v7450_v23 = vmax.f32 %v1002_v20, 0.0  ;;  %1280 = vmatmul.mubr.f32.gmra.mxu0 %v1179_v24  ;;  %v1171_v9 = vsel %vm390_vm1, %v1169_v11, %v1170_v10  ;;  %v1182_v38 = vrot.slane %v1017_v28, 1  ;;  %v1633_v2 = vrot.slane %v1017_v28, 2  ;;  %v1080_v20 = vld [vmem:[%s10309_s2 + $0x1f0] sm:$0xff]  ;;  %v1079_v21 = vld [vmem:[%s10309_s2 + $0x1e8] sm:$0xff]  ;;  %v1077_v11 = vld [vmem:[%s10309_s2 + $0x1d8] sm:$0xff] }
 0x10f   : > { %5780 = vmatmul.mubr.msk.f32.vlgmr.msra.gmra.mxu1 %vm1190_vm4, %v1171_v9  ;;  %1528 = vmatprep.mubr.f32.mxu0 %v6881_v17  ;;  %v1622_v56 = vsel %vm795_vm3, %v1620_v47, %v1621_v50  ;;  %v1074_v24 = vld [vmem:[%s10309_s2 + $0x1c0] sm:$0xff]  ;;  %v1072_v9 = vld [vmem:[%s10309_s2 + $0x1b0] sm:$0xff] }
 0x110   : > { %v1176_v26 = vrot.slane %v7450_v23, 1  ;;  %1382 = vmatpush1.msra.mxu1 %v1048_v8  ;;  %1356 = vmatprep.mubr.f32.mxu1 %v6881_v17  ;;  %v1627_v55 = vrot.slane %v7450_v23, 2  ;;  %v1073_v8 = vld [vmem:[%s10309_s2 + $0x1b8] sm:$0xff]  ;;  %v1068_v28 = vld [vmem:[%s10309_s2 + $0x190] sm:$0xff]  ;;  %v1054_v47 = vld [vmem:[%s10309_s2 + $0x120] sm:$0xff] }
 0x111   : > { %1383 = vmatprep.subr.mxu1 %v1047_v25  ;;  %v1071_v25 = vld [vmem:[%s10309_s2 + $0x1a8] sm:$0xff] }
 0x112   : > { %v1177_v30 = vsel %vm390_vm1, %v1170_v10, %v1176_v26  ;;  %1384 = vmatpush1.msra.mxu1 %v1046_v27  ;;  %5785 = vmatmul.mubr.msk.f32.vlgmr.msra.gmra.mxu0 %vm1190_vm4, %v7443_v18  ;;  %v1183_v41 = vsel %vm390_vm1, %v1176_v26, %v1182_v38  ;;  %v1628_v63 = vsel %vm795_vm3, %v1621_v50, %v1627_v55  ;;  %v1018_v18 = vld [vmem:[%s10309_s2] sm:$0xff]  ;;  %v1069_v27 = vld [vmem:[%s10309_s2 + $0x198] sm:$0xff]  ;;  %v1051_v50 = vld [vmem:[%s10309_s2 + $0x108] sm:$0xff] }
 0x113   : > { %1385 = vmatprep.subr.mxu1 %v1045_v29  ;;  %5781 = vmatmul.mubr.msk.f32.gmra.mxu1 %vm1190_vm4, %v1177_v30  ;;  %v1634_v12 = vsel %vm795_vm3, %v1627_v55, %v1633_v2  ;;  %v1078_v10 = vld [vmem:[%s10309_s2 + $0x1e0] sm:$0xff]  ;;  %v1067_v29 = vld [vmem:[%s10309_s2 + $0x188] sm:$0xff]  ;;  %v5818_v55 = vld [vmem:[%s10309_s2 + $0x510] sm:$0xff]  ;;  %v1617_v2 = vrot.slane %v7399_v32, 2 }
 0x114   : > { %1386 = vmatpush1.msra.mxu1 %v1044_v34  ;;  %1534 = vmatprep.mubr.f32.mxu0 %v6881_v17  ;;  %v1070_v26 = vld [vmem:[%s10309_s2 + $0x1a0] sm:$0xff]  ;;  %v1065_v34 = vld [vmem:[%s10309_s2 + $0x178] sm:$0xff] }
 0x115   : > { %1387 = vmatprep.subr.mxu1 %v1043_v35  ;;  %1362 = vmatprep.mubr.f32.mxu1 %v6881_v17  ;;  %v1066_v30 = vld [vmem:[%s10309_s2 + $0x180] sm:$0xff]  ;;  %v1064_v35 = vld [vmem:[%s10309_s2 + $0x170] sm:$0xff] }
 0x116   : > { %1388 = vmatpush1.msra.mxu1 %v1042_v37  ;;  %5786 = vmatmul.mubr.msk.f32.gmra.mxu0 %vm1190_vm4, %v7430_v4  ;;  %v1026_v4 = vld [vmem:[%s10309_s2 + $0x40] sm:$0xff]  ;;  %v1063_v37 = vld [vmem:[%s10309_s2 + $0x168] sm:$0xff] }
 0x117   : > { %1389 = vmatprep.subr.mxu1 %v1041_v39  ;;  %5782 = vmatmul.mubr.msk.f32.gmra.mxu1 %vm1190_vm4, %v1183_v41  ;;  %v1062_v38 = vld [vmem:[%s10309_s2 + $0x160] sm:$0xff]  ;;  %v1061_v39 = vld [vmem:[%s10309_s2 + $0x158] sm:$0xff]  ;;  %v1059_v41 = vld [vmem:[%s10309_s2 + $0x148] sm:$0xff] }
 0x118   : > { %1390 = vmatpush1.msra.mxu1 %v1040_v40  ;;  %1445 = vmatprep.mubr.f32.mxu1 %v7399_v32  ;;  %v1060_v40 = vld [vmem:[%s10309_s2 + $0x150] sm:$0xff]  ;;  %v5808_v32 = vld [vmem:[%s10309_s2 + $0x4c0] sm:$0xff] }
 0x119   : > { %1391 = vmatprep.subr.mxu1 %v1039_v42  ;;  %1540 = vmatprep.mubr.f32.mxu0 %v6881_v17  ;;  %v1058_v42 = vld [vmem:[%s10309_s2 + $0x140] sm:$0xff] }
 0x11a   : > { %1392 = vmatpush1.msra.mxu1 %v1038_v44  ;;  %5787 = vmatmul.mubr.msk.f32.gmra.mxu0 %vm1190_vm4, %v7450_v23  ;;  %v1075_v23 = vld [vmem:[%s10309_s2 + $0x1c8] sm:$0xff]  ;;  %v1057_v44 = vld [vmem:[%s10309_s2 + $0x138] sm:$0xff] }
 0x11b   : > { %1393 = vmatprep.subr.mxu1 %v1037_v45  ;;  %5855 = vmatpush1.msk.msra.mxu0 %vm407_vm0, %v5852_v46  ;;  %v1056_v45 = vld [vmem:[%s10309_s2 + $0x130] sm:$0xff]  ;;  %v1055_v46 = vld [vmem:[%s10309_s2 + $0x128] sm:$0xff] }
 0x11c   : > { %1394 = vmatpush1.msra.mxu1 %v1036_v48  ;;  %1800 = vmatprep.mubr.f32.mxu0 %v6881_v17  ;;  %v1053_v48 = vld [vmem:[%s10309_s2 + $0x118] sm:$0xff] }
 0x11d   : > { %1395 = vmatprep.subr.mxu1 %v1035_v49  ;;  %v1052_v49 = vld [vmem:[%s10309_s2 + $0x110] sm:$0xff]  ;;  %2098 = vmatprep.subr.mxu0 %v5920_v61 }
 0x11e   : > { %1396 = vmatpush1.msra.mxu1 %v1034_v51  ;;  %5856 = vmatmul.mubr.msk.f32.vlgmr.msra.gmra.mxu0 %vm1190_vm4, %v1622_v56  ;;  %v1050_v51 = vld [vmem:[%s10309_s2 + $0x100] sm:$0xff]  ;;  %v5817_v56 = vld [vmem:[%s10309_s2 + $0x508] sm:$0xff]  ;;  %v5861_v61 = vld [vmem:[%s10310_s3 + $0x3d0] sm:$0xff] }
 0x11f   : > { %1397 = vmatprep.subr.mxu1 %v1033_v54  ;;  %1806 = vmatprep.mubr.f32.mxu0 %v6881_v17  ;;  %v5819_v54 = vld [vmem:[%s10309_s2 + $0x518] sm:$0xff] }
 0x120   : > { %1398 = vmatpush1.msra.mxu1 %v1032_v57  ;;  %v5816_v57 = vld [vmem:[%s10309_s2 + $0x500] sm:$0xff]  ;;  %2099 = vmatpush1.msra.mxu0 %v5919_v52  ;;  %v5978_v52 = vld [vmem:[%s10310_s3 + $0x778] sm:$0xff] }
 0x121   : > { %1399 = vmatprep.subr.mxu1 %v1031_v58  ;;  %v5815_v58 = vld [vmem:[%s10309_s2 + $0x4f8] sm:$0xff] }
 0x122   : > { %1400 = vmatpush1.msra.mxu1 %v1030_v59  ;;  %5857 = vmatmul.mubr.msk.f32.gmra.mxu0 %vm1190_vm4, %v1628_v63  ;;  %v5814_v59 = vld [vmem:[%s10309_s2 + $0x4f0] sm:$0xff]  ;;  %v1618_v63 = vrot.slane %v7403_v36, 2 }
 0x123   : > { %1401 = vmatprep.subr.mxu1 %v1029_v62  ;;  %1812 = vmatprep.mubr.f32.mxu0 %v6881_v17  ;;  %v5813_v62 = vld [vmem:[%s10309_s2 + $0x4e8] sm:$0xff] }
 0x124   : > { %1402 = vmatpush1.msra.mxu1 %v1028_v0  ;;  %v5812_v0 = vld [vmem:[%s10309_s2 + $0x4e0] sm:$0xff] }
 0x125   : > { %1403 = vmatprep.subr.mxu1 %v1027_v1  ;;  %v5811_v1 = vld [vmem:[%s10309_s2 + $0x4d8] sm:$0xff] }
 0x126   : > { %1404 = vmatpush1.msra.mxu1 %v1026_v4  ;;  %5858 = vmatmul.mubr.msk.f32.gmra.mxu0 %vm1190_vm4, %v1634_v12  ;;  %v5810_v4 = vld [vmem:[%s10309_s2 + $0x4d0] sm:$0xff]  ;;  %v1619_v12 = vsel %vm795_vm3, %v1617_v2, %v1618_v63  ;;  %v5823_v2 = vld [vmem:[%s10309_s2 + $0x538] sm:$0xff] }
 0x127   : > { %1405 = vmatprep.subr.mxu1 %v1025_v5  ;;  %v5809_v5 = vld [vmem:[%s10309_s2 + $0x4c8] sm:$0xff] }
 0x128   : > { %1406 = vmatpush1.msra.mxu1 %v1024_v13  ;;  %v5807_v13 = vld [vmem:[%s10309_s2 + $0x4b8] sm:$0xff] }
 0x129   : > { %1407 = vmatprep.subr.mxu1 %v1023_v14  ;;  %v5806_v14 = vld [vmem:[%s10309_s2 + $0x4b0] sm:$0xff] }
 0x12a   : > { %1408 = vmatpush1.msra.mxu1 %v1022_v6  ;;  %v5805_v6 = vld [vmem:[%s10309_s2 + $0x4a8] sm:$0xff] }
 0x12b   : > { %1409 = vmatprep.subr.mxu1 %v1021_v7  ;;  %v5804_v7 = vld [vmem:[%s10309_s2 + $0x4a0] sm:$0xff] }
 0x12c   : > { %1410 = vmatpush1.msra.mxu1 %v1020_v15  ;;  %v5803_v15 = vld [vmem:[%s10309_s2 + $0x498] sm:$0xff] }
 0x12d   : > { %1411 = vmatprep.subr.mxu1 %v1019_v16  ;;  %v5802_v16 = vld [vmem:[%s10309_s2 + $0x490] sm:$0xff] }
 0x12e   : > { %1412 = vmatpush1.msra.mxu1 %v1018_v18  ;;  %v5801_v18 = vld [vmem:[%s10309_s2 + $0x488] sm:$0xff] }
 0x12f   : > { %1413 = vmatprep.subr.mxu1 %v1081_v19  ;;  %v5800_v19 = vld [vmem:[%s10309_s2 + $0x480] sm:$0xff] }
 0x130   : > { %1414 = vmatpush2.msra.mxu1 %v1080_v20  ;;  %v5799_v20 = vld [vmem:[%s10309_s2 + $0x478] sm:$0xff] }
 0x131   : > { %1415 = vmatprep.subr.mxu1 %v1079_v21  ;;  %v5798_v21 = vld [vmem:[%s10309_s2 + $0x470] sm:$0xff] }
 0x132   : > { %1416 = vmatpush2.msra.mxu1 %v1078_v10  ;;  %v5797_v10 = vld [vmem:[%s10309_s2 + $0x468] sm:$0xff] }
 0x133   : > { %1417 = vmatprep.subr.mxu1 %v1077_v11  ;;  %v5796_v11 = vld [vmem:[%s10309_s2 + $0x460] sm:$0xff] }
 0x134   : > { %1418 = vmatpush2.msra.mxu1 %v1076_v22  ;;  %v5795_v22 = vld [vmem:[%s10309_s2 + $0x458] sm:$0xff] }
 0x135   : > { %1419 = vmatprep.subr.mxu1 %v1075_v23  ;;  %v5794_v23 = vld [vmem:[%s10309_s2 + $0x450] sm:$0xff] }
 0x136   : > { %1420 = vmatpush2.msra.mxu1 %v1074_v24  ;;  %v5793_v24 = vld [vmem:[%s10309_s2 + $0x448] sm:$0xff] }
 0x137   : > { %1421 = vmatprep.subr.mxu1 %v1073_v8  ;;  %v5792_v8 = vld [vmem:[%s10309_s2 + $0x440] sm:$0xff] }
 0x138   : > { %1422 = vmatpush2.msra.mxu1 %v1072_v9  ;;  %v5791_v9 = vld [vmem:[%s10309_s2 + $0x438] sm:$0xff] }
 0x139   : > { %1423 = vmatprep.subr.mxu1 %v1071_v25  ;;  %v5790_v25 = vld [vmem:[%s10309_s2 + $0x430] sm:$0xff] }
 0x13a   : > { %1424 = vmatpush2.msra.mxu1 %v1070_v26  ;;  %v5789_v26 = vld [vmem:[%s10309_s2 + $0x428] sm:$0xff] }
 0x13b   : > { %1425 = vmatprep.subr.mxu1 %v1069_v27  ;;  %v5788_v27 = vld [vmem:[%s10309_s2 + $0x420] sm:$0xff] }
 0x13c   : > { %1426 = vmatpush2.msra.mxu1 %v1068_v28  ;;  %v5851_v28 = vld [vmem:[%s10309_s2 + $0x618] sm:$0xff] }
 0x13d   : > { %1427 = vmatprep.subr.mxu1 %v1067_v29  ;;  %v5850_v29 = vld [vmem:[%s10309_s2 + $0x610] sm:$0xff] }
 0x13e   : > { %1428 = vmatpush2.msra.mxu1 %v1066_v30  ;;  %v5849_v30 = vld [vmem:[%s10309_s2 + $0x608] sm:$0xff] }
 0x13f   : > { %1429 = vmatprep.subr.mxu1 %v1065_v34  ;;  %v5848_v34 = vld [vmem:[%s10309_s2 + $0x600] sm:$0xff] }
 0x140   : > { %1430 = vmatpush2.msra.mxu1 %v1064_v35  ;;  %v5847_v35 = vld [vmem:[%s10309_s2 + $0x5f8] sm:$0xff] }
 0x141   : > { %1431 = vmatprep.subr.mxu1 %v1063_v37  ;;  %v5846_v37 = vld [vmem:[%s10309_s2 + $0x5f0] sm:$0xff] }
 0x142   : > { %1432 = vmatpush2.msra.mxu1 %v1062_v38  ;;  %v5845_v38 = vld [vmem:[%s10309_s2 + $0x5e8] sm:$0xff] }
 0x143   : > { %1433 = vmatprep.subr.mxu1 %v1061_v39  ;;  %v5844_v39 = vld [vmem:[%s10309_s2 + $0x5e0] sm:$0xff] }
 0x144   : > { %1434 = vmatpush2.msra.mxu1 %v1060_v40  ;;  %v5843_v40 = vld [vmem:[%s10309_s2 + $0x5d8] sm:$0xff] }
 0x145   : > { %1435 = vmatprep.subr.mxu1 %v1059_v41  ;;  %v5842_v41 = vld [vmem:[%s10309_s2 + $0x5d0] sm:$0xff] }
 0x146   : > { %1436 = vmatpush2.msra.mxu1 %v1058_v42  ;;  %v5841_v42 = vld [vmem:[%s10309_s2 + $0x5c8] sm:$0xff] }
 0x147   : > { %1437 = vmatprep.subr.mxu1 %v1057_v44  ;;  %v5840_v44 = vld [vmem:[%s10309_s2 + $0x5c0] sm:$0xff] }
 0x148   : > { %1438 = vmatpush2.msra.mxu1 %v1056_v45  ;;  %v5839_v45 = vld [vmem:[%s10309_s2 + $0x5b8] sm:$0xff] }
 0x149   : > { %1439 = vmatprep.subr.mxu1 %v1055_v46  ;;  %v5838_v46 = vld [vmem:[%s10309_s2 + $0x5b0] sm:$0xff] }
 0x14a   : > { %1440 = vmatpush2.msra.mxu1 %v1054_v47  ;;  %v5837_v47 = vld [vmem:[%s10309_s2 + $0x5a8] sm:$0xff] }
 0x14b   : > { %1441 = vmatprep.subr.mxu1 %v1053_v48  ;;  %v5836_v48 = vld [vmem:[%s10309_s2 + $0x5a0] sm:$0xff] }
 0x14c   : > { %1442 = vmatpush2.msra.mxu1 %v1052_v49  ;;  %v5835_v49 = vld [vmem:[%s10309_s2 + $0x598] sm:$0xff] }
 0x14d   : > { %1443 = vmatprep.subr.mxu1 %v1051_v50  ;;  %v5834_v50 = vld [vmem:[%s10309_s2 + $0x590] sm:$0xff] }
 0x14e   : > { %1444 = vmatpush2.msra.mxu1 %v1050_v51  ;;  %v5833_v51 = vld [vmem:[%s10309_s2 + $0x588] sm:$0xff] }
 0x14f   : > { %1446 = vmatmul.mubr.f32.vlgmr.msra.gmra.mxu1 %v7397_v31  ;;  %1653 = vmatprep.subr.mxu1 %v5819_v54  ;;  %v5832_v54 = vld [vmem:[%s10309_s2 + $0x580] sm:$0xff] }
 0x150   : > { %1451 = vmatprep.mubr.f32.mxu1 %v7403_v36  ;;  %1654 = vmatpush1.msra.mxu1 %v5818_v55  ;;  %v5831_v55 = vld [vmem:[%s10309_s2 + $0x578] sm:$0xff] }
 0x151   : > { %1655 = vmatprep.subr.mxu1 %v5817_v56  ;;  %v5830_v56 = vld [vmem:[%s10309_s2 + $0x570] sm:$0xff]  ;;  %v5922_v36 = vld [vmem:[%s10310_s3 + $0x5b8] sm:$0xff] }
 0x152   : > { %1656 = vmatpush1.msra.mxu1 %v5816_v57  ;;  %v5829_v57 = vld [vmem:[%s10309_s2 + $0x568] sm:$0xff] }
 0x153   : > { %1452 = vmatmul.mubr.f32.gmra.mxu1 %v7401_v33  ;;  %1657 = vmatprep.subr.mxu1 %v5815_v58  ;;  %v5828_v58 = vld [vmem:[%s10309_s2 + $0x560] sm:$0xff] }
 0x154   : > { %1457 = vmatprep.mubr.f32.mxu1 %v7413_v53  ;;  %1658 = vmatpush1.msra.mxu1 %v5814_v59  ;;  %v5827_v59 = vld [vmem:[%s10309_s2 + $0x558] sm:$0xff] }
 0x155   : > { %1659 = vmatprep.subr.mxu1 %v5813_v62  ;;  %v5826_v62 = vld [vmem:[%s10309_s2 + $0x550] sm:$0xff] }
 0x156   : > { %1660 = vmatpush1.msra.mxu1 %v5812_v0  ;;  %v5825_v0 = vld [vmem:[%s10309_s2 + $0x548] sm:$0xff] }
 0x157   : > { %1458 = vmatmul.mubr.f32.gmra.mxu1 %v7407_v43  ;;  %1661 = vmatprep.subr.mxu1 %v5811_v1  ;;  %v5824_v1 = vld [vmem:[%s10309_s2 + $0x540] sm:$0xff] }
 0x158   : > { %1662 = vmatpush1.msra.mxu1 %v5810_v4  ;;  %1717 = vmatprep.mubr.f32.mxu1 %v1619_v12  ;;  %v5822_v4 = vld [vmem:[%s10309_s2 + $0x530] sm:$0xff]  ;;  %v5821_v12 = vld [vmem:[%s10309_s2 + $0x528] sm:$0xff] }
 0x159   : > { %1663 = vmatprep.subr.mxu1 %v5809_v5  ;;  %v1615_v5 = vrot.slane %v7401_v33, 2 }
 0x15a   : > { %1664 = vmatpush1.msra.mxu1 %v5808_v32  ;;  %v1625_v32 = vrot.slane %v7413_v53, 2 }
 0x15b   : > { %1665 = vmatprep.subr.mxu1 %v5807_v13  ;;  %v5820_v13 = vld [vmem:[%s10309_s2 + $0x520] sm:$0xff] }
 0x15c   : > { %1666 = vmatpush1.msra.mxu1 %v5806_v14  ;;  %v1614_v14 = vrot.slane %v7397_v31, 2  ;;  %v1626_v53 = vsel %vm795_vm3, %v1618_v63, %v1625_v32  ;;  %v5918_v63 = vld [vmem:[%s10310_s3 + $0x598] sm:$0xff] }
 0x15d   : > { %1667 = vmatprep.subr.mxu1 %v5805_v6  ;;  %v1623_v6 = vrot.slane %v7407_v43, 2 }
 0x15e   : > { %1668 = vmatpush1.msra.mxu1 %v5804_v7  ;;  %v1616_v33 = vsel %vm795_vm3, %v1614_v14, %v1615_v5  ;;  %v1631_v7 = vrot.slane %v1016_v3, 2  ;;  %v5916_v3 = vld [vmem:[%s10310_s3 + $0x588] sm:$0xff]  ;;  %v5867_v14 = vld [vmem:[%s10310_s3 + $0x400] sm:$0xff] }
 0x15f   : > { %1669 = vmatprep.subr.mxu1 %v5803_v15  ;;  %v1629_v15 = vrot.slane %v1015_v60, 2  ;;  %v1624_v31 = vsel %vm795_vm3, %v1615_v5, %v1623_v6  ;;  %v5921_v60 = vld [vmem:[%s10310_s3 + $0x5b0] sm:$0xff]  ;;  %2100 = vmatprep.subr.mxu0 %v5916_v3  ;;  %v5871_v5 = vld [vmem:[%s10310_s3 + $0x420] sm:$0xff] }
 0x160   : > { %1670 = vmatpush1.msra.mxu1 %v5802_v16  ;;  %v1632_v43 = vsel %vm795_vm3, %v1625_v32, %v1631_v7  ;;  %v5868_v32 = vld [vmem:[%s10310_s3 + $0x408] sm:$0xff]  ;;  %v5866_v7 = vld [vmem:[%s10310_s3 + $0x3f8] sm:$0xff]  ;;  %v5977_v3 = vld [vmem:[%s10310_s3 + $0x770] sm:$0xff] }
 0x161   : > { %1671 = vmatprep.subr.mxu1 %v5801_v18  ;;  %v1630_v16 = vsel %vm795_vm3, %v1623_v6, %v1629_v15  ;;  %v5915_v18 = vld [vmem:[%s10310_s3 + $0x580] sm:$0xff]  ;;  %v5869_v6 = vld [vmem:[%s10310_s3 + $0x410] sm:$0xff] }
 0x162   : > { %1672 = vmatpush1.msra.mxu1 %v5800_v19  ;;  %v5917_v19 = vld [vmem:[%s10310_s3 + $0x590] sm:$0xff]  ;;  %2101 = vmatpush1.msra.mxu0 %v5915_v18  ;;  %v5974_v18 = vld [vmem:[%s10310_s3 + $0x758] sm:$0xff] }
 0x163   : > { %1673 = vmatprep.subr.mxu1 %v5799_v20  ;;  %v5912_v20 = vld [vmem:[%s10310_s3 + $0x568] sm:$0xff]  ;;  %v5865_v15 = vld [vmem:[%s10310_s3 + $0x3f0] sm:$0xff] }
 0x164   : > { %1674 = vmatpush1.msra.mxu1 %v5798_v21  ;;  %v5914_v21 = vld [vmem:[%s10310_s3 + $0x578] sm:$0xff]  ;;  %2102 = vmatprep.subr.mxu0 %v5912_v20  ;;  %v5973_v20 = vld [vmem:[%s10310_s3 + $0x750] sm:$0xff] }
 0x165   : > { %1675 = vmatprep.subr.mxu1 %v5797_v10  ;;  %v5911_v10 = vld [vmem:[%s10310_s3 + $0x560] sm:$0xff] }
 0x166   : > { %1676 = vmatpush1.msra.mxu1 %v5796_v11  ;;  %v5913_v11 = vld [vmem:[%s10310_s3 + $0x570] sm:$0xff]  ;;  %2103 = vmatpush1.msra.mxu0 %v5911_v10  ;;  %v5970_v10 = vld [vmem:[%s10310_s3 + $0x738] sm:$0xff] }
 0x167   : > { %1677 = vmatprep.subr.mxu1 %v5795_v22  ;;  %v5908_v22 = vld [vmem:[%s10310_s3 + $0x548] sm:$0xff] }
 0x168   : > { %1678 = vmatpush1.msra.mxu1 %v5794_v23  ;;  %v5910_v23 = vld [vmem:[%s10310_s3 + $0x558] sm:$0xff]  ;;  %2104 = vmatprep.subr.mxu0 %v5908_v22  ;;  %v5969_v22 = vld [vmem:[%s10310_s3 + $0x730] sm:$0xff] }
 0x169   : > { %1679 = vmatprep.subr.mxu1 %v5793_v24  ;;  %v5907_v24 = vld [vmem:[%s10310_s3 + $0x540] sm:$0xff] }
 0x16a   : > { %1680 = vmatpush1.msra.mxu1 %v5792_v8  ;;  %v5909_v8 = vld [vmem:[%s10310_s3 + $0x550] sm:$0xff]  ;;  %2105 = vmatpush1.msra.mxu0 %v5907_v24  ;;  %v5966_v24 = vld [vmem:[%s10310_s3 + $0x718] sm:$0xff] }
 0x16b   : > { %1681 = vmatprep.subr.mxu1 %v5791_v9  ;;  %v5904_v9 = vld [vmem:[%s10310_s3 + $0x528] sm:$0xff] }
 0x16c   : > { %1682 = vmatpush1.msra.mxu1 %v5790_v25  ;;  %v5906_v25 = vld [vmem:[%s10310_s3 + $0x538] sm:$0xff]  ;;  %2106 = vmatprep.subr.mxu0 %v5904_v9  ;;  %v5965_v9 = vld [vmem:[%s10310_s3 + $0x710] sm:$0xff] }
 0x16d   : > { %1683 = vmatprep.subr.mxu1 %v5789_v26  ;;  %v5903_v26 = vld [vmem:[%s10310_s3 + $0x520] sm:$0xff] }
 0x16e   : > { %1684 = vmatpush1.msra.mxu1 %v5788_v27  ;;  %v5905_v27 = vld [vmem:[%s10310_s3 + $0x530] sm:$0xff]  ;;  %2107 = vmatpush1.msra.mxu0 %v5903_v26  ;;  %v5962_v26 = vld [vmem:[%s10310_s3 + $0x6f8] sm:$0xff] }
 0x16f   : > { %1685 = vmatprep.subr.mxu1 %v5851_v28  ;;  %v5900_v28 = vld [vmem:[%s10310_s3 + $0x508] sm:$0xff] }
 0x170   : > { %1686 = vmatpush2.msra.mxu1 %v5850_v29  ;;  %v5902_v29 = vld [vmem:[%s10310_s3 + $0x518] sm:$0xff]  ;;  %2108 = vmatprep.subr.mxu0 %v5900_v28  ;;  %v5961_v28 = vld [vmem:[%s10310_s3 + $0x6f0] sm:$0xff] }
 0x171   : > { %1687 = vmatprep.subr.mxu1 %v5849_v30  ;;  %v5899_v30 = vld [vmem:[%s10310_s3 + $0x500] sm:$0xff] }
 0x172   : > { %1688 = vmatpush2.msra.mxu1 %v5848_v34  ;;  %v5901_v34 = vld [vmem:[%s10310_s3 + $0x510] sm:$0xff]  ;;  %2109 = vmatpush1.msra.mxu0 %v5899_v30  ;;  %v5958_v30 = vld [vmem:[%s10310_s3 + $0x6d8] sm:$0xff] }
 0x173   : > { %1689 = vmatprep.subr.mxu1 %v5847_v35  ;;  %v5896_v35 = vld [vmem:[%s10310_s3 + $0x4e8] sm:$0xff] }
 0x174   : > { %1690 = vmatpush2.msra.mxu1 %v5846_v37  ;;  %v5898_v37 = vld [vmem:[%s10310_s3 + $0x4f8] sm:$0xff]  ;;  %2110 = vmatprep.subr.mxu0 %v5896_v35  ;;  %v5957_v35 = vld [vmem:[%s10310_s3 + $0x6d0] sm:$0xff] }
 0x175   : > { %1691 = vmatprep.subr.mxu1 %v5845_v38  ;;  %v5895_v38 = vld [vmem:[%s10310_s3 + $0x4e0] sm:$0xff] }
 0x176   : > { %1692 = vmatpush2.msra.mxu1 %v5844_v39  ;;  %v5897_v39 = vld [vmem:[%s10310_s3 + $0x4f0] sm:$0xff]  ;;  %2111 = vmatpush1.msra.mxu0 %v5895_v38  ;;  %v5954_v38 = vld [vmem:[%s10310_s3 + $0x6b8] sm:$0xff] }
 0x177   : > { %1693 = vmatprep.subr.mxu1 %v5843_v40  ;;  %v5892_v40 = vld [vmem:[%s10310_s3 + $0x4c8] sm:$0xff] }
 0x178   : > { %1694 = vmatpush2.msra.mxu1 %v5842_v41  ;;  %v5894_v41 = vld [vmem:[%s10310_s3 + $0x4d8] sm:$0xff]  ;;  %2112 = vmatprep.subr.mxu0 %v5892_v40  ;;  %v5953_v40 = vld [vmem:[%s10310_s3 + $0x6b0] sm:$0xff] }
 0x179   : > { %1695 = vmatprep.subr.mxu1 %v5841_v42  ;;  %v5891_v42 = vld [vmem:[%s10310_s3 + $0x4c0] sm:$0xff] }
 0x17a   : > { %1696 = vmatpush2.msra.mxu1 %v5840_v44  ;;  %v5893_v44 = vld [vmem:[%s10310_s3 + $0x4d0] sm:$0xff]  ;;  %2113 = vmatpush1.msra.mxu0 %v5891_v42  ;;  %v5950_v42 = vld [vmem:[%s10310_s3 + $0x698] sm:$0xff] }
 0x17b   : > { %1697 = vmatprep.subr.mxu1 %v5839_v45  ;;  %v5888_v45 = vld [vmem:[%s10310_s3 + $0x4a8] sm:$0xff] }
 0x17c   : > { %1698 = vmatpush2.msra.mxu1 %v5838_v46  ;;  %v5890_v46 = vld [vmem:[%s10310_s3 + $0x4b8] sm:$0xff]  ;;  %2114 = vmatprep.subr.mxu0 %v5888_v45  ;;  %v5949_v45 = vld [vmem:[%s10310_s3 + $0x690] sm:$0xff] }
 0x17d   : > { %1699 = vmatprep.subr.mxu1 %v5837_v47  ;;  %v5887_v47 = vld [vmem:[%s10310_s3 + $0x4a0] sm:$0xff] }
 0x17e   : > { %1700 = vmatpush2.msra.mxu1 %v5836_v48  ;;  %v5889_v48 = vld [vmem:[%s10310_s3 + $0x4b0] sm:$0xff]  ;;  %2115 = vmatpush1.msra.mxu0 %v5887_v47  ;;  %v5946_v47 = vld [vmem:[%s10310_s3 + $0x678] sm:$0xff] }
 0x17f   : > { %1701 = vmatprep.subr.mxu1 %v5835_v49  ;;  %v5884_v49 = vld [vmem:[%s10310_s3 + $0x488] sm:$0xff] }
 0x180   : > { %1702 = vmatpush2.msra.mxu1 %v5834_v50  ;;  %v5886_v50 = vld [vmem:[%s10310_s3 + $0x498] sm:$0xff]  ;;  %2116 = vmatprep.subr.mxu0 %v5884_v49  ;;  %v5945_v49 = vld [vmem:[%s10310_s3 + $0x670] sm:$0xff] }
 0x181   : > { %1703 = vmatprep.subr.mxu1 %v5833_v51  ;;  %v5883_v51 = vld [vmem:[%s10310_s3 + $0x480] sm:$0xff] }
 0x182   : > { %1704 = vmatpush2.msra.mxu1 %v5832_v54  ;;  %v5885_v54 = vld [vmem:[%s10310_s3 + $0x490] sm:$0xff]  ;;  %2117 = vmatpush1.msra.mxu0 %v5883_v51  ;;  %v5942_v51 = vld [vmem:[%s10310_s3 + $0x658] sm:$0xff] }
 0x183   : > { %1705 = vmatprep.subr.mxu1 %v5831_v55  ;;  %v5880_v55 = vld [vmem:[%s10310_s3 + $0x468] sm:$0xff] }
 0x184   : > { %1706 = vmatpush2.msra.mxu1 %v5830_v56  ;;  %v5882_v56 = vld [vmem:[%s10310_s3 + $0x478] sm:$0xff]  ;;  %2118 = vmatprep.subr.mxu0 %v5880_v55  ;;  %v5941_v55 = vld [vmem:[%s10310_s3 + $0x650] sm:$0xff] }
 0x185   : > { %1707 = vmatprep.subr.mxu1 %v5829_v57  ;;  %v5879_v57 = vld [vmem:[%s10310_s3 + $0x460] sm:$0xff] }
 0x186   : > { %1708 = vmatpush2.msra.mxu1 %v5828_v58  ;;  %v5881_v58 = vld [vmem:[%s10310_s3 + $0x470] sm:$0xff]  ;;  %2119 = vmatpush1.msra.mxu0 %v5879_v57  ;;  %v5938_v57 = vld [vmem:[%s10310_s3 + $0x638] sm:$0xff] }
 0x187   : > { %1709 = vmatprep.subr.mxu1 %v5827_v59  ;;  %v5876_v59 = vld [vmem:[%s10310_s3 + $0x448] sm:$0xff] }
 0x188   : > { %1710 = vmatpush2.msra.mxu1 %v5826_v62  ;;  %v5878_v62 = vld [vmem:[%s10310_s3 + $0x458] sm:$0xff]  ;;  %2120 = vmatprep.subr.mxu0 %v5876_v59  ;;  %v5937_v59 = vld [vmem:[%s10310_s3 + $0x630] sm:$0xff] }
 0x189   : > { %1711 = vmatprep.subr.mxu1 %v5825_v0  ;;  %v5875_v0 = vld [vmem:[%s10310_s3 + $0x440] sm:$0xff] }
 0x18a   : > { %1712 = vmatpush2.msra.mxu1 %v5824_v1  ;;  %v5877_v1 = vld [vmem:[%s10310_s3 + $0x450] sm:$0xff]  ;;  %2121 = vmatpush1.msra.mxu0 %v5875_v0  ;;  %v5934_v0 = vld [vmem:[%s10310_s3 + $0x618] sm:$0xff] }
 0x18b   : > { %1713 = vmatprep.subr.mxu1 %v5823_v2  ;;  %v5872_v2 = vld [vmem:[%s10310_s3 + $0x428] sm:$0xff] }
 0x18c   : > { %1714 = vmatpush2.msra.mxu1 %v5822_v4  ;;  %v5874_v4 = vld [vmem:[%s10310_s3 + $0x438] sm:$0xff]  ;;  %2122 = vmatprep.subr.mxu0 %v5872_v2  ;;  %v5933_v2 = vld [vmem:[%s10310_s3 + $0x610] sm:$0xff] }
 0x18d   : > { %1715 = vmatprep.subr.mxu1 %v5821_v12  ;;  %v5873_v12 = vld [vmem:[%s10310_s3 + $0x430] sm:$0xff]  ;;  %2123 = vmatpush1.msra.mxu0 %v5871_v5  ;;  %v5930_v5 = vld [vmem:[%s10310_s3 + $0x5f8] sm:$0xff] }
 0x18e   : > { %1716 = vmatpush2.msra.mxu1 %v5820_v13  ;;  %v5870_v13 = vld [vmem:[%s10310_s3 + $0x418] sm:$0xff]  ;;  %2124 = vmatprep.subr.mxu0 %v5868_v32  ;;  %v5929_v32 = vld [vmem:[%s10310_s3 + $0x5f0] sm:$0xff] }
 0x18f   : > { %1718 = vmatmul.mubr.f32.vlgmr.msra.gmra.mxu1 %v1616_v33  ;;  %2181 = vmatprep.subr.mxu1 %v5922_v36  ;;  %v5864_v33 = vld [vmem:[%s10310_s3 + $0x3e8] sm:$0xff] }
 0x190   : > { %1723 = vmatprep.mubr.f32.mxu1 %v1626_v53  ;;  %2182 = vmatpush1.msra.mxu1 %v5921_v60  ;;  %v5863_v53 = vld [vmem:[%s10310_s3 + $0x3e0] sm:$0xff]  ;;  %v5976_v36 = vld [vmem:[%s10310_s3 + $0x768] sm:$0xff] }
 0x191   : > { %2183 = vmatprep.subr.mxu1 %v5918_v63  ;;  %2125 = vmatpush1.msra.mxu0 %v5867_v14  ;;  %v5975_v60 = vld [vmem:[%s10310_s3 + $0x760] sm:$0xff]  ;;  %v5972_v63 = vld [vmem:[%s10310_s3 + $0x748] sm:$0xff]  ;;  %v5926_v14 = vld [vmem:[%s10310_s3 + $0x5d8] sm:$0xff] }
 0x192   : > { %2184 = vmatpush1.msra.mxu1 %v5917_v19  ;;  %2126 = vmatprep.subr.mxu0 %v5864_v33  ;;  %v5971_v19 = vld [vmem:[%s10310_s3 + $0x740] sm:$0xff]  ;;  %v5925_v33 = vld [vmem:[%s10310_s3 + $0x5d0] sm:$0xff] }
 0x193   : > { %1724 = vmatmul.mubr.f32.gmra.mxu1 %v1624_v31  ;;  %2185 = vmatprep.subr.mxu1 %v5914_v21  ;;  %v5860_v31 = vld [vmem:[%s10310_s3 + $0x3c8] sm:$0xff] }
 0x194   : > { %1729 = vmatprep.mubr.f32.mxu1 %v1632_v43  ;;  %2186 = vmatpush1.msra.mxu1 %v5913_v11  ;;  %v5862_v43 = vld [vmem:[%s10310_s3 + $0x3d8] sm:$0xff]  ;;  %v5968_v21 = vld [vmem:[%s10310_s3 + $0x728] sm:$0xff]  ;;  %v5967_v11 = vld [vmem:[%s10310_s3 + $0x720] sm:$0xff] }
 0x195   : > { %2187 = vmatprep.subr.mxu1 %v5910_v23  ;;  %2127 = vmatpush1.msra.mxu0 %v5863_v53  ;;  %v5964_v23 = vld [vmem:[%s10310_s3 + $0x708] sm:$0xff]  ;;  %v1894_v53 = vld [vmem:[%s10310_s3 + $0x1f8] sm:$0xff] }
 0x196   : > { %2188 = vmatpush1.msra.mxu1 %v5909_v8  ;;  %2128 = vmatprep.subr.mxu0 %v5860_v31  ;;  %v5963_v8 = vld [vmem:[%s10310_s3 + $0x700] sm:$0xff] }
 0x197   : > { %1730 = vmatmul.mubr.f32.gmra.mxu1 %v1630_v16  ;;  %2189 = vmatprep.subr.mxu1 %v5906_v25  ;;  %v5859_v16 = vld [vmem:[%s10310_s3 + $0x3c0] sm:$0xff]  ;;  %v5960_v25 = vld [vmem:[%s10310_s3 + $0x6e8] sm:$0xff] }
 0x198   : > { %2190 = vmatpush1.msra.mxu1 %v5905_v27  ;;  %2129 = vmatpush1.msra.mxu0 %v5859_v16  ;;  %v5959_v27 = vld [vmem:[%s10310_s3 + $0x6e0] sm:$0xff] }
 0x199   : > { %2191 = vmatprep.subr.mxu1 %v5902_v29  ;;  %2134 = vmatprep.subr.mxu0 %v5976_v36  ;;  %v5956_v29 = vld [vmem:[%s10310_s3 + $0x6c8] sm:$0xff] }
 0x19a   : > { %2192 = vmatpush1.msra.mxu1 %v5901_v34  ;;  %2135 = vmatpush2.msra.mxu0 %v5975_v60  ;;  %v5955_v34 = vld [vmem:[%s10310_s3 + $0x6c0] sm:$0xff] }
 0x19b   : > { %2193 = vmatprep.subr.mxu1 %v5898_v37  ;;  %2136 = vmatprep.subr.mxu0 %v5972_v63  ;;  %v5952_v37 = vld [vmem:[%s10310_s3 + $0x6a8] sm:$0xff] }
 0x19c   : > { %2194 = vmatpush1.msra.mxu1 %v5897_v39  ;;  %2137 = vmatpush2.msra.mxu0 %v5971_v19  ;;  %v5951_v39 = vld [vmem:[%s10310_s3 + $0x6a0] sm:$0xff] }
 0x19d   : > { %2195 = vmatprep.subr.mxu1 %v5894_v41  ;;  %2138 = vmatprep.subr.mxu0 %v5968_v21  ;;  %v5948_v41 = vld [vmem:[%s10310_s3 + $0x688] sm:$0xff] }
 0x19e   : > { %2196 = vmatpush1.msra.mxu1 %v5893_v44  ;;  %2139 = vmatpush2.msra.mxu0 %v5967_v11  ;;  %v5947_v44 = vld [vmem:[%s10310_s3 + $0x680] sm:$0xff] }
 0x19f   : > { %2197 = vmatprep.subr.mxu1 %v5890_v46  ;;  %2140 = vmatprep.subr.mxu0 %v5964_v23  ;;  %v5944_v46 = vld [vmem:[%s10310_s3 + $0x668] sm:$0xff] }
 0x1a0   : > { %2198 = vmatpush1.msra.mxu1 %v5889_v48  ;;  %2141 = vmatpush2.msra.mxu0 %v5963_v8  ;;  %v5943_v48 = vld [vmem:[%s10310_s3 + $0x660] sm:$0xff] }
 0x1a1   : > { %2199 = vmatprep.subr.mxu1 %v5886_v50  ;;  %2142 = vmatprep.subr.mxu0 %v5960_v25  ;;  %v5940_v50 = vld [vmem:[%s10310_s3 + $0x648] sm:$0xff] }
 0x1a2   : > { %2200 = vmatpush1.msra.mxu1 %v5885_v54  ;;  %2143 = vmatpush2.msra.mxu0 %v5959_v27  ;;  %v5939_v54 = vld [vmem:[%s10310_s3 + $0x640] sm:$0xff] }
 0x1a3   : > { %2201 = vmatprep.subr.mxu1 %v5882_v56  ;;  %2144 = vmatprep.subr.mxu0 %v5956_v29  ;;  %v5936_v56 = vld [vmem:[%s10310_s3 + $0x628] sm:$0xff] }
 0x1a4   : > { %2202 = vmatpush1.msra.mxu1 %v5881_v58  ;;  %2145 = vmatpush2.msra.mxu0 %v5955_v34  ;;  %v5935_v58 = vld [vmem:[%s10310_s3 + $0x620] sm:$0xff] }
 0x1a5   : > { %2203 = vmatprep.subr.mxu1 %v5878_v62  ;;  %2146 = vmatprep.subr.mxu0 %v5952_v37  ;;  %v5932_v62 = vld [vmem:[%s10310_s3 + $0x608] sm:$0xff] }
 0x1a6   : > { %2204 = vmatpush1.msra.mxu1 %v5877_v1  ;;  %2147 = vmatpush2.msra.mxu0 %v5951_v39  ;;  %v5931_v1 = vld [vmem:[%s10310_s3 + $0x600] sm:$0xff] }
 0x1a7   : > { %2205 = vmatprep.subr.mxu1 %v5874_v4  ;;  %2148 = vmatprep.subr.mxu0 %v5948_v41  ;;  %v5928_v4 = vld [vmem:[%s10310_s3 + $0x5e8] sm:$0xff] }
 0x1a8   : > { %2206 = vmatpush1.msra.mxu1 %v5873_v12  ;;  %2149 = vmatpush2.msra.mxu0 %v5947_v44  ;;  %v5927_v12 = vld [vmem:[%s10310_s3 + $0x5e0] sm:$0xff] }
 0x1a9   : > { %2207 = vmatprep.subr.mxu1 %v5870_v13  ;;  %2150 = vmatprep.subr.mxu0 %v5944_v46  ;;  %v5924_v13 = vld [vmem:[%s10310_s3 + $0x5c8] sm:$0xff] }
 0x1aa   : > { %2208 = vmatpush1.msra.mxu1 %v5869_v6  ;;  %2151 = vmatpush2.msra.mxu0 %v5943_v48  ;;  %v5923_v6 = vld [vmem:[%s10310_s3 + $0x5c0] sm:$0xff] }
 0x1ab   : > { %2209 = vmatprep.subr.mxu1 %v5866_v7  ;;  %2152 = vmatprep.subr.mxu0 %v5940_v50  ;;  %v1892_v7 = vld [vmem:[%s10310_s3 + $0x1e8] sm:$0xff] }
 0x1ac   : > { %2210 = vmatpush1.msra.mxu1 %v5865_v15  ;;  %2153 = vmatpush2.msra.mxu0 %v5939_v54 }
 0x1ad   : > { %2211 = vmatprep.subr.mxu1 %v5862_v43  ;;  %2154 = vmatprep.subr.mxu0 %v5936_v56 }
 0x1ae   : > { %2212 = vmatpush1.msra.mxu1 %v5861_v61  ;;  %2155 = vmatpush2.msra.mxu0 %v5935_v58 }
 0x1af   : > { %2217 = vmatprep.subr.mxu1 %v5978_v52  ;;  %2156 = vmatprep.subr.mxu0 %v5932_v62 }
 0x1b0   : > { %2218 = vmatpush2.msra.mxu1 %v5977_v3  ;;  %2157 = vmatpush2.msra.mxu0 %v5931_v1 }
 0x1b1   : > { %2219 = vmatprep.subr.mxu1 %v5974_v18  ;;  %2158 = vmatprep.subr.mxu0 %v5928_v4 }
 0x1b2   : > { %2220 = vmatpush2.msra.mxu1 %v5973_v20  ;;  %2159 = vmatpush2.msra.mxu0 %v5927_v12 }
 0x1b3   : > { %2221 = vmatprep.subr.mxu1 %v5970_v10  ;;  %2160 = vmatprep.subr.mxu0 %v5924_v13 }
 0x1b4   : > { %2222 = vmatpush2.msra.mxu1 %v5969_v22  ;;  %2161 = vmatpush2.msra.mxu0 %v5923_v6 }
 0x1b5   : > { %2223 = vmatprep.subr.mxu1 %v5966_v24  ;;  %2270 = vmatprep.subr.mxu0 %v1892_v7 }
 0x1b6   : > { %2224 = vmatpush2.msra.mxu1 %v5965_v9 }
 0x1b7   : > { %2225 = vmatprep.subr.mxu1 %v5962_v26 }
 0x1b8   : > { %2226 = vmatpush2.msra.mxu1 %v5961_v28 }
 0x1b9   : > { %2227 = vmatprep.subr.mxu1 %v5958_v30 }
 0x1ba   : > { %2228 = vmatpush2.msra.mxu1 %v5957_v35 }
 0x1bb   : > { %2229 = vmatprep.subr.mxu1 %v5954_v38 }
 0x1bc   : > { %2230 = vmatpush2.msra.mxu1 %v5953_v40 }
 0x1bd   : > { %2231 = vmatprep.subr.mxu1 %v5950_v42 }
 0x1be   : > { %2232 = vmatpush2.msra.mxu1 %v5949_v45 }
 0x1bf   : > { %2233 = vmatprep.subr.mxu1 %v5946_v47 }
 0x1c0   : > { %2234 = vmatpush2.msra.mxu1 %v5945_v49 }
 0x1c1   : > { %2235 = vmatprep.subr.mxu1 %v5942_v51 }
 0x1c2   : > { %2236 = vmatpush2.msra.mxu1 %v5941_v55 }
 0x1c3   : > { %2237 = vmatprep.subr.mxu1 %v5938_v57 }
 0x1c4   : > { %2238 = vmatpush2.msra.mxu1 %v5937_v59 }
 0x1c5   : > { %2239 = vmatprep.subr.mxu1 %v5934_v0 }
 0x1c6   : > { %2240 = vmatpush2.msra.mxu1 %v5933_v2  ;;  %v1269_v15 = vpop.f32.mrf.mxu0 }
 0x1c7   : > { %2241 = vmatprep.subr.mxu1 %v5930_v5 }
 0x1c8   : > { %2242 = vmatpush2.msra.mxu1 %v5929_v32  ;;  %v1271_v31 = vpop.f32.mrf.mxu0 }
 0x1c9   : > { %2243 = vmatprep.subr.mxu1 %v5926_v14 }
 0x1ca   : > { %2244 = vmatpush2.msra.mxu1 %v5925_v33  ;;  %v1275_v43 = vpop.f32.mrf.mxu0 }
 0x1cb   : > { %2353 = vmatprep.subr.mxu1 %v1894_v53 }
 0x1cc   : > { %v1277_v16 = vpop.f32.mrf.mxu0 }
 0x1ce   : > { %v1281_v36 = vpop.f32.mrf.mxu0 }
 0x1cf   : > { %v1352_v61 = vpop.f32.mrf.mxu1 }
 0x1d0   : > { %v1283_v60 = vpop.f32.mrf.mxu0  ;;  %v1353_v30 = vadd.f32 %v1352_v61, %v1269_v15 }
 0x1d1   : > { %v1354_v52 = vpop.f32.mrf.mxu1 }
 0x1d2   : > { %v1530_v63 = vpop.f32.mrf.mxu0  ;;  %v1355_v29 = vadd.f32 %v1354_v52, %v1271_v31 }
 0x1d3   : > { %v1358_v3 = vpop.f32.mrf.mxu1 }
 0x1d4   : > { %v1532_v19 = vpop.f32.mrf.mxu0  ;;  %v1359_v37 = vadd.f32 %v1358_v3, %v1275_v43 }
 0x1d5   : > { %v1360_v18 = vpop.f32.mrf.mxu1 }
 0x1d6   : > { %v1536_v21 = vpop.f32.mrf.mxu0  ;;  %v1361_v41 = vadd.f32 %v1360_v18, %v1277_v16 }
 0x1d7   : > { %v1364_v20 = vpop.f32.mrf.mxu1 }
 0x1d8   : > { %v1538_v11 = vpop.f32.mrf.mxu0  ;;  %v1365_v44 = vadd.f32 %v1364_v20, %v1281_v36 }
 0x1d9   : > { %v1366_v10 = vpop.f32.mrf.mxu1 }
 0x1da   : > { %v1542_v23 = vpop.f32.mrf.mxu0  ;;  %v1367_v56 = vadd.f32 %v1366_v10, %v1283_v60  ;;  %v1891_v10 = vld [vmem:[%s10310_s3 + $0x1e0] sm:$0xff] }
 0x1dc   : > { %v1544_v8 = vpop.f32.mrf.mxu0 }
 0x1de   : > { %v1802_v25 = vpop.f32.mrf.mxu0 }
 0x1e0   : > { %v1804_v27 = vpop.f32.mrf.mxu0 }
 0x1e2   : > { %v1808_v34 = vpop.f32.mrf.mxu0 }
 0x1e4   : > { %v1810_v45 = vpop.f32.mrf.mxu0 }
 0x1e6   : > { %v1814_v62 = vpop.f32.mrf.mxu0 }
 0x1e8   : > { %v1816_v53 = vpop.f32.mrf.mxu0 }
 0x20f   : > { %v1447_v22 = vpop.f32.mrf.mxu1 }
 0x210   : > { %v1448_v39 = vadd.f32 %v1447_v22, %v1353_v30  ;;  %v1883_v30 = vld [vmem:[%s10310_s3 + $0x1a0] sm:$0xff] }
 0x211   : > { %v1449_v24 = vpop.f32.mrf.mxu1 }
 0x212   : > { %v1450_v38 = vadd.f32 %v1449_v24, %v1355_v29  ;;  %v1531_v51 = vadd.f32 %v1530_v63, %v1448_v39  ;;  %v1890_v24 = vld [vmem:[%s10310_s3 + $0x1d8] sm:$0xff]  ;;  %v1879_v39 = vld [vmem:[%s10310_s3 + $0x180] sm:$0xff] }
 0x213   : > { %v1453_v9 = vpop.f32.mrf.mxu1  ;;  %v1886_v29 = vld [vmem:[%s10310_s3 + $0x1b8] sm:$0xff] }
 0x214   : > { %v1454_v42 = vadd.f32 %v1453_v9, %v1359_v37  ;;  %v1533_v48 = vadd.f32 %v1532_v19, %v1450_v38  ;;  %v1889_v9 = vld [vmem:[%s10310_s3 + $0x1d0] sm:$0xff]  ;;  %v1880_v37 = vld [vmem:[%s10310_s3 + $0x188] sm:$0xff]  ;;  %v1882_v38 = vld [vmem:[%s10310_s3 + $0x198] sm:$0xff] }
 0x215   : > { %v1455_v26 = vpop.f32.mrf.mxu1 }
 0x216   : > { %v1456_v49 = vadd.f32 %v1455_v26, %v1361_v41  ;;  %v1537_v57 = vadd.f32 %v1536_v21, %v1454_v42  ;;  %v1876_v41 = vld [vmem:[%s10310_s3 + $0x168] sm:$0xff]  ;;  %v1878_v42 = vld [vmem:[%s10310_s3 + $0x178] sm:$0xff] }
 0x217   : > { %v1459_v28 = vpop.f32.mrf.mxu1 }
 0x218   : > { %v1460_v54 = vadd.f32 %v1459_v28, %v1365_v44  ;;  %v1539_v2 = vadd.f32 %v1538_v11, %v1456_v49  ;;  %v1893_v11 = vld [vmem:[%s10310_s3 + $0x1f0] sm:$0xff]  ;;  %v1884_v28 = vld [vmem:[%s10310_s3 + $0x1a8] sm:$0xff]  ;;  %v1875_v44 = vld [vmem:[%s10310_s3 + $0x160] sm:$0xff] }
 0x219   : > { %v1461_v35 = vpop.f32.mrf.mxu1  ;;  %v1873_v49 = vld [vmem:[%s10310_s3 + $0x150] sm:$0xff] }
 0x21a   : > { %v1462_v4 = vadd.f32 %v1461_v35, %v1367_v56  ;;  %v1543_v32 = vadd.f32 %v1542_v23, %v1460_v54  ;;  %v1888_v23 = vld [vmem:[%s10310_s3 + $0x1c8] sm:$0xff]  ;;  %v1867_v54 = vld [vmem:[%s10310_s3 + $0x120] sm:$0xff] }
 0x21b   : > { %v1864_v56 = vld [vmem:[%s10310_s3 + $0x108] sm:$0xff] }
 0x21c   : > { %v1545_v43 = vadd.f32 %v1544_v8, %v1462_v4  ;;  %v1887_v8 = vld [vmem:[%s10310_s3 + $0x1c0] sm:$0xff]  ;;  %v1856_v4 = vld [vmem:[%s10310_s3 + $0xc8] sm:$0xff] }
 0x24f   : > { %v1719_v40 = vpop.f32.mrf.mxu1 }
 0x250   : > { %v1803_v46 = vadd.f32 %v1802_v25, %v1719_v40  ;;  %v1881_v40 = vld [vmem:[%s10310_s3 + $0x190] sm:$0xff] }
 0x251   : > { %v1721_v47 = vpop.f32.mrf.mxu1 }
 0x252   : > { %v1805_v50 = vadd.f32 %v1804_v27, %v1721_v47  ;;  %v1819_v0 = vadd.f32 %v1803_v46, %v1531_v51  ;;  %v1872_v46 = vld [vmem:[%s10310_s3 + $0x148] sm:$0xff]  ;;  %v1874_v47 = vld [vmem:[%s10310_s3 + $0x158] sm:$0xff] }
 0x253   : > { %v1725_v55 = vpop.f32.mrf.mxu1  ;;  %v1870_v51 = vld [vmem:[%s10310_s3 + $0x138] sm:$0xff] }
 0x254   : > { %v1820_v58 = vadd.f32 %v1805_v50, %v1533_v48  ;;  %v1809_v59 = vadd.f32 %v1808_v34, %v1725_v55  ;;  %v8265_v15 = vmax.f32 %v1819_v0, 0.0  ;;  %v1885_v34 = vld [vmem:[%s10310_s3 + $0x1b0] sm:$0xff]  ;;  %v1871_v48 = vld [vmem:[%s10310_s3 + $0x140] sm:$0xff]  ;;  %v1868_v50 = vld [vmem:[%s10310_s3 + $0x128] sm:$0xff] }
 0x255   : > { %v1727_v1 = vpop.f32.mrf.mxu1  ;;  %v1869_v55 = vld [vmem:[%s10310_s3 + $0x130] sm:$0xff]  ;;  %v1862_v0 = vld [vmem:[%s10310_s3 + $0xf8] sm:$0xff] }
 0x256   : > { %v1821_v5 = vadd.f32 %v1809_v59, %v1537_v57  ;;  %v1811_v12 = vadd.f32 %v1810_v45, %v1727_v1  ;;  %v8261_v14 = vmax.f32 %v1820_v58, 0.0  ;;  %v2078_v19 = vrot.slane %v8265_v15, 1  ;;  %v1877_v45 = vld [vmem:[%s10310_s3 + $0x170] sm:$0xff]  ;;  %v1866_v57 = vld [vmem:[%s10310_s3 + $0x118] sm:$0xff]  ;;  %v1863_v58 = vld [vmem:[%s10310_s3 + $0x100] sm:$0xff] }
 0x257   : > { %v1731_v13 = vpop.f32.mrf.mxu1  ;;  %v1865_v59 = vld [vmem:[%s10310_s3 + $0x110] sm:$0xff]  ;;  %v1859_v1 = vld [vmem:[%s10310_s3 + $0xe0] sm:$0xff] }
 0x258   : > { %v8263_v6 = vmax.f32 %v1821_v5, 0.0  ;;  %v1822_v33 = vadd.f32 %v1811_v12, %v1539_v2  ;;  %v1815_v7 = vadd.f32 %v1814_v62, %v1731_v13  ;;  %v2081_v3 = vrot.slane %v8261_v14, 1  ;;  %v1860_v62 = vld [vmem:[%s10310_s3 + $0xe8] sm:$0xff]  ;;  %v1861_v2 = vld [vmem:[%s10310_s3 + $0xf0] sm:$0xff]  ;;  %v1858_v5 = vld [vmem:[%s10310_s3 + $0xd8] sm:$0xff] }
 0x259   : > { %v1733_v31 = vpop.f32.mrf.mxu1  ;;  %v1855_v12 = vld [vmem:[%s10310_s3 + $0xc0] sm:$0xff]  ;;  %v1852_v13 = vld [vmem:[%s10310_s3 + $0xa8] sm:$0xff] }
 0x25a   : > { %v8267_v16 = vmax.f32 %v1822_v33, 0.0  ;;  %v1823_v61 = vadd.f32 %v1815_v7, %v1543_v32  ;;  %v1817_v36 = vadd.f32 %v1816_v53, %v1733_v31  ;;  %v2079_v52 = vrot.slane %v8263_v6, 1  ;;  %v1857_v32 = vld [vmem:[%s10310_s3 + $0xd0] sm:$0xff]  ;;  %v1854_v33 = vld [vmem:[%s10310_s3 + $0xb8] sm:$0xff]  ;;  %v1851_v7 = vld [vmem:[%s10310_s3 + $0xa0] sm:$0xff] }
 0x25b   : > { %v1853_v53 = vld [vmem:[%s10310_s3 + $0xb0] sm:$0xff]  ;;  %v1848_v31 = vld [vmem:[%s10310_s3 + $0x88] sm:$0xff] }
 0x25c   : > { %v1824_v60 = vadd.f32 %v1817_v36, %v1545_v43  ;;  %v2082_v63 = vrot.slane %v8267_v16, 1  ;;  %v8272_v18 = vmax.f32 %v1823_v61, 0.0  ;;  %v2080_v22 = vsel %vm390_vm1, %v2078_v19, %v2079_v52  ;;  %v1850_v43 = vld [vmem:[%s10310_s3 + $0x98] sm:$0xff]  ;;  %v1847_v61 = vld [vmem:[%s10310_s3 + $0x80] sm:$0xff]  ;;  %v1849_v36 = vld [vmem:[%s10310_s3 + $0x90] sm:$0xff] }
 0x25d   : > { %v1840_v19 = vld [vmem:[%s10310_s3 + $0x48] sm:$0xff] }
 0x25e   : > { %v8275_v20 = vmax.f32 %v1824_v60, 0.0  ;;  %v2083_v21 = vsel %vm390_vm1, %v2081_v3, %v2082_v63  ;;  %v2084_v26 = vrot.slane %v8272_v18, 1  ;;  %v1846_v60 = vld [vmem:[%s10310_s3 + $0x78] sm:$0xff]  ;;  %v1843_v3 = vld [vmem:[%s10310_s3 + $0x60] sm:$0xff] }
 0x25f   : > { %5979 = vmatprep.mubr.msk.f32.mxu0 %vm2091_vm5, %v2083_v21  ;;  %5982 = vmatprep.mubr.msk.f32.mxu1 %vm2091_vm5, %v2083_v21  ;;  %v1842_v21 = vld [vmem:[%s10310_s3 + $0x58] sm:$0xff] }
 0x260   : > { %2163 = vmatmul.mubr.f32.vlgmr.msra.gmra.mxu0 %v2080_v22  ;;  %2246 = vmatmul.mubr.f32.vlgmr.msra.gmra.mxu1 %v2080_v22  ;;  %v2086_v25 = vrot.slane %v8275_v20, 1  ;;  %v2085_v35 = vsel %vm390_vm1, %v2079_v52, %v2084_v26  ;;  %v1844_v52 = vld [vmem:[%s10310_s3 + $0x68] sm:$0xff] }
 0x261   : > { %2271 = vmatpush1.msra.mxu0 %v1891_v10  ;;  %2354 = vmatpush1.msra.mxu1 %v1893_v11  ;;  %v1839_v10 = vld [vmem:[%s10310_s3 + $0x40] sm:$0xff]  ;;  %v1841_v11 = vld [vmem:[%s10310_s3 + $0x50] sm:$0xff]  ;;  %v1836_v22 = vld [vmem:[%s10310_s3 + $0x28] sm:$0xff] }
 0x262   : > { %2272 = vmatprep.subr.mxu0 %v1888_v23  ;;  %2355 = vmatprep.subr.mxu1 %v1890_v24  ;;  %v2087_v27 = vsel %vm390_vm1, %v2082_v63, %v2086_v25  ;;  %v1845_v63 = vld [vmem:[%s10310_s3 + $0x70] sm:$0xff]  ;;  %v1838_v23 = vld [vmem:[%s10310_s3 + $0x38] sm:$0xff]  ;;  %v1835_v24 = vld [vmem:[%s10310_s3 + $0x20] sm:$0xff] }
 0x263   : > { %2273 = vmatpush1.msra.mxu0 %v1887_v8  ;;  %2356 = vmatpush1.msra.mxu1 %v1889_v9  ;;  %v1837_v8 = vld [vmem:[%s10310_s3 + $0x30] sm:$0xff]  ;;  %v1832_v9 = vld [vmem:[%s10310_s3 + $0x8] sm:$0xff] }
 0x264   : > { %5980 = vmatprep.mubr.msk.f32.mxu0 %vm2091_vm5, %v2087_v27  ;;  %5983 = vmatprep.mubr.msk.f32.mxu1 %vm2091_vm5, %v2087_v27  ;;  %v1833_v27 = vld [vmem:[%s10310_s3 + $0x10] sm:$0xff] }
 0x265   : > { %2274 = vmatprep.subr.mxu0 %v1884_v28  ;;  %2357 = vmatprep.subr.mxu1 %v1886_v29  ;;  %v1948_v28 = vld [vmem:[%s10310_s3 + $0x3a8] sm:$0xff]  ;;  %v1950_v29 = vld [vmem:[%s10310_s3 + $0x3b8] sm:$0xff] }
 0x266   : > { %2169 = vmatmul.mubr.f32.gmra.mxu0 %v2085_v35  ;;  %2252 = vmatmul.mubr.f32.gmra.mxu1 %v2085_v35  ;;  %v1944_v35 = vld [vmem:[%s10310_s3 + $0x388] sm:$0xff] }
 0x267   : > { %2275 = vmatpush1.msra.mxu0 %v1883_v30  ;;  %2358 = vmatpush1.msra.mxu1 %v1885_v34  ;;  %v1947_v30 = vld [vmem:[%s10310_s3 + $0x3a0] sm:$0xff]  ;;  %v1949_v34 = vld [vmem:[%s10310_s3 + $0x3b0] sm:$0xff] }
 0x268   : > { %5981 = vmatprep.mubr.msk.f32.mxu0 %vm2091_vm5, %v2086_v25  ;;  %5984 = vmatprep.mubr.msk.f32.mxu1 %vm2091_vm5, %v2086_v25  ;;  %v1834_v25 = vld [vmem:[%s10310_s3 + $0x18] sm:$0xff] }
 0x269   : > { %2276 = vmatprep.subr.mxu0 %v1880_v37  ;;  %2359 = vmatprep.subr.mxu1 %v1882_v38  ;;  %v1946_v37 = vld [vmem:[%s10310_s3 + $0x398] sm:$0xff]  ;;  %v1943_v38 = vld [vmem:[%s10310_s3 + $0x380] sm:$0xff] }
 0x26a   : > { %2277 = vmatpush1.msra.mxu0 %v1879_v39  ;;  %2360 = vmatpush1.msra.mxu1 %v1881_v40  ;;  %v1945_v39 = vld [vmem:[%s10310_s3 + $0x390] sm:$0xff]  ;;  %v1940_v40 = vld [vmem:[%s10310_s3 + $0x368] sm:$0xff] }
 0x26b   : > { %2278 = vmatprep.subr.mxu0 %v1876_v41  ;;  %2361 = vmatprep.subr.mxu1 %v1878_v42  ;;  %v1942_v41 = vld [vmem:[%s10310_s3 + $0x378] sm:$0xff]  ;;  %v1939_v42 = vld [vmem:[%s10310_s3 + $0x360] sm:$0xff] }
 0x26c   : > { %2175 = vmatmul.mubr.f32.gmra.mxu0 %v2084_v26  ;;  %2258 = vmatmul.mubr.f32.gmra.mxu1 %v2084_v26  ;;  %v1831_v26 = vld [vmem:[%s10310_s3] sm:$0xff] }
 0x26d   : > { %2279 = vmatpush1.msra.mxu0 %v1875_v44  ;;  %2362 = vmatpush1.msra.mxu1 %v1877_v45  ;;  %v1941_v44 = vld [vmem:[%s10310_s3 + $0x370] sm:$0xff]  ;;  %v1936_v45 = vld [vmem:[%s10310_s3 + $0x348] sm:$0xff] }
 0x26e   : > { %2280 = vmatprep.subr.mxu0 %v1872_v46  ;;  %5985 = vmatprep.mubr.msk.f32.mxu0 %vm2091_vm5, %v8261_v14  ;;  %v1938_v46 = vld [vmem:[%s10310_s3 + $0x358] sm:$0xff] }
 0x26f   : > { %2363 = vmatprep.subr.mxu1 %v1874_v47  ;;  %5988 = vmatprep.mubr.msk.f32.mxu1 %vm2091_vm5, %v8261_v14  ;;  %v1935_v47 = vld [vmem:[%s10310_s3 + $0x340] sm:$0xff] }
 0x270   : > { %2281 = vmatpush1.msra.mxu0 %v1871_v48  ;;  %2364 = vmatpush1.msra.mxu1 %v1873_v49  ;;  %v1937_v48 = vld [vmem:[%s10310_s3 + $0x350] sm:$0xff]  ;;  %v1932_v49 = vld [vmem:[%s10310_s3 + $0x328] sm:$0xff] }
 0x271   : > { %2282 = vmatprep.subr.mxu0 %v1868_v50  ;;  %2365 = vmatprep.subr.mxu1 %v1870_v51  ;;  %v1934_v50 = vld [vmem:[%s10310_s3 + $0x338] sm:$0xff]  ;;  %v1931_v51 = vld [vmem:[%s10310_s3 + $0x320] sm:$0xff] }
 0x272   : > { %2283 = vmatpush1.msra.mxu0 %v1867_v54  ;;  %2366 = vmatpush1.msra.mxu1 %v1869_v55  ;;  %v1933_v54 = vld [vmem:[%s10310_s3 + $0x330] sm:$0xff]  ;;  %v1928_v55 = vld [vmem:[%s10310_s3 + $0x308] sm:$0xff] }
 0x273   : > { %2284 = vmatprep.subr.mxu0 %v1864_v56  ;;  %2367 = vmatprep.subr.mxu1 %v1866_v57  ;;  %v1930_v56 = vld [vmem:[%s10310_s3 + $0x318] sm:$0xff]  ;;  %v1927_v57 = vld [vmem:[%s10310_s3 + $0x300] sm:$0xff] }
 0x274   : > { %2285 = vmatpush1.msra.mxu0 %v1863_v58  ;;  %2368 = vmatpush1.msra.mxu1 %v1865_v59  ;;  %v1929_v58 = vld [vmem:[%s10310_s3 + $0x310] sm:$0xff]  ;;  %v1924_v59 = vld [vmem:[%s10310_s3 + $0x2e8] sm:$0xff] }
 0x275   : > { %2286 = vmatprep.subr.mxu0 %v1860_v62  ;;  %2369 = vmatprep.subr.mxu1 %v1862_v0  ;;  %v1926_v62 = vld [vmem:[%s10310_s3 + $0x2f8] sm:$0xff]  ;;  %v1923_v0 = vld [vmem:[%s10310_s3 + $0x2e0] sm:$0xff] }
 0x276   : > { %2287 = vmatpush1.msra.mxu0 %v1859_v1  ;;  %2370 = vmatpush1.msra.mxu1 %v1861_v2  ;;  %v1925_v1 = vld [vmem:[%s10310_s3 + $0x2f0] sm:$0xff]  ;;  %v1920_v2 = vld [vmem:[%s10310_s3 + $0x2c8] sm:$0xff] }
 0x277   : > { %2288 = vmatprep.subr.mxu0 %v1856_v4  ;;  %2371 = vmatprep.subr.mxu1 %v1858_v5  ;;  %v1922_v4 = vld [vmem:[%s10310_s3 + $0x2d8] sm:$0xff]  ;;  %v1919_v5 = vld [vmem:[%s10310_s3 + $0x2c0] sm:$0xff] }
 0x278   : > { %2289 = vmatpush1.msra.mxu0 %v1855_v12  ;;  %2372 = vmatpush1.msra.mxu1 %v1857_v32  ;;  %v1921_v12 = vld [vmem:[%s10310_s3 + $0x2d0] sm:$0xff]  ;;  %v1916_v32 = vld [vmem:[%s10310_s3 + $0x2a8] sm:$0xff] }
 0x279   : > { %2290 = vmatprep.subr.mxu0 %v1852_v13  ;;  %2373 = vmatprep.subr.mxu1 %v1854_v33  ;;  %v1918_v13 = vld [vmem:[%s10310_s3 + $0x2b8] sm:$0xff]  ;;  %v1915_v33 = vld [vmem:[%s10310_s3 + $0x2a0] sm:$0xff] }
 0x27a   : > { %2291 = vmatpush1.msra.mxu0 %v1851_v7  ;;  %2374 = vmatpush1.msra.mxu1 %v1853_v53  ;;  %v1917_v7 = vld [vmem:[%s10310_s3 + $0x2b0] sm:$0xff]  ;;  %v1912_v53 = vld [vmem:[%s10310_s3 + $0x288] sm:$0xff] }
 0x27b   : > { %2292 = vmatprep.subr.mxu0 %v1848_v31  ;;  %2375 = vmatprep.subr.mxu1 %v1850_v43  ;;  %v1914_v31 = vld [vmem:[%s10310_s3 + $0x298] sm:$0xff]  ;;  %v1911_v43 = vld [vmem:[%s10310_s3 + $0x280] sm:$0xff] }
 0x27c   : > { %2293 = vmatpush1.msra.mxu0 %v1847_v61  ;;  %2376 = vmatpush1.msra.mxu1 %v1849_v36  ;;  %v1913_v61 = vld [vmem:[%s10310_s3 + $0x290] sm:$0xff]  ;;  %v1908_v36 = vld [vmem:[%s10310_s3 + $0x268] sm:$0xff] }
 0x27d   : > { %2294 = vmatprep.subr.mxu0 %v1844_v52  ;;  %2377 = vmatprep.subr.mxu1 %v1846_v60  ;;  %v1910_v52 = vld [vmem:[%s10310_s3 + $0x278] sm:$0xff]  ;;  %v1907_v60 = vld [vmem:[%s10310_s3 + $0x260] sm:$0xff] }
 0x27e   : > { %2295 = vmatpush1.msra.mxu0 %v1843_v3  ;;  %2378 = vmatpush1.msra.mxu1 %v1845_v63  ;;  %v1909_v3 = vld [vmem:[%s10310_s3 + $0x270] sm:$0xff]  ;;  %v1904_v63 = vld [vmem:[%s10310_s3 + $0x248] sm:$0xff] }
 0x27f   : > { %2296 = vmatprep.subr.mxu0 %v1840_v19  ;;  %2379 = vmatprep.subr.mxu1 %v1842_v21  ;;  %v1906_v19 = vld [vmem:[%s10310_s3 + $0x258] sm:$0xff]  ;;  %v1903_v21 = vld [vmem:[%s10310_s3 + $0x240] sm:$0xff] }
 0x280   : > { %2297 = vmatpush1.msra.mxu0 %v1839_v10  ;;  %2380 = vmatpush1.msra.mxu1 %v1841_v11  ;;  %v1905_v10 = vld [vmem:[%s10310_s3 + $0x250] sm:$0xff]  ;;  %v1900_v11 = vld [vmem:[%s10310_s3 + $0x228] sm:$0xff] }
 0x281   : > { %2298 = vmatprep.subr.mxu0 %v1836_v22  ;;  %2381 = vmatprep.subr.mxu1 %v1838_v23  ;;  %v1902_v22 = vld [vmem:[%s10310_s3 + $0x238] sm:$0xff]  ;;  %v1899_v23 = vld [vmem:[%s10310_s3 + $0x220] sm:$0xff] }
 0x282   : > { %2299 = vmatpush1.msra.mxu0 %v1835_v24  ;;  %2382 = vmatpush1.msra.mxu1 %v1837_v8  ;;  %v1901_v24 = vld [vmem:[%s10310_s3 + $0x230] sm:$0xff]  ;;  %v1896_v8 = vld [vmem:[%s10310_s3 + $0x208] sm:$0xff] }
 0x283   : > { %2300 = vmatprep.subr.mxu0 %v1832_v9  ;;  %2383 = vmatprep.subr.mxu1 %v1834_v25  ;;  %v1898_v9 = vld [vmem:[%s10310_s3 + $0x218] sm:$0xff]  ;;  %v1895_v25 = vld [vmem:[%s10310_s3 + $0x200] sm:$0xff] }
 0x284   : > { %2301 = vmatpush1.msra.mxu0 %v1831_v26  ;;  %2384 = vmatpush1.msra.mxu1 %v1833_v27  ;;  %v1897_v26 = vld [vmem:[%s10310_s3 + $0x210] sm:$0xff]  ;;  %v6052_v27 = vld [vmem:[%s10310_s3 + $0x968] sm:$0xff] }
 0x285   : > { %2306 = vmatprep.subr.mxu0 %v1948_v28  ;;  %2389 = vmatprep.subr.mxu1 %v1950_v29  ;;  %v6054_v28 = vld [vmem:[%s10310_s3 + $0x978] sm:$0xff]  ;;  %v6051_v29 = vld [vmem:[%s10310_s3 + $0x960] sm:$0xff] }
 0x286   : > { %2307 = vmatpush2.msra.mxu0 %v1947_v30  ;;  %2390 = vmatpush2.msra.mxu1 %v1949_v34  ;;  %v6053_v30 = vld [vmem:[%s10310_s3 + $0x970] sm:$0xff]  ;;  %v6048_v34 = vld [vmem:[%s10310_s3 + $0x948] sm:$0xff] }
 0x287   : > { %2308 = vmatprep.subr.mxu0 %v1944_v35  ;;  %2391 = vmatprep.subr.mxu1 %v1946_v37  ;;  %v6050_v35 = vld [vmem:[%s10310_s3 + $0x958] sm:$0xff]  ;;  %v6047_v37 = vld [vmem:[%s10310_s3 + $0x940] sm:$0xff] }
 0x288   : > { %2309 = vmatpush2.msra.mxu0 %v1943_v38  ;;  %2392 = vmatpush2.msra.mxu1 %v1945_v39  ;;  %v6049_v38 = vld [vmem:[%s10310_s3 + $0x950] sm:$0xff]  ;;  %v6044_v39 = vld [vmem:[%s10310_s3 + $0x928] sm:$0xff] }
 0x289   : > { %2310 = vmatprep.subr.mxu0 %v1940_v40  ;;  %2393 = vmatprep.subr.mxu1 %v1942_v41  ;;  %v6046_v40 = vld [vmem:[%s10310_s3 + $0x938] sm:$0xff]  ;;  %v6043_v41 = vld [vmem:[%s10310_s3 + $0x920] sm:$0xff] }
 0x28a   : > { %2311 = vmatpush2.msra.mxu0 %v1939_v42  ;;  %2394 = vmatpush2.msra.mxu1 %v1941_v44  ;;  %v6045_v42 = vld [vmem:[%s10310_s3 + $0x930] sm:$0xff]  ;;  %v6040_v44 = vld [vmem:[%s10310_s3 + $0x908] sm:$0xff] }
 0x28b   : > { %2312 = vmatprep.subr.mxu0 %v1936_v45  ;;  %2395 = vmatprep.subr.mxu1 %v1938_v46  ;;  %v6042_v45 = vld [vmem:[%s10310_s3 + $0x918] sm:$0xff]  ;;  %v6039_v46 = vld [vmem:[%s10310_s3 + $0x900] sm:$0xff] }
 0x28c   : > { %2313 = vmatpush2.msra.mxu0 %v1935_v47  ;;  %2396 = vmatpush2.msra.mxu1 %v1937_v48  ;;  %v6041_v47 = vld [vmem:[%s10310_s3 + $0x910] sm:$0xff]  ;;  %v2561_v48 = vrot.slane %v8267_v16, 2 }
 0x28d   : > { %2314 = vmatprep.subr.mxu0 %v1932_v49  ;;  %2397 = vmatprep.subr.mxu1 %v1934_v50  ;;  %v6036_v49 = vld [vmem:[%s10310_s3 + $0x8e8] sm:$0xff]  ;;  %v6038_v50 = vld [vmem:[%s10310_s3 + $0x8f8] sm:$0xff] }
 0x28e   : > { %2315 = vmatpush2.msra.mxu0 %v1931_v51  ;;  %2398 = vmatpush2.msra.mxu1 %v1933_v54  ;;  %v6035_v51 = vld [vmem:[%s10310_s3 + $0x8e0] sm:$0xff]  ;;  %v2560_v54 = vrot.slane %v8261_v14, 2  ;;  %v6034_v14 = vld [vmem:[%s10310_s3 + $0x8d8] sm:$0xff] }
 0x28f   : > { %2316 = vmatprep.subr.mxu0 %v1928_v55  ;;  %2399 = vmatprep.subr.mxu1 %v1930_v56  ;;  %v6037_v55 = vld [vmem:[%s10310_s3 + $0x8f0] sm:$0xff] }
 0x290   : > { %2317 = vmatpush2.msra.mxu0 %v1927_v57  ;;  %2400 = vmatpush2.msra.mxu1 %v1929_v58  ;;  %v2562_v56 = vsel %vm795_vm3, %v2560_v54, %v2561_v48  ;;  %v6032_v57 = vld [vmem:[%s10310_s3 + $0x8c8] sm:$0xff]  ;;  %v6031_v58 = vld [vmem:[%s10310_s3 + $0x8c0] sm:$0xff] }
 0x291   : > { %2318 = vmatprep.subr.mxu0 %v1924_v59  ;;  %2401 = vmatprep.subr.mxu1 %v1926_v62  ;;  %v6033_v59 = vld [vmem:[%s10310_s3 + $0x8d0] sm:$0xff]  ;;  %v6028_v62 = vld [vmem:[%s10310_s3 + $0x8a8] sm:$0xff]  ;;  %v6099_v54 = vld [vmem:[%s10310_s3 + $0xae0] sm:$0xff] }
 0x292   : > { %2319 = vmatpush2.msra.mxu0 %v1923_v0  ;;  %2402 = vmatpush2.msra.mxu1 %v1925_v1  ;;  %v6030_v0 = vld [vmem:[%s10310_s3 + $0x8b8] sm:$0xff]  ;;  %v6027_v1 = vld [vmem:[%s10310_s3 + $0x8a0] sm:$0xff] }
 0x293   : > { %2320 = vmatprep.subr.mxu0 %v1920_v2  ;;  %2403 = vmatprep.subr.mxu1 %v1922_v4  ;;  %v6029_v2 = vld [vmem:[%s10310_s3 + $0x8b0] sm:$0xff]  ;;  %v6024_v4 = vld [vmem:[%s10310_s3 + $0x888] sm:$0xff] }
 0x294   : > { %2321 = vmatpush2.msra.mxu0 %v1919_v5  ;;  %2404 = vmatpush2.msra.mxu1 %v1921_v12  ;;  %v6026_v5 = vld [vmem:[%s10310_s3 + $0x898] sm:$0xff]  ;;  %v6023_v12 = vld [vmem:[%s10310_s3 + $0x880] sm:$0xff] }
 0x295   : > { %2322 = vmatprep.subr.mxu0 %v1916_v32  ;;  %2405 = vmatprep.subr.mxu1 %v1918_v13  ;;  %v6025_v32 = vld [vmem:[%s10310_s3 + $0x890] sm:$0xff]  ;;  %v6020_v13 = vld [vmem:[%s10310_s3 + $0x868] sm:$0xff] }
 0x296   : > { %2323 = vmatpush2.msra.mxu0 %v1915_v33  ;;  %2406 = vmatpush2.msra.mxu1 %v1917_v7  ;;  %v6022_v33 = vld [vmem:[%s10310_s3 + $0x878] sm:$0xff]  ;;  %v6019_v7 = vld [vmem:[%s10310_s3 + $0x860] sm:$0xff] }
 0x297   : > { %2324 = vmatprep.subr.mxu0 %v1912_v53  ;;  %2407 = vmatprep.subr.mxu1 %v1914_v31  ;;  %v6021_v53 = vld [vmem:[%s10310_s3 + $0x870] sm:$0xff]  ;;  %v6016_v31 = vld [vmem:[%s10310_s3 + $0x848] sm:$0xff] }
 0x298   : > { %2325 = vmatpush2.msra.mxu0 %v1911_v43  ;;  %2408 = vmatpush2.msra.mxu1 %v1913_v61  ;;  %v6018_v43 = vld [vmem:[%s10310_s3 + $0x858] sm:$0xff]  ;;  %v6015_v61 = vld [vmem:[%s10310_s3 + $0x840] sm:$0xff] }
 0x299   : > { %2326 = vmatprep.subr.mxu0 %v1908_v36  ;;  %2409 = vmatprep.subr.mxu1 %v1910_v52  ;;  %v6017_v36 = vld [vmem:[%s10310_s3 + $0x850] sm:$0xff]  ;;  %v6012_v52 = vld [vmem:[%s10310_s3 + $0x828] sm:$0xff] }
 0x29a   : > { %2327 = vmatpush2.msra.mxu0 %v1907_v60  ;;  %2410 = vmatpush2.msra.mxu1 %v1909_v3  ;;  %v6014_v60 = vld [vmem:[%s10310_s3 + $0x838] sm:$0xff]  ;;  %v6011_v3 = vld [vmem:[%s10310_s3 + $0x820] sm:$0xff] }
 0x29b   : > { %2328 = vmatprep.subr.mxu0 %v1904_v63  ;;  %2411 = vmatprep.subr.mxu1 %v1906_v19  ;;  %v6013_v63 = vld [vmem:[%s10310_s3 + $0x830] sm:$0xff]  ;;  %v6008_v19 = vld [vmem:[%s10310_s3 + $0x808] sm:$0xff] }
 0x29c   : > { %2329 = vmatpush2.msra.mxu0 %v1903_v21  ;;  %2412 = vmatpush2.msra.mxu1 %v1905_v10  ;;  %v6010_v21 = vld [vmem:[%s10310_s3 + $0x818] sm:$0xff]  ;;  %v6007_v10 = vld [vmem:[%s10310_s3 + $0x800] sm:$0xff] }
 0x29d   : > { %2330 = vmatprep.subr.mxu0 %v1900_v11  ;;  %2413 = vmatprep.subr.mxu1 %v1902_v22  ;;  %v6009_v11 = vld [vmem:[%s10310_s3 + $0x810] sm:$0xff]  ;;  %v6004_v22 = vld [vmem:[%s10310_s3 + $0x7e8] sm:$0xff] }
 0x29e   : > { %2331 = vmatpush2.msra.mxu0 %v1899_v23  ;;  %2414 = vmatpush2.msra.mxu1 %v1901_v24  ;;  %v6006_v23 = vld [vmem:[%s10310_s3 + $0x7f8] sm:$0xff]  ;;  %v6003_v24 = vld [vmem:[%s10310_s3 + $0x7e0] sm:$0xff] }
 0x29f   : > { %2332 = vmatprep.subr.mxu0 %v1896_v8  ;;  %2415 = vmatprep.subr.mxu1 %v1898_v9  ;;  %v6005_v8 = vld [vmem:[%s10310_s3 + $0x7f0] sm:$0xff]  ;;  %v6000_v9 = vld [vmem:[%s10310_s3 + $0x7c8] sm:$0xff] }
 0x2a0   : > { %2333 = vmatpush2.msra.mxu0 %v1895_v25  ;;  %2416 = vmatpush2.msra.mxu1 %v1897_v26  ;;  %v6002_v25 = vld [vmem:[%s10310_s3 + $0x7d8] sm:$0xff]  ;;  %v5999_v26 = vld [vmem:[%s10310_s3 + $0x7c0] sm:$0xff] }
 0x2a1   : > { %2335 = vmatmul.mubr.f32.vlgmr.msra.gmra.mxu0 %v8265_v15  ;;  %2418 = vmatmul.mubr.f32.vlgmr.msra.gmra.mxu1 %v8265_v15 }
 0x2a2   : > { %2576 = vmatprep.subr.mxu0 %v6052_v27  ;;  %2659 = vmatprep.subr.mxu1 %v6054_v28  ;;  %v6001_v27 = vld [vmem:[%s10310_s3 + $0x7d0] sm:$0xff]  ;;  %v5996_v28 = vld [vmem:[%s10310_s3 + $0x7a8] sm:$0xff] }
 0x2a3   : > { %5986 = vmatprep.mubr.msk.f32.mxu0 %vm2091_vm5, %v8267_v16  ;;  %5989 = vmatprep.mubr.msk.f32.mxu1 %vm2091_vm5, %v8267_v16 }
 0x2a4   : > { %2577 = vmatpush1.msra.mxu0 %v6051_v29  ;;  %2660 = vmatpush1.msra.mxu1 %v6053_v30  ;;  %v5998_v29 = vld [vmem:[%s10310_s3 + $0x7b8] sm:$0xff]  ;;  %v5995_v30 = vld [vmem:[%s10310_s3 + $0x7a0] sm:$0xff] }
 0x2a5   : > { %2578 = vmatprep.subr.mxu0 %v6048_v34  ;;  %2661 = vmatprep.subr.mxu1 %v6050_v35  ;;  %v5997_v34 = vld [vmem:[%s10310_s3 + $0x7b0] sm:$0xff]  ;;  %v5992_v35 = vld [vmem:[%s10310_s3 + $0x788] sm:$0xff] }
 0x2a6   : > { %2579 = vmatpush1.msra.mxu0 %v6047_v37  ;;  %2662 = vmatpush1.msra.mxu1 %v6049_v38  ;;  %v5994_v37 = vld [vmem:[%s10310_s3 + $0x798] sm:$0xff]  ;;  %v5991_v38 = vld [vmem:[%s10310_s3 + $0x780] sm:$0xff] }
 0x2a7   : > { %2341 = vmatmul.mubr.f32.gmra.mxu0 %v8263_v6  ;;  %2424 = vmatmul.mubr.f32.gmra.mxu1 %v8263_v6 }
 0x2a8   : > { %2580 = vmatprep.subr.mxu0 %v6044_v39  ;;  %2663 = vmatprep.subr.mxu1 %v6046_v40  ;;  %v5993_v39 = vld [vmem:[%s10310_s3 + $0x790] sm:$0xff]  ;;  %v6108_v40 = vld [vmem:[%s10310_s3 + $0xb28] sm:$0xff] }
 0x2a9   : > { %5987 = vmatprep.mubr.msk.f32.mxu0 %vm2091_vm5, %v8275_v20  ;;  %5990 = vmatprep.mubr.msk.f32.mxu1 %vm2091_vm5, %v8275_v20 }
 0x2aa   : > { %2581 = vmatpush1.msra.mxu0 %v6043_v41  ;;  %2664 = vmatpush1.msra.mxu1 %v6045_v42  ;;  %v6110_v41 = vld [vmem:[%s10310_s3 + $0xb38] sm:$0xff]  ;;  %v6107_v42 = vld [vmem:[%s10310_s3 + $0xb20] sm:$0xff] }
 0x2ab   : > { %2582 = vmatprep.subr.mxu0 %v6040_v44  ;;  %2665 = vmatprep.subr.mxu1 %v6042_v45  ;;  %v6109_v44 = vld [vmem:[%s10310_s3 + $0xb30] sm:$0xff]  ;;  %v6104_v45 = vld [vmem:[%s10310_s3 + $0xb08] sm:$0xff] }
 0x2ac   : > { %2583 = vmatpush1.msra.mxu0 %v6039_v46  ;;  %2666 = vmatpush1.msra.mxu1 %v6041_v47  ;;  %v6106_v46 = vld [vmem:[%s10310_s3 + $0xb18] sm:$0xff]  ;;  %v6103_v47 = vld [vmem:[%s10310_s3 + $0xb00] sm:$0xff] }
 0x2ad   : > { %2347 = vmatmul.mubr.f32.gmra.mxu0 %v8272_v18  ;;  %2430 = vmatmul.mubr.f32.gmra.mxu1 %v8272_v18 }
 0x2ae   : > { %2584 = vmatprep.subr.mxu0 %v6036_v49  ;;  %2667 = vmatprep.subr.mxu1 %v6038_v50  ;;  %v6105_v49 = vld [vmem:[%s10310_s3 + $0xb10] sm:$0xff]  ;;  %v6100_v50 = vld [vmem:[%s10310_s3 + $0xae8] sm:$0xff] }
 0x2af   : > { %2585 = vmatpush1.msra.mxu0 %v6035_v51  ;;  %6111 = vmatprep.mubr.msk.f32.mxu0 %vm2091_vm5, %v2562_v56  ;;  %v6102_v51 = vld [vmem:[%s10310_s3 + $0xaf8] sm:$0xff] }
 0x2b0   : > { %2668 = vmatpush1.msra.mxu1 %v6037_v55  ;;  %6114 = vmatprep.mubr.msk.f32.mxu1 %vm2091_vm5, %v2562_v56  ;;  %v6101_v55 = vld [vmem:[%s10310_s3 + $0xaf0] sm:$0xff]  ;;  %v6096_v56 = vld [vmem:[%s10310_s3 + $0xac8] sm:$0xff] }
 0x2b1   : > { %2586 = vmatprep.subr.mxu0 %v6032_v57  ;;  %2669 = vmatprep.subr.mxu1 %v6034_v14  ;;  %v6098_v57 = vld [vmem:[%s10310_s3 + $0xad8] sm:$0xff]  ;;  %v6095_v14 = vld [vmem:[%s10310_s3 + $0xac0] sm:$0xff] }
 0x2b2   : > { %2587 = vmatpush1.msra.mxu0 %v6031_v58  ;;  %2670 = vmatpush1.msra.mxu1 %v6033_v59  ;;  %v6097_v58 = vld [vmem:[%s10310_s3 + $0xad0] sm:$0xff]  ;;  %v6092_v59 = vld [vmem:[%s10310_s3 + $0xaa8] sm:$0xff] }
 0x2b3   : > { %2588 = vmatprep.subr.mxu0 %v6028_v62  ;;  %2671 = vmatprep.subr.mxu1 %v6030_v0  ;;  %v6094_v62 = vld [vmem:[%s10310_s3 + $0xab8] sm:$0xff]  ;;  %v6091_v0 = vld [vmem:[%s10310_s3 + $0xaa0] sm:$0xff] }
 0x2b4   : > { %2589 = vmatpush1.msra.mxu0 %v6027_v1  ;;  %2672 = vmatpush1.msra.mxu1 %v6029_v2  ;;  %v6093_v1 = vld [vmem:[%s10310_s3 + $0xab0] sm:$0xff]  ;;  %v6088_v2 = vld [vmem:[%s10310_s3 + $0xa88] sm:$0xff] }
 0x2b5   : > { %2590 = vmatprep.subr.mxu0 %v6024_v4  ;;  %2673 = vmatprep.subr.mxu1 %v6026_v5  ;;  %v6090_v4 = vld [vmem:[%s10310_s3 + $0xa98] sm:$0xff]  ;;  %v6087_v5 = vld [vmem:[%s10310_s3 + $0xa80] sm:$0xff] }
 0x2b6   : > { %2591 = vmatpush1.msra.mxu0 %v6023_v12  ;;  %2674 = vmatpush1.msra.mxu1 %v6025_v32  ;;  %v6089_v12 = vld [vmem:[%s10310_s3 + $0xa90] sm:$0xff]  ;;  %v6084_v32 = vld [vmem:[%s10310_s3 + $0xa68] sm:$0xff] }
 0x2b7   : > { %2592 = vmatprep.subr.mxu0 %v6020_v13  ;;  %2675 = vmatprep.subr.mxu1 %v6022_v33  ;;  %v6086_v13 = vld [vmem:[%s10310_s3 + $0xa78] sm:$0xff]  ;;  %v6083_v33 = vld [vmem:[%s10310_s3 + $0xa60] sm:$0xff] }
 0x2b8   : > { %2593 = vmatpush1.msra.mxu0 %v6019_v7  ;;  %2676 = vmatpush1.msra.mxu1 %v6021_v53  ;;  %v6085_v7 = vld [vmem:[%s10310_s3 + $0xa70] sm:$0xff]  ;;  %v6080_v53 = vld [vmem:[%s10310_s3 + $0xa48] sm:$0xff] }
 0x2b9   : > { %2594 = vmatprep.subr.mxu0 %v6016_v31  ;;  %2677 = vmatprep.subr.mxu1 %v6018_v43  ;;  %v6082_v31 = vld [vmem:[%s10310_s3 + $0xa58] sm:$0xff]  ;;  %v6079_v43 = vld [vmem:[%s10310_s3 + $0xa40] sm:$0xff] }
 0x2ba   : > { %2595 = vmatpush1.msra.mxu0 %v6015_v61  ;;  %2678 = vmatpush1.msra.mxu1 %v6017_v36  ;;  %v6081_v61 = vld [vmem:[%s10310_s3 + $0xa50] sm:$0xff]  ;;  %v6076_v36 = vld [vmem:[%s10310_s3 + $0xa28] sm:$0xff] }
 0x2bb   : > { %2596 = vmatprep.subr.mxu0 %v6012_v52  ;;  %2679 = vmatprep.subr.mxu1 %v6014_v60  ;;  %v6078_v52 = vld [vmem:[%s10310_s3 + $0xa38] sm:$0xff]  ;;  %v6075_v60 = vld [vmem:[%s10310_s3 + $0xa20] sm:$0xff] }
 0x2bc   : > { %2597 = vmatpush1.msra.mxu0 %v6011_v3  ;;  %2680 = vmatpush1.msra.mxu1 %v6013_v63  ;;  %v6077_v3 = vld [vmem:[%s10310_s3 + $0xa30] sm:$0xff]  ;;  %v6072_v63 = vld [vmem:[%s10310_s3 + $0xa08] sm:$0xff] }
 0x2bd   : > { %2598 = vmatprep.subr.mxu0 %v6008_v19  ;;  %2681 = vmatprep.subr.mxu1 %v6010_v21  ;;  %v6074_v19 = vld [vmem:[%s10310_s3 + $0xa18] sm:$0xff]  ;;  %v6071_v21 = vld [vmem:[%s10310_s3 + $0xa00] sm:$0xff] }
 0x2be   : > { %2599 = vmatpush1.msra.mxu0 %v6007_v10  ;;  %2682 = vmatpush1.msra.mxu1 %v6009_v11  ;;  %v6073_v10 = vld [vmem:[%s10310_s3 + $0xa10] sm:$0xff]  ;;  %v6068_v11 = vld [vmem:[%s10310_s3 + $0x9e8] sm:$0xff] }
 0x2bf   : > { %2600 = vmatprep.subr.mxu0 %v6004_v22  ;;  %2683 = vmatprep.subr.mxu1 %v6006_v23  ;;  %v6070_v22 = vld [vmem:[%s10310_s3 + $0x9f8] sm:$0xff]  ;;  %v6067_v23 = vld [vmem:[%s10310_s3 + $0x9e0] sm:$0xff] }
 0x2c0   : > { %2601 = vmatpush1.msra.mxu0 %v6003_v24  ;;  %2684 = vmatpush1.msra.mxu1 %v6005_v8  ;;  %v6069_v24 = vld [vmem:[%s10310_s3 + $0x9f0] sm:$0xff]  ;;  %v6064_v8 = vld [vmem:[%s10310_s3 + $0x9c8] sm:$0xff] }
 0x2c1   : > { %2602 = vmatprep.subr.mxu0 %v6000_v9  ;;  %2685 = vmatprep.subr.mxu1 %v6002_v25  ;;  %v6066_v9 = vld [vmem:[%s10310_s3 + $0x9d8] sm:$0xff]  ;;  %v6063_v25 = vld [vmem:[%s10310_s3 + $0x9c0] sm:$0xff] }
 0x2c2   : > { %2603 = vmatpush1.msra.mxu0 %v5999_v26  ;;  %2686 = vmatpush1.msra.mxu1 %v6001_v27  ;;  %v6065_v26 = vld [vmem:[%s10310_s3 + $0x9d0] sm:$0xff]  ;;  %v6060_v27 = vld [vmem:[%s10310_s3 + $0x9a8] sm:$0xff] }
 0x2c3   : > { %2604 = vmatprep.subr.mxu0 %v5996_v28  ;;  %2687 = vmatprep.subr.mxu1 %v5998_v29  ;;  %v6062_v28 = vld [vmem:[%s10310_s3 + $0x9b8] sm:$0xff]  ;;  %v6059_v29 = vld [vmem:[%s10310_s3 + $0x9a0] sm:$0xff] }
 0x2c4   : > { %2605 = vmatpush1.msra.mxu0 %v5995_v30  ;;  %2688 = vmatpush1.msra.mxu1 %v5997_v34  ;;  %v6061_v30 = vld [vmem:[%s10310_s3 + $0x9b0] sm:$0xff]  ;;  %v6056_v34 = vld [vmem:[%s10310_s3 + $0x988] sm:$0xff] }
 0x2c5   : > { %2606 = vmatprep.subr.mxu0 %v5992_v35  ;;  %2689 = vmatprep.subr.mxu1 %v5994_v37  ;;  %v6058_v35 = vld [vmem:[%s10310_s3 + $0x998] sm:$0xff]  ;;  %v2558_v37 = vrot.slane %v8263_v6, 2 }
 0x2c6   : > { %2607 = vmatpush1.msra.mxu0 %v5991_v38  ;;  %2690 = vmatpush1.msra.mxu1 %v5993_v39  ;;  %v6055_v38 = vld [vmem:[%s10310_s3 + $0x980] sm:$0xff]  ;;  %v6057_v39 = vld [vmem:[%s10310_s3 + $0x990] sm:$0xff] }
 0x2c7   : > { %2612 = vmatprep.subr.mxu0 %v6108_v40  ;;  %2695 = vmatprep.subr.mxu1 %v6110_v41  ;;  %v2565_v40 = vrot.slane %v8275_v20, 2  ;;  %v2557_v41 = vrot.slane %v8265_v15, 2 }
 0x2c8   : > { %2613 = vmatpush2.msra.mxu0 %v6107_v42  ;;  %2696 = vmatpush2.msra.mxu1 %v6109_v44  ;;  %v2563_v42 = vrot.slane %v8272_v18, 2 }
 0x2c9   : > { %2614 = vmatprep.subr.mxu0 %v6104_v45  ;;  %2697 = vmatprep.subr.mxu1 %v6106_v46  ;;  %v2559_v6 = vsel %vm795_vm3, %v2557_v41, %v2558_v37  ;;  %v2566_v44 = vsel %vm795_vm3, %v2561_v48, %v2565_v40 }
 0x2ca   : > { %2615 = vmatpush2.msra.mxu0 %v6103_v47  ;;  %2698 = vmatpush2.msra.mxu1 %v6105_v49  ;;  %v2564_v15 = vsel %vm795_vm3, %v2558_v37, %v2563_v42 }
 0x2cb   : > { %2616 = vmatprep.subr.mxu0 %v6100_v50  ;;  %2699 = vmatprep.subr.mxu1 %v6102_v51 }
 0x2cc   : > { %2617 = vmatpush2.msra.mxu0 %v6099_v54  ;;  %2700 = vmatpush2.msra.mxu1 %v6101_v55 }
 0x2cd   : > { %2618 = vmatprep.subr.mxu0 %v6096_v56  ;;  %2701 = vmatprep.subr.mxu1 %v6098_v57 }
 0x2ce   : > { %2619 = vmatpush2.msra.mxu0 %v6095_v14  ;;  %2702 = vmatpush2.msra.mxu1 %v6097_v58 }
 0x2cf   : > { %2620 = vmatprep.subr.mxu0 %v6092_v59  ;;  %2703 = vmatprep.subr.mxu1 %v6094_v62  ;;  %v2822_v59 = vld [vmem:[%s10316_s9] sm:$0xff] }
 0x2d0   : > { %2621 = vmatpush2.msra.mxu0 %v6091_v0  ;;  %2704 = vmatpush2.msra.mxu1 %v6093_v1  ;;  %v2826_v1 = vsel %vm2824_vm6, %v2822_v59, 0 }
 0x2d1   : > { %2622 = vmatprep.subr.mxu0 %v6088_v2  ;;  %2705 = vmatprep.subr.mxu1 %v6090_v4  ;;  %v2823_v2 = vld [vmem:[%s10316_s9 + $0x8] sm:$0x7] }
 0x2d2   : > { %2623 = vmatpush2.msra.mxu0 %v6087_v5  ;;  %2706 = vmatpush2.msra.mxu1 %v6089_v12  ;;  %v9049_v12 = vand.u32 4294901760, %v2826_v1 }
 0x2d3   : > { %2624 = vmatprep.subr.mxu0 %v6084_v32  ;;  %2707 = vmatprep.subr.mxu1 %v6086_v13  ;;  %v2829_v32 = vsel %vm2824_vm6, %v2823_v2, 0 }
 0x2d4   : > { %2625 = vmatpush2.msra.mxu0 %v6083_v33  ;;  %2708 = vmatpush2.msra.mxu1 %v6085_v7  ;;  %v9052_v7 = vsub.f32 %v2826_v1, %v9049_v12 }
 0x2d5   : > { %2626 = vmatprep.subr.mxu0 %v6080_v53  ;;  %2709 = vmatprep.subr.mxu1 %v6082_v31  ;;  %v9054_v53 = vand.u32 4294901760, %v2829_v32 }
 0x2d6   : > { %2627 = vmatpush2.msra.mxu0 %v6079_v43  ;;  %2710 = vmatpush2.msra.mxu1 %v6081_v61  ;;  %v9057_v61 = vand.u32 4294901760, %v9052_v7 }
 0x2d7   : > { %2628 = vmatprep.subr.mxu0 %v6076_v36  ;;  %2711 = vmatprep.subr.mxu1 %v6078_v52  ;;  %v9060_v36 = vsub.f32 %v2829_v32, %v9054_v53 }
 0x2d8   : > { %2629 = vmatpush2.msra.mxu0 %v6075_v60  ;;  %2712 = vmatpush2.msra.mxu1 %v6077_v3 }
 0x2d9   : > { %2630 = vmatprep.subr.mxu0 %v6072_v63  ;;  %2713 = vmatprep.subr.mxu1 %v6074_v19 }
 0x2da   : > { %2631 = vmatpush2.msra.mxu0 %v6071_v21  ;;  %2714 = vmatpush2.msra.mxu1 %v6073_v10 }
 0x2db   : > { %2632 = vmatprep.subr.mxu0 %v6068_v11  ;;  %2715 = vmatprep.subr.mxu1 %v6070_v22 }
 0x2dc   : > { %2633 = vmatpush2.msra.mxu0 %v6067_v23  ;;  %2716 = vmatpush2.msra.mxu1 %v6069_v24  ;;  %v2918_v24 = vsub.f32 %v9052_v7, %v9057_v61 }
 0x2dd   : > { %2634 = vmatprep.subr.mxu0 %v6064_v8  ;;  %2717 = vmatprep.subr.mxu1 %v6066_v9  ;;  %v9065_v8 = vand.u32 4294901760, %v9060_v36 }
 0x2de   : > { %2635 = vmatpush2.msra.mxu0 %v6063_v25  ;;  %2718 = vmatpush2.msra.mxu1 %v6065_v26 }
 0x2df   : > { %2636 = vmatprep.subr.mxu0 %v6060_v27  ;;  %2719 = vmatprep.subr.mxu1 %v6062_v28 }
 0x2e0   : > { %2637 = vmatpush2.msra.mxu0 %v6059_v29  ;;  %2720 = vmatpush2.msra.mxu1 %v6061_v30 }
 0x2e1   : > { %2638 = vmatprep.subr.mxu0 %v6056_v34  ;;  %2721 = vmatprep.subr.mxu1 %v6058_v35 }
 0x2e2   : > { %2639 = vmatpush2.msra.mxu0 %v6055_v38  ;;  %2722 = vmatpush2.msra.mxu1 %v6057_v39 }
 0x2e3   : > { %2641 = vmatmul.mubr.f32.vlgmr.msra.gmra.mxu0 %v2559_v6  ;;  %2724 = vmatmul.mubr.f32.vlgmr.msra.gmra.mxu1 %v2559_v6 }
 0x2e4   : > { %6112 = vmatprep.mubr.msk.f32.mxu0 %vm2091_vm5, %v2566_v44  ;;  %6115 = vmatprep.mubr.msk.f32.mxu1 %vm2091_vm5, %v2566_v44 }
 0x2e7   : > { %2647 = vmatmul.mubr.f32.gmra.mxu0 %v2564_v15  ;;  %2730 = vmatmul.mubr.f32.gmra.mxu1 %v2564_v15 }
 0x2e8   : > { %6113 = vmatprep.mubr.msk.f32.mxu0 %vm2091_vm5, %v2565_v40  ;;  %6116 = vmatprep.mubr.msk.f32.mxu1 %vm2091_vm5, %v2565_v40 }
 0x2eb   : > { %2653 = vmatmul.mubr.f32.gmra.mxu0 %v2563_v42  ;;  %2736 = vmatmul.mubr.f32.gmra.mxu1 %v2563_v42 }
 0x2ec   : > { %2914 = vmatprep.mubr.f32.mxu0 %v6881_v17  ;;  %3597 = vmatprep.mubr.f32.mxu1 %v6881_v17 }
 0x320   : > { %v2164_v16 = vpop.f32.mrf.mxu0  ;;  %v2247_v18 = vpop.f32.mrf.mxu1 }
 0x322   : > { %v2166_v20 = vpop.f32.mrf.mxu0  ;;  %v2249_v48 = vpop.f32.mrf.mxu1 }
 0x326   : > { %v2170_v45 = vpop.f32.mrf.mxu0  ;;  %v2253_v46 = vpop.f32.mrf.mxu1 }
 0x328   : > { %v2172_v47 = vpop.f32.mrf.mxu0  ;;  %v2255_v49 = vpop.f32.mrf.mxu1 }
 0x32c   : > { %v2176_v50 = vpop.f32.mrf.mxu0  ;;  %v2259_v51 = vpop.f32.mrf.mxu1 }
 0x32e   : > { %v2178_v54 = vpop.f32.mrf.mxu0  ;;  %v2261_v55 = vpop.f32.mrf.mxu1 }
 0x361   : > { %v2336_v56 = vpop.f32.mrf.mxu0  ;;  %v2419_v57 = vpop.f32.mrf.mxu1 }
 0x362   : > { %v2337_v52 = vadd.f32 %v2336_v56, %v2164_v16  ;;  %v2420_v60 = vadd.f32 %v2419_v57, %v2247_v18 }
 0x363   : > { %v2338_v14 = vpop.f32.mrf.mxu0  ;;  %v2421_v58 = vpop.f32.mrf.mxu1 }
 0x364   : > { %v2339_v19 = vadd.f32 %v2338_v14, %v2166_v20  ;;  %v2422_v21 = vadd.f32 %v2421_v58, %v2249_v48 }
 0x367   : > { %v2342_v62 = vpop.f32.mrf.mxu0  ;;  %v2425_v0 = vpop.f32.mrf.mxu1 }
 0x368   : > { %v2343_v9 = vadd.f32 %v2342_v62, %v2170_v45  ;;  %v2426_v25 = vadd.f32 %v2425_v0, %v2253_v46 }
 0x369   : > { %v2344_v4 = vpop.f32.mrf.mxu0  ;;  %v2427_v5 = vpop.f32.mrf.mxu1 }
 0x36a   : > { %v2345_v30 = vadd.f32 %v2344_v4, %v2172_v47  ;;  %v2428_v34 = vadd.f32 %v2427_v5, %v2255_v49 }
 0x36d   : > { %v2348_v13 = vpop.f32.mrf.mxu0  ;;  %v2431_v33 = vpop.f32.mrf.mxu1 }
 0x36e   : > { %v2349_v35 = vadd.f32 %v2348_v13, %v2176_v50  ;;  %v2432_v37 = vadd.f32 %v2431_v33, %v2259_v51 }
 0x36f   : > { %v2350_v31 = vpop.f32.mrf.mxu0  ;;  %v2433_v43 = vpop.f32.mrf.mxu1 }
 0x370   : > { %v2351_v44 = vadd.f32 %v2350_v31, %v2178_v54  ;;  %v2434_v15 = vadd.f32 %v2433_v43, %v2261_v55 }
 0x3a3   : > { %v2642_v3 = vpop.f32.mrf.mxu0  ;;  %v2725_v63 = vpop.f32.mrf.mxu1 }
 0x3a4   : > { %v2742_v10 = vadd.f32 %v2642_v3, %v2337_v52  ;;  %v2744_v11 = vadd.f32 %v2725_v63, %v2420_v60  ;;  %v9069_v52 = vand.u32 4294901760, %v2918_v24 }
 0x3a5   : > { %v2644_v22 = vpop.f32.mrf.mxu0  ;;  %v2727_v23 = vpop.f32.mrf.mxu1 }
 0x3a6   : > { %v2743_v26 = vadd.f32 %v2644_v22, %v2339_v19  ;;  %v2745_v27 = vadd.f32 %v2727_v23, %v2422_v21  ;;  %v2754_v38 = vmax.f32 %v2742_v10, 0.0  ;;  %v2756_v39 = vmax.f32 %v2744_v11, 0.0 }
 0x3a7   : > { %v2648_v28 = vpop.f32.mrf.mxu0  ;;  %v2731_v29 = vpop.f32.mrf.mxu1  ;;  %v2929_v19 = vsub.f32 %v9060_v36, %v9065_v8 }
 0x3a8   : > { %v2746_v40 = vadd.f32 %v2648_v28, %v2343_v9  ;;  %v2748_v41 = vadd.f32 %v2731_v29, %v2426_v25  ;;  %v2755_v20 = vmax.f32 %v2743_v26, 0.0  ;;  %v2757_v48 = vmax.f32 %v2745_v27, 0.0 }
 0x3a9   : > { %v2650_v6 = vpop.f32.mrf.mxu0  ;;  %v2733_v42 = vpop.f32.mrf.mxu1  ;;  %v2778_v14 = vrot.slane %v2754_v38, 1  ;;  %v2784_v58 = vrot.slane %v2756_v39, 1 }
 0x3aa   : > { %v2747_v16 = vadd.f32 %v2650_v6, %v2345_v30  ;;  %v2749_v18 = vadd.f32 %v2733_v42, %v2428_v34  ;;  %v2758_v45 = vmax.f32 %v2746_v40, 0.0  ;;  %v2760_v46 = vmax.f32 %v2748_v41, 0.0 }
 0x3ab   : > { %v2654_v56 = vpop.f32.mrf.mxu0  ;;  %v2737_v57 = vpop.f32.mrf.mxu1  ;;  %v2781_v5 = vrot.slane %v2755_v20, 1  ;;  %v2787_v31 = vrot.slane %v2757_v48, 1 }
 0x3ac   : > { %v2759_v47 = vmax.f32 %v2747_v16, 0.0  ;;  %v2761_v49 = vmax.f32 %v2749_v18, 0.0  ;;  %v2750_v50 = vadd.f32 %v2654_v56, %v2349_v35  ;;  %v2752_v51 = vadd.f32 %v2737_v57, %v2432_v37 }
 0x3ad   : > { %v2779_v59 = vrot.slane %v2758_v45, 1  ;;  %v2785_v62 = vrot.slane %v2760_v46, 1  ;;  %v2656_v0 = vpop.f32.mrf.mxu0  ;;  %v2739_v1 = vpop.f32.mrf.mxu1 }
 0x3ae   : > { %v2782_v54 = vrot.slane %v2759_v47, 1  ;;  %v2788_v55 = vrot.slane %v2761_v49, 1  ;;  %v2762_v2 = vmax.f32 %v2750_v50, 0.0  ;;  %v2764_v4 = vmax.f32 %v2752_v51, 0.0 }
 0x3af   : > { %v2780_v32 = vsel %vm390_vm1, %v2778_v14, %v2779_v59  ;;  %v2751_v13 = vadd.f32 %v2656_v0, %v2351_v44  ;;  %v2753_v33 = vadd.f32 %v2739_v1, %v2434_v15  ;;  %v2786_v43 = vsel %vm390_vm1, %v2784_v58, %v2785_v62 }
 0x3b0   : > { %v2783_v60 = vsel %vm390_vm1, %v2781_v5, %v2782_v54  ;;  %v2790_v3 = vrot.slane %v2762_v2, 1  ;;  %v2794_v63 = vrot.slane %v2764_v4, 1  ;;  %v9074_v21 = vmax.f32 %v2754_v38, %v2780_v32 }
 0x3b1   : > { %v2789_v10 = vsel %vm390_vm1, %v2787_v31, %v2788_v55  ;;  %v2763_v11 = vmax.f32 %v2751_v13, 0.0  ;;  %v2765_v22 = vmax.f32 %v2753_v33, 0.0  ;;  %v2812_v23 = vmax.f32 %v2756_v39, %v2786_v43 }
 0x3b2   : > { %v2791_v9 = vsel %vm390_vm1, %v2779_v59, %v2790_v3  ;;  %v2818_v25 = vmax.f32 %v2762_v2, %v2790_v3  ;;  %v2795_v24 = vsel %vm390_vm1, %v2785_v62, %v2794_v63  ;;  %v2811_v26 = vmax.f32 %v2755_v20, %v2783_v60 }
 0x3b3   : > { %v2814_v27 = vmax.f32 %v2758_v45, %v2791_v9  ;;  %v2816_v28 = vmax.f32 %v2760_v46, %v2795_v24  ;;  %v2820_v29 = vmax.f32 %v2764_v4, %v2794_v63  ;;  %v2813_v30 = vmax.f32 %v2757_v48, %v2789_v10 }
 0x3b4   : > { %v2833_v34 = vsel %vm2831_vm7, %v2818_v25, 0  ;;  %v2792_v35 = vrot.slane %v2763_v11, 1  ;;  %v2796_v37 = vrot.slane %v2765_v22, 1  ;;  %v9091_v16 = vand.u32 4294901760, %v2812_v23 }
 0x3b5   : > { %v9080_v38 = vand.u32 4294901760, %v2833_v34  ;;  %v2839_v40 = vsel %vm2831_vm7, %v2820_v29, 0  ;;  %v9083_v41 = vand.u32 4294901760, %v2816_v28  ;;  %v9085_v39 = vand.u32 4294901760, %v2814_v27 }
 0x3b6   : > { %v9087_v6 = vand.u32 4294901760, %v2839_v40  ;;  %v2793_v42 = vsel %vm390_vm1, %v2782_v54, %v2792_v35  ;;  %v2819_v44 = vmax.f32 %v2763_v11, %v2792_v35  ;;  %v2797_v15 = vsel %vm390_vm1, %v2788_v55, %v2796_v37 }
 0x3b7   : > { %v9094_v18 = vsub.f32 %v2833_v34, %v9080_v38  ;;  %v2815_v20 = vmax.f32 %v2759_v47, %v2793_v42  ;;  %v2817_v48 = vmax.f32 %v2761_v49, %v2797_v15  ;;  %v2821_v56 = vmax.f32 %v2765_v22, %v2796_v37 }
 0x3b8   : > { %v9097_v45 = vsub.f32 %v2839_v40, %v9087_v6  ;;  %v2836_v46 = vsel %vm2831_vm7, %v2819_v44, 0  ;;  %v9101_v57 = vsub.f32 %v2814_v27, %v9085_v39  ;;  %v9109_v58 = vand.u32 4294901760, %v2811_v26 }
 0x3b9   : > { %v9103_v50 = vand.u32 4294901760, %v2836_v46  ;;  %v9105_v51 = vand.u32 4294901760, %v2817_v48  ;;  %v9107_v14 = vand.u32 4294901760, %v2815_v20  ;;  %v9112_v47 = vsub.f32 %v2816_v28, %v9083_v41 }
 0x3ba   : > { %v2842_v49 = vsel %vm2831_vm7, %v2821_v56, 0  ;;  %v2971_v59 = vand.u32 4294901760, %v9094_v18  ;;  %v3537_v62 = vand.u32 4294901760, %v9097_v45  ;;  %v2983_v55 = vand.u32 4294901760, %v9101_v57 }
 0x3bb   : > { %v9118_v0 = vsub.f32 %v2836_v46, %v9103_v50  ;;  %v9120_v1 = vand.u32 4294901760, %v2842_v49  ;;  %2871 = vmatprep.subr.mxu0 %v9103_v50  ;;  %v9124_v54 = vsub.f32 %v2815_v20, %v9107_v14  ;;  %v9128_v2 = vsub.f32 %v2812_v23, %v9091_v16 }
 0x3bc   : > { %v9130_v4 = vand.u32 4294901760, %v2813_v30  ;;  %2873 = vmatpush1.msra.mxu0 %v9080_v38  ;;  %v9134_v5 = vand.u32 4294901760, %v9074_v21  ;;  %v9137_v32 = vsub.f32 %v2817_v48, %v9105_v51  ;;  %v9144_v31 = vand.u32 4294901760, %v2929_v19 }
 0x3bd   : > { %v9140_v13 = vsub.f32 %v2842_v49, %v9120_v1  ;;  %2875 = vmatprep.subr.mxu0 %v9107_v14  ;;  %v2965_v33 = vand.u32 4294901760, %v9118_v0  ;;  %v2977_v43 = vand.u32 4294901760, %v9124_v54  ;;  %v2972_v60 = vsub.f32 %v9094_v18, %v2971_v59 }
 0x3be   : > { %2877 = vmatpush1.msra.mxu0 %v9085_v39  ;;  %v3538_v3 = vsub.f32 %v9097_v45, %v3537_v62  ;;  %v3543_v63 = vand.u32 4294901760, %v9137_v32  ;;  %v3549_v10 = vand.u32 4294901760, %v9112_v47  ;;  %v2984_v22 = vsub.f32 %v9101_v57, %v2983_v55 }
 0x3bf   : > { %2879 = vmatprep.subr.mxu0 %v9109_v58  ;;  %v2966_v19 = vsub.f32 %v9118_v0, %v2965_v33  ;;  %v3531_v11 = vand.u32 4294901760, %v9140_v13  ;;  %v9165_v23 = vsub.f32 %v2811_v26, %v9109_v58  ;;  %v2978_v9 = vsub.f32 %v9124_v54, %v2977_v43 }
 0x3c0   : > { %2881 = vmatpush1.msra.mxu0 %v9134_v5  ;;  %v9172_v25 = vsub.f32 %v2813_v30, %v9130_v4  ;;  %v9176_v24 = vsub.f32 %v9074_v21, %v9134_v5  ;;  %v3561_v27 = vand.u32 4294901760, %v9128_v2  ;;  %v3544_v29 = vsub.f32 %v9137_v32, %v3543_v63 }
 0x3c1   : > { %2920 = vmatmul.mubr.f32.vlgmr.msra.gmra.mxu0 %v9069_v52  ;;  %v2967_v28 = vand.u32 4294901760, %v2966_v19  ;;  %v3532_v26 = vsub.f32 %v9140_v13, %v3531_v11  ;;  %v2989_v30 = vand.u32 4294901760, %v9165_v23  ;;  %v2973_v34 = vand.u32 4294901760, %v2972_v60 }
 0x3c2   : > { %2925 = vmatprep.mubr.f32.mxu0 %v6881_v17  ;;  %v3550_v21 = vsub.f32 %v9112_v47, %v3549_v10  ;;  %v3555_v35 = vand.u32 4294901760, %v9172_v25  ;;  %v2995_v37 = vand.u32 4294901760, %v9176_v24  ;;  %v3539_v42 = vand.u32 4294901760, %v3538_v3 }
 0x3c3   : > { %2968 = vmatprep.subr.mxu0 %v2967_v28  ;;  %v3533_v40 = vand.u32 4294901760, %v3532_v26  ;;  %v2990_v44 = vsub.f32 %v9165_v23, %v2989_v30  ;;  %v2979_v15 = vand.u32 4294901760, %v2978_v9  ;;  %v3562_v46 = vsub.f32 %v9128_v2, %v3561_v27 }
 0x3c4   : > { %2974 = vmatpush1.msra.mxu0 %v2973_v34  ;;  %v3556_v20 = vsub.f32 %v9172_v25, %v3555_v35  ;;  %v2996_v48 = vsub.f32 %v9176_v24, %v2995_v37  ;;  %v3545_v56 = vand.u32 4294901760, %v3544_v29  ;;  %v2985_v49 = vand.u32 4294901760, %v2984_v22  ;;  %v4056_v22 = vld [vmem:[%s10311_s4 + $0x108] sm:$0xff] }
 0x3c5   : > { %3534 = vmatprep.subr.mxu1 %v3533_v40  ;;  %2931 = vmatmul.mubr.f32.gmra.mxu0 %v9144_v31  ;;  %v3551_v60 = vand.u32 4294901760, %v3550_v21  ;;  %v2991_v3 = vand.u32 4294901760, %v2990_v44  ;;  %v3563_v28 = vand.u32 4294901760, %v3562_v46 }
 0x3c6   : > { %3540 = vmatpush1.msra.mxu1 %v3539_v42  ;;  %2980 = vmatprep.subr.mxu0 %v2979_v15  ;;  %v3557_v19 = vand.u32 4294901760, %v3556_v20  ;;  %v2997_v9 = vand.u32 4294901760, %v2996_v48 }
 0x3c7   : > { %3546 = vmatprep.subr.mxu1 %v3545_v56  ;;  %2986 = vmatpush1.msra.mxu0 %v2985_v49 }
 0x3c8   : > { %3552 = vmatpush1.msra.mxu1 %v3551_v60  ;;  %2992 = vmatprep.subr.mxu0 %v2991_v3 }
 0x3c9   : > { %3558 = vmatprep.subr.mxu1 %v3557_v19  ;;  %2998 = vmatpush1.msra.mxu0 %v2997_v9 }
 0x3ca   : > { %3031 = vmatprep.mubr.f32.mxu0 %v6881_v17  ;;  %3564 = vmatpush1.msra.mxu1 %v3563_v28 }
 0x3cb   : > { %3033 = vmatmul.mubr.f32.vlgmr.msra.gmra.mxu0 %v9049_v12  ;;  %3074 = vmatprep.subr.mxu0 %v9118_v0  ;;  %v4047_v0 = vld [vmem:[%s10311_s4 + $0xc0] sm:$0xff] }
 0x3cc   : > { %3599 = vmatmul.mubr.f32.vlgmr.msra.gmra.mxu1 %v9049_v12  ;;  %3732 = vmatprep.subr.mxu1 %v9120_v1 }
 0x3cd   : > { %3077 = vmatpush1.msra.mxu0 %v9094_v18  ;;  %3734 = vmatpush1.msra.mxu1 %v9087_v6  ;;  %v4035_v18 = vld [vmem:[%s10311_s4 + $0x60] sm:$0xff] }
 0x3ce   : > { %3080 = vmatprep.subr.mxu0 %v9124_v54  ;;  %3736 = vmatprep.subr.mxu1 %v9105_v51  ;;  %v4031_v54 = vld [vmem:[%s10311_s4 + $0x40] sm:$0xff] }
 0x3cf   : > { %3038 = vmatprep.mubr.f32.mxu0 %v6881_v17  ;;  %3083 = vmatpush1.msra.mxu0 %v9101_v57  ;;  %v4065_v57 = vld [vmem:[%s10311_s4 + $0x150] sm:$0xff] }
 0x3d0   : > { %3604 = vmatprep.mubr.f32.mxu1 %v6881_v17  ;;  %3738 = vmatpush1.msra.mxu1 %v9083_v41 }
 0x3d1   : > { %3040 = vmatmul.mubr.f32.gmra.mxu0 %v9054_v53  ;;  %3086 = vmatprep.subr.mxu0 %v9165_v23 }
 0x3d2   : > { %3606 = vmatmul.mubr.f32.gmra.mxu1 %v9054_v53  ;;  %3740 = vmatprep.subr.mxu1 %v9130_v4 }
 0x3d3   : > { %3089 = vmatpush1.msra.mxu0 %v9176_v24  ;;  %3742 = vmatpush1.msra.mxu1 %v9091_v16 }
 0x3d4   : > { %3166 = vmatprep.subr.mxu0 %v9103_v50  ;;  %3918 = vmatprep.subr.mxu1 %v9120_v1 }
 0x3d5   : > { %3122 = vmatprep.mubr.f32.mxu0 %v6881_v17  ;;  %3775 = vmatprep.mubr.f32.mxu1 %v6881_v17 }
 0x3d6   : > { %3125 = vmatmul.mubr.f32.vlgmr.msra.gmra.mxu0 %v9052_v7  ;;  %3779 = vmatmul.mubr.f32.vlgmr.msra.gmra.mxu1 %v9057_v61 }
 0x3d7   : > { %3168 = vmatpush1.msra.mxu0 %v9080_v38  ;;  %3920 = vmatpush1.msra.mxu1 %v9087_v6 }
 0x3d8   : > { %3170 = vmatprep.subr.mxu0 %v9107_v14  ;;  %3922 = vmatprep.subr.mxu1 %v9105_v51 }
 0x3d9   : > { %3172 = vmatpush1.msra.mxu0 %v9085_v39  ;;  %3924 = vmatpush1.msra.mxu1 %v9083_v41 }
 0x3da   : > { %3130 = vmatprep.mubr.f32.mxu0 %v6881_v17  ;;  %3174 = vmatprep.subr.mxu0 %v9109_v58 }
 0x3db   : > { %3926 = vmatprep.subr.mxu1 %v9130_v4  ;;  %3133 = vmatmul.mubr.f32.gmra.mxu0 %v9060_v36 }
 0x3dc   : > { %3176 = vmatpush1.msra.mxu0 %v9134_v5  ;;  %3928 = vmatpush1.msra.mxu1 %v9091_v16 }
 0x3dd   : > { %3257 = vmatprep.subr.mxu0 %v2965_v33  ;;  %3209 = vmatprep.mubr.f32.mxu0 %v6881_v17  ;;  %v4044_v33 = vld [vmem:[%s10311_s4 + $0xa8] sm:$0xff] }
 0x3de   : > { %3784 = vmatprep.mubr.f32.mxu1 %v6881_v17  ;;  %4161 = vmatprep.subr.mxu1 %v6881_v17 }
 0x3df   : > { %3213 = vmatmul.mubr.f32.vlgmr.msra.gmra.mxu0 %v9057_v61  ;;  %3788 = vmatmul.mubr.f32.gmra.mxu1 %v9065_v8  ;;  %v4069_v61 = vld [vmem:[%s10311_s4 + $0x170] sm:$0xff] }
 0x3e0   : > { %3261 = vmatpush1.msra.mxu0 %v2971_v59  ;;  %3218 = vmatprep.mubr.f32.mxu0 %v6881_v17  ;;  %v4063_v59 = vld [vmem:[%s10311_s4 + $0x140] sm:$0xff] }
 0x3e1   : > { %3265 = vmatprep.subr.mxu0 %v2977_v43  ;;  %3961 = vmatprep.mubr.f32.mxu1 %v6881_v17  ;;  %v4028_v43 = vld [vmem:[%s10311_s4 + $0x28] sm:$0xff] }
 0x3e2   : > { %3269 = vmatpush1.msra.mxu0 %v2983_v55  ;;  %v4046_v55 = vld [vmem:[%s10311_s4 + $0xb8] sm:$0xff] }
 0x3e3   : > { %3273 = vmatprep.subr.mxu0 %v2989_v30  ;;  %3222 = vmatmul.mubr.f32.gmra.mxu0 %v9065_v8  ;;  %v4053_v8 = vld [vmem:[%s10311_s4 + $0xf0] sm:$0xff] }
 0x3e4   : > { %3277 = vmatpush1.msra.mxu0 %v2995_v37  ;;  %3310 = vmatprep.mubr.f32.mxu0 %v6881_v17 }
 0x3e5   : > { %3352 = vmatprep.subr.mxu0 %v9103_v50  ;;  %3963 = vmatmul.mubr.f32.vlgmr.msra.gmra.mxu1 %v9049_v12  ;;  %v4034_v50 = vld [vmem:[%s10311_s4 + $0x58] sm:$0xff] }
 0x3e6   : > { %3968 = vmatprep.mubr.f32.mxu1 %v6881_v17 }
 0x3e7   : > { %3312 = vmatmul.mubr.f32.vlgmr.msra.gmra.mxu0 %v9049_v12 }
 0x3e8   : > { %3354 = vmatpush1.msra.mxu0 %v9080_v38  ;;  %3317 = vmatprep.mubr.f32.mxu0 %v6881_v17  ;;  %v4052_v38 = vld [vmem:[%s10311_s4 + $0xe8] sm:$0xff] }
 0x3e9   : > { %3356 = vmatprep.subr.mxu0 %v9107_v14  ;;  %3970 = vmatmul.mubr.f32.gmra.mxu1 %v9054_v53  ;;  %v4064_v14 = vld [vmem:[%s10311_s4 + $0x148] sm:$0xff] }
 0x3ea   : > { %3358 = vmatpush1.msra.mxu0 %v9085_v39  ;;  %v4036_v39 = vld [vmem:[%s10311_s4 + $0x68] sm:$0xff] }
 0x3eb   : > { %3360 = vmatprep.subr.mxu0 %v9109_v58  ;;  %3319 = vmatmul.mubr.f32.gmra.mxu0 %v9054_v53  ;;  %v4033_v58 = vld [vmem:[%s10311_s4 + $0x50] sm:$0xff] }
 0x3ec   : > { %3362 = vmatpush1.msra.mxu0 %v9134_v5  ;;  %3395 = vmatprep.mubr.f32.mxu0 %v6881_v17  ;;  %v4045_v5 = vld [vmem:[%s10311_s4 + $0xb0] sm:$0xff] }
 0x3ed   : > { %3437 = vmatprep.subr.mxu0 %v9120_v1  ;;  %v4062_v1 = vld [vmem:[%s10311_s4 + $0x138] sm:$0xff] }
 0x3ef   : > { %3397 = vmatmul.mubr.f32.vlgmr.msra.gmra.mxu0 %v9049_v12 }
 0x3f0   : > { %3439 = vmatpush1.msra.mxu0 %v9087_v6  ;;  %3402 = vmatprep.mubr.f32.mxu0 %v6881_v17  ;;  %v4051_v6 = vld [vmem:[%s10311_s4 + $0xe0] sm:$0xff] }
 0x3f1   : > { %3441 = vmatprep.subr.mxu0 %v9105_v51  ;;  %v4049_v51 = vld [vmem:[%s10311_s4 + $0xd0] sm:$0xff] }
 0x3f2   : > { %3443 = vmatpush1.msra.mxu0 %v9083_v41  ;;  %v4067_v41 = vld [vmem:[%s10311_s4 + $0x160] sm:$0xff] }
 0x3f3   : > { %3445 = vmatprep.subr.mxu0 %v9130_v4  ;;  %3404 = vmatmul.mubr.f32.gmra.mxu0 %v9054_v53  ;;  %v4030_v4 = vld [vmem:[%s10311_s4 + $0x38] sm:$0xff] }
 0x3f4   : > { %3447 = vmatpush1.msra.mxu0 %v9091_v16  ;;  %3480 = vmatprep.mubr.f32.mxu0 %v6881_v17  ;;  %v4066_v16 = vld [vmem:[%s10311_s4 + $0x158] sm:$0xff] }
 0x3f5   : > { %3640 = vmatprep.subr.mxu0 %v9140_v13  ;;  %v4029_v13 = vld [vmem:[%s10311_s4 + $0x30] sm:$0xff] }
 0x3f7   : > { %3486 = vmatmul.mubr.f32.vlgmr.msra.gmra.mxu0 %v9069_v52  ;;  %v4037_v52 = vld [vmem:[%s10311_s4 + $0x70] sm:$0xff] }
 0x3f8   : > { %3643 = vmatpush1.msra.mxu0 %v9097_v45  ;;  %3491 = vmatprep.mubr.f32.mxu0 %v6881_v17  ;;  %v4050_v45 = vld [vmem:[%s10311_s4 + $0xd8] sm:$0xff] }
 0x3f9   : > { %3646 = vmatprep.subr.mxu0 %v9137_v32  ;;  %v4060_v32 = vld [vmem:[%s10311_s4 + $0x128] sm:$0xff] }
 0x3fa   : > { %3649 = vmatpush1.msra.mxu0 %v9112_v47  ;;  %v4048_v47 = vld [vmem:[%s10311_s4 + $0xc8] sm:$0xff] }
 0x3fb   : > { %3652 = vmatprep.subr.mxu0 %v9172_v25  ;;  %3497 = vmatmul.mubr.f32.gmra.mxu0 %v9144_v31  ;;  %v4059_v31 = vld [vmem:[%s10311_s4 + $0x120] sm:$0xff] }
 0x3fc   : > { %3655 = vmatpush1.msra.mxu0 %v9128_v2  ;;  %3688 = vmatprep.mubr.f32.mxu0 %v6881_v17  ;;  %v4061_v2 = vld [vmem:[%s10311_s4 + $0x130] sm:$0xff] }
 0x3fd   : > { %3823 = vmatprep.subr.mxu0 %v3531_v11  ;;  %v4057_v11 = vld [vmem:[%s10311_s4 + $0x110] sm:$0xff] }
 0x3ff   : > { %3691 = vmatmul.mubr.f32.vlgmr.msra.gmra.mxu0 %v9052_v7  ;;  %v4070_v7 = vld [vmem:[%s10311_s4 + $0x178] sm:$0xff] }
 0x400   : > { %3827 = vmatpush1.msra.mxu0 %v3537_v62  ;;  %3696 = vmatprep.mubr.f32.mxu0 %v6881_v17  ;;  %v4032_v62 = vld [vmem:[%s10311_s4 + $0x48] sm:$0xff] }
 0x401   : > { %3831 = vmatprep.subr.mxu0 %v3543_v63  ;;  %4162 = vmatpush1.msra.mxu1 %v4070_v7  ;;  %v4043_v63 = vld [vmem:[%s10311_s4 + $0xa0] sm:$0xff] }
 0x402   : > { %3835 = vmatpush1.msra.mxu0 %v3549_v10  ;;  %4163 = vmatprep.subr.mxu1 %v6881_v17  ;;  %v4058_v10 = vld [vmem:[%s10311_s4 + $0x118] sm:$0xff] }
 0x403   : > { %3839 = vmatprep.subr.mxu0 %v3555_v35  ;;  %3699 = vmatmul.mubr.f32.gmra.mxu0 %v9060_v36  ;;  %v4054_v36 = vld [vmem:[%s10311_s4 + $0xf8] sm:$0xff] }
 0x404   : > { %3843 = vmatpush1.msra.mxu0 %v3561_v27  ;;  %3876 = vmatprep.mubr.f32.mxu0 %v6881_v17 }
 0x405   : > { %6312 = vmatprep.subr.mxu0 %v4054_v36  ;;  %4164 = vmatpush1.msra.mxu1 %v4069_v61 }
 0x406   : > { %4165 = vmatprep.subr.mxu1 %v6881_v17 }
 0x407   : > { %3878 = vmatmul.mubr.f32.vlgmr.msra.gmra.mxu0 %v9049_v12  ;;  %v4038_v12 = vld [vmem:[%s10311_s4 + $0x78] sm:$0xff] }
 0x408   : > { %3883 = vmatprep.mubr.f32.mxu0 %v6881_v17  ;;  %6313 = vmatpush3.msra.mxu0 %v4038_v12 }
 0x409   : > { %6314 = vmatprep.subr.mxu0 %v4053_v8 }
 0x40a   : > { %6315 = vmatpush3.msra.mxu0 %v4037_v52 }
 0x40b   : > { %3885 = vmatmul.mubr.f32.gmra.mxu0 %v9054_v53  ;;  %v4068_v53 = vld [vmem:[%s10311_s4 + $0x168] sm:$0xff]  ;;  %6316 = vmatprep.subr.mxu0 %v4052_v38 }
 0x40c   : > { %4166 = vmatpush1.msra.mxu1 %v4068_v53  ;;  %6317 = vmatpush3.msra.mxu0 %v4036_v39 }
 0x40d   : > { %4167 = vmatprep.subr.mxu1 %v6881_v17  ;;  %6318 = vmatprep.subr.mxu0 %v4051_v6 }
 0x40e   : > { %4168 = vmatpush1.msra.mxu1 %v4067_v41  ;;  %6319 = vmatpush3.msra.mxu0 %v4035_v18 }
 0x40f   : > { %4169 = vmatprep.subr.mxu1 %v6881_v17  ;;  %6320 = vmatprep.subr.mxu0 %v4050_v45 }
 0x410   : > { %4170 = vmatpush1.msra.mxu1 %v4066_v16  ;;  %6321 = vmatpush3.msra.mxu0 %v4034_v50  ;;  %v4027_v50 = vld [vmem:[%s10311_s4 + $0x20] sm:$0xff] }
 0x411   : > { %4171 = vmatprep.subr.mxu1 %v6881_v17  ;;  %6322 = vmatprep.subr.mxu0 %v4049_v51  ;;  %v4055_v51 = vld [vmem:[%s10311_s4 + $0x100] sm:$0xff] }
 0x412   : > { %4172 = vmatpush1.msra.mxu1 %v4065_v57  ;;  %6323 = vmatpush3.msra.mxu0 %v4033_v58 }
 0x413   : > { %4173 = vmatprep.subr.mxu1 %v6881_v17  ;;  %6324 = vmatprep.subr.mxu0 %v4048_v47  ;;  %v4026_v47 = vld [vmem:[%s10311_s4 + $0x18] sm:$0xff] }
 0x414   : > { %4174 = vmatpush1.msra.mxu1 %v4064_v14  ;;  %6325 = vmatpush3.msra.mxu0 %v4032_v62  ;;  %v4042_v14 = vld [vmem:[%s10311_s4 + $0x98] sm:$0xff]  ;;  %v4041_v62 = vld [vmem:[%s10311_s4 + $0x90] sm:$0xff] }
 0x415   : > { %4175 = vmatprep.subr.mxu1 %v6881_v17  ;;  %6326 = vmatprep.subr.mxu0 %v4047_v0 }
 0x416   : > { %4176 = vmatpush1.msra.mxu1 %v4063_v59  ;;  %6327 = vmatpush3.msra.mxu0 %v4031_v54  ;;  %v4075_v59 = vld [vmem:[%s10311_s4 + $0x1a0] sm:$0xf] }
 0x417   : > { %4177 = vmatprep.subr.mxu1 %v6881_v17  ;;  %6328 = vmatprep.subr.mxu0 %v4046_v55 }
 0x418   : > { %4178 = vmatpush1.msra.mxu1 %v4062_v1  ;;  %6329 = vmatpush3.msra.mxu0 %v4030_v4 }
 0x419   : > { %4179 = vmatprep.subr.mxu1 %v6881_v17  ;;  %6330 = vmatprep.subr.mxu0 %v4045_v5 }
 0x41a   : > { %4180 = vmatpush1.msra.mxu1 %v4061_v2  ;;  %6331 = vmatpush3.msra.mxu0 %v4029_v13 }
 0x41b   : > { %4181 = vmatprep.subr.mxu1 %v6881_v17  ;;  %6332 = vmatprep.subr.mxu0 %v4044_v33 }
 0x41c   : > { %4182 = vmatpush1.msra.mxu1 %v4060_v32  ;;  %6333 = vmatpush3.msra.mxu0 %v4028_v43 }
 0x41d   : > { %4183 = vmatprep.subr.mxu1 %v6881_v17  ;;  %6334 = vmatprep.subr.mxu0 %v4043_v63 }
 0x41e   : > { %4184 = vmatpush1.msra.mxu1 %v4059_v31  ;;  %6335 = vmatpush3.msra.mxu0 %v4027_v50 }
 0x41f   : > { %4185 = vmatprep.subr.mxu1 %v6881_v17  ;;  %6336 = vmatprep.subr.mxu0 %v4042_v14  ;;  %v4251_v14 = vld [vmem:[%s10312_s5 + $0x68] sm:$0x3f] }
 0x420   : > { %4186 = vmatpush1.msra.mxu1 %v4058_v10  ;;  %6337 = vmatpush3.msra.mxu0 %v4026_v47 }
 0x421   : > { %4187 = vmatprep.subr.mxu1 %v6881_v17  ;;  %6338 = vmatprep.subr.mxu0 %v4041_v62 }
 0x422   : > { %4188 = vmatpush1.msra.mxu1 %v4057_v11 }
 0x423   : > { %4189 = vmatprep.subr.mxu1 %v6881_v17 }
 0x424   : > { %4190 = vmatpush1.msra.mxu1 %v4056_v22 }
 0x425   : > { %4191 = vmatprep.subr.mxu1 %v6881_v17 }
 0x426   : > { %4192 = vmatpush1.msra.mxu1 %v4055_v51 }
 0x427   : > { %4215 = vmatprep.subr.mxu1 %v6881_v17 }
 0x428   : > { %6117 = vmatpush2.msk.msra.mxu1 %vm407_vm0, %v4075_v59 }
 0x429   : > { %4217 = vmatprep.subr.mxu1 %v6881_v17 }
 0x481   : > { %v2921_v23 = vpop.f32.mrf.mxu0 }
 0x483   : > { %v2923_v25 = vpop.f32.mrf.mxu0 }
 0x485   : > { %v2932_v24 = vpop.f32.mrf.mxu0 }
 0x487   : > { %v2934_v27 = vpop.f32.mrf.mxu0 }
 0x48b   : > { %v3034_v26 = vpop.f32.mrf.mxu0 }
 0x48c   : > { %v3600_v48 = vpop.f32.mrf.mxu1  ;;  %v3035_v55 = vadd.f32 %v3034_v26, %v2921_v23 }
 0x48d   : > { %v3036_v29 = vpop.f32.mrf.mxu0 }
 0x48e   : > { %v3602_v49 = vpop.f32.mrf.mxu1  ;;  %v3037_v18 = vadd.f32 %v3036_v29, %v2923_v25 }
 0x491   : > { %v3041_v30 = vpop.f32.mrf.mxu0 }
 0x492   : > { %v3607_v19 = vpop.f32.mrf.mxu1  ;;  %v3042_v2 = vadd.f32 %v3041_v30, %v2932_v24  ;;  %v4025_v30 = vld [vmem:[%s10311_s4 + $0x10] sm:$0xff] }
 0x493   : > { %v3043_v34 = vpop.f32.mrf.mxu0  ;;  %6339 = vmatpush3.msra.mxu0 %v4025_v30 }
 0x494   : > { %v3609_v7 = vpop.f32.mrf.mxu1  ;;  %v3044_v0 = vadd.f32 %v3043_v34, %v2934_v27  ;;  %v4074_v34 = vld [vmem:[%s10311_s4 + $0x198] sm:$0xff] }
 0x495   : > { %4218 = vmatpush2.msra.mxu1 %v4074_v34  ;;  %v6132_v34 = vld [vmem:[%s10312_s5 + $0xd0] sm:$0xff] }
 0x496   : > { %v3126_v21 = vpop.f32.mrf.mxu0  ;;  %v3780_v12 = vpop.f32.mrf.mxu1  ;;  %4219 = vmatprep.subr.mxu1 %v6881_v17 }
 0x497   : > { %v3127_v31 = vadd.f32 %v3126_v21, %v3035_v55  ;;  %v4040_v21 = vld [vmem:[%s10311_s4 + $0x88] sm:$0xff] }
 0x498   : > { %v3128_v35 = vpop.f32.mrf.mxu0  ;;  %v9455_v52 = vpop.f32.mrf.mxu1  ;;  %6340 = vmatprep.subr.mxu0 %v4040_v21  ;;  %v4249_v21 = vld [vmem:[%s10312_s5 + $0x58] sm:$0xff] }
 0x499   : > { %v3129_v1 = vadd.f32 %v3128_v35, %v3037_v18 }
 0x49b   : > { %v3134_v37 = vpop.f32.mrf.mxu0 }
 0x49c   : > { %v3135_v43 = vadd.f32 %v3134_v37, %v3042_v2 }
 0x49d   : > { %v3136_v40 = vpop.f32.mrf.mxu0 }
 0x49e   : > { %v3137_v5 = vadd.f32 %v3136_v40, %v3044_v0 }
 0x49f   : > { %v3214_v42 = vpop.f32.mrf.mxu0  ;;  %v3789_v39 = vpop.f32.mrf.mxu1 }
 0x4a0   : > { %v3215_v24 = vadd.f32 %v3214_v42, %v3127_v31 }
 0x4a1   : > { %v3216_v44 = vpop.f32.mrf.mxu0  ;;  %v9457_v57 = vpop.f32.mrf.mxu1 }
 0x4a2   : > { %v3217_v32 = vadd.f32 %v3216_v44, %v3129_v1 }
 0x4a3   : > { %v3223_v15 = vpop.f32.mrf.mxu0 }
 0x4a4   : > { %v3224_v27 = vadd.f32 %v3223_v15, %v3135_v43  ;;  %v4024_v15 = vld [vmem:[%s10311_s4 + $0x8] sm:$0xff] }
 0x4a5   : > { %v3225_v20 = vpop.f32.mrf.mxu0  ;;  %v3964_v33 = vpop.f32.mrf.mxu1  ;;  %6341 = vmatpush3.msra.mxu0 %v4024_v15  ;;  %v4246_v15 = vld [vmem:[%s10312_s5 + $0x40] sm:$0xff] }
 0x4a6   : > { %v3226_v11 = vadd.f32 %v3225_v20, %v3137_v5  ;;  %v4073_v20 = vld [vmem:[%s10311_s4 + $0x190] sm:$0xff] }
 0x4a7   : > { %v9445_v46 = vpop.f32.mrf.mxu0  ;;  %v3966_v44 = vpop.f32.mrf.mxu1  ;;  %4220 = vmatpush2.msra.mxu1 %v4073_v20  ;;  %v6129_v20 = vld [vmem:[%s10312_s5 + $0xb8] sm:$0xff] }
 0x4a8   : > { %4221 = vmatprep.subr.mxu1 %v6881_v17 }
 0x4a9   : > { %v3315_v56 = vpop.f32.mrf.mxu0 }
 0x4aa   : > { %v3316_v22 = vadd.f32 %v3315_v56, %v3217_v32 }
 0x4ab   : > { %v9447_v60 = vpop.f32.mrf.mxu0 }
 0x4ad   : > { %v3322_v3 = vpop.f32.mrf.mxu0 }
 0x4ae   : > { %v3323_v35 = vadd.f32 %v3322_v3, %v3226_v11 }
 0x4af   : > { %v9449_v9 = vpop.f32.mrf.mxu0 }
 0x4b1   : > { %v3400_v28 = vpop.f32.mrf.mxu0 }
 0x4b2   : > { %v9489_v37 = vadd.f32 %v3400_v28, %v3316_v22  ;;  %v4072_v28 = vld [vmem:[%s10311_s4 + $0x188] sm:$0xff] }
 0x4b3   : > { %v9451_v61 = vpop.f32.mrf.mxu0  ;;  %4222 = vmatpush2.msra.mxu1 %v4072_v28  ;;  %v6126_v28 = vld [vmem:[%s10312_s5 + $0xa0] sm:$0xff] }
 0x4b4   : > { %4223 = vmatprep.subr.mxu1 %v6881_v17 }
 0x4b5   : > { %v9453_v36 = vpop.f32.mrf.mxu0 }
 0x4b7   : > { %v3487_v53 = vpop.f32.mrf.mxu0 }
 0x4b8   : > { %v3601_v16 = vadd.f32 %v3600_v48, %v3487_v53  ;;  %v4039_v48 = vld [vmem:[%s10311_s4 + $0x80] sm:$0xff] }
 0x4b9   : > { %v3489_v8 = vpop.f32.mrf.mxu0  ;;  %6342 = vmatprep.subr.mxu0 %v4039_v48  ;;  %v4245_v48 = vld [vmem:[%s10312_s5 + $0x38] sm:$0xff] }
 0x4ba   : > { %v3603_v25 = vadd.f32 %v3602_v49, %v3489_v8  ;;  %v3971_v8 = vpop.f32.mrf.mxu1 }
 0x4bb   : > { %v3498_v38 = vpop.f32.mrf.mxu0 }
 0x4bc   : > { %v3608_v4 = vadd.f32 %v3607_v19, %v3498_v38  ;;  %v4023_v19 = vld [vmem:[%s10311_s4] sm:$0xff]  ;;  %v3408_v38 = vadd.f32 %v9453_v36, %v3323_v35 }
 0x4bd   : > { %v3500_v41 = vpop.f32.mrf.mxu0  ;;  %6343 = vmatpush3.msra.mxu0 %v4023_v19  ;;  %v4243_v19 = vld [vmem:[%s10312_s5 + $0x28] sm:$0xff] }
 0x4be   : > { %v3610_v26 = vadd.f32 %v3609_v7, %v3500_v41  ;;  %v3314_v7 = vadd.f32 %v9445_v46, %v3215_v24 }
 0x4bf   : > { %v3692_v6 = vpop.f32.mrf.mxu0 }
 0x4c0   : > { %v3693_v58 = vadd.f32 %v3692_v6, %v3601_v16  ;;  %v4071_v6 = vld [vmem:[%s10311_s4 + $0x180] sm:$0xff]  ;;  %v3399_v46 = vadd.f32 %v9449_v9, %v3314_v7 }
 0x4c1   : > { %v3694_v45 = vpop.f32.mrf.mxu0  ;;  %4224 = vmatpush2.msra.mxu1 %v4071_v6  ;;  %v4242_v7 = vld [vmem:[%s10312_s5 + $0x20] sm:$0xff] }
 0x4c2   : > { %v3781_v63 = vadd.f32 %v3780_v12, %v3693_v58  ;;  %v3695_v40 = vadd.f32 %v3694_v45, %v3603_v25  ;;  %v3321_v12 = vadd.f32 %v9447_v60, %v3224_v27  ;;  %v6805_v50 = vpack.i.bf16 %v3408_v38, %v3399_v46  ;;  %6541 = vmatprep.subr.msk.mxu1 %vm795_vm3, %v4251_v14  ;;  %v6122_v6 = vld [vmem:[%s10312_s5 + $0x80] sm:$0xff] }
 0x4c3   : > { %v3700_v54 = vpop.f32.mrf.mxu0 }
 0x4c4   : > { %v3701_v10 = vadd.f32 %v3700_v54, %v3608_v4  ;;  %v9520_v60 = vadd.f32 %v9451_v61, %v3321_v12  ;;  %v3783_v36 = vadd.f32 %v9455_v52, %v3695_v40  ;;  %v6133_v52 = vld [vmem:[%s10312_s5 + $0xd8] sm:$0x3f]  ;;  %v6131_v40 = vld [vmem:[%s10312_s5 + $0xc8] sm:$0xff] }
 0x4c5   : > { %v3702_v13 = vpop.f32.mrf.mxu0  ;;  %6510 = vmatprep.subr.msk.mxu0 %vm795_vm3, %v6133_v52  ;;  %v6125_v12 = vld [vmem:[%s10312_s5 + $0x98] sm:$0xff] }
 0x4c6   : > { %v3703_v56 = vadd.f32 %v3702_v13, %v3610_v26  ;;  %v3790_v49 = vadd.f32 %v3789_v39, %v3701_v10 }
 0x4c7   : > { %v3879_v23 = vpop.f32.mrf.mxu0 }
 0x4c8   : > { %v3880_v29 = vadd.f32 %v3879_v23, %v3781_v63  ;;  %v3792_v18 = vadd.f32 %v9457_v57, %v3703_v56  ;;  %v3973_v57 = vpop.f32.mrf.mxu1  ;;  %v6128_v56 = vld [vmem:[%s10312_s5 + $0xb0] sm:$0xff] }
 0x4c9   : > { %v3881_v42 = vpop.f32.mrf.mxu0 }
 0x4ca   : > { %v9500_v3 = vadd.f32 %v3964_v33, %v3880_v29  ;;  %v3882_v51 = vadd.f32 %v3881_v42, %v3783_v36  ;;  %v4250_v29 = vld [vmem:[%s10312_s5 + $0x60] sm:$0xff]  ;;  %v4247_v42 = vld [vmem:[%s10312_s5 + $0x48] sm:$0xff] }
 0x4cb   : > { %v3886_v53 = vpop.f32.mrf.mxu0  ;;  %v6153_v36 = vld [vmem:[%s10312_s5 + $0x148] sm:$0x3f] }
 0x4cc   : > { %v3887_v41 = vadd.f32 %v3886_v53, %v3790_v49  ;;  %v6800_v39 = vpack.i.bf16 %v9500_v3, %v9489_v37  ;;  %v3967_v58 = vadd.f32 %v3966_v44, %v3882_v51  ;;  %v6130_v44 = vld [vmem:[%s10312_s5 + $0xc0] sm:$0xff]  ;;  %v4244_v49 = vld [vmem:[%s10312_s5 + $0x30] sm:$0xff]  ;;  %v4241_v53 = vld [vmem:[%s10312_s5 + $0x18] sm:$0xff] }
 0x4cd   : > { %v3888_v16 = vpop.f32.mrf.mxu0 }
 0x4ce   : > { %v9524_v45 = vadd.f32 %v3971_v8, %v3887_v41  ;;  %6801 = vrot.lane.b32.xlu0 %v6800_v39, %s6882_s12  ;;  %v3889_v9 = vadd.f32 %v3888_v16, %v3792_v18  ;;  %v6124_v8 = vld [vmem:[%s10312_s5 + $0x90] sm:$0xff]  ;;  %v6123_v41 = vld [vmem:[%s10312_s5 + $0x88] sm:$0xff] }
 0x4cf   : > { %v4239_v39 = vld [vmem:[%s10312_s5 + $0x8] sm:$0xff]  ;;  %v6120_v16 = vld [vmem:[%s10312_s5 + $0x70] sm:$0xff] }
 0x4d0   : > { %v6810_v61 = vpack.i.bf16 %v9520_v60, %v9524_v45  ;;  %v3974_v47 = vadd.f32 %v3973_v57, %v3889_v9 }
 0x4d2   : > { %6811 = vrot.lane.b32.xlu1 %v6810_v61, %s6882_s12  ;;  %6806 = vrot.lane.b32.xlu0 %v6805_v50, %s6882_s12 }
 0x4d6   : > { %3990 = vrot.lane.b32.xlu1 %v3967_v58, %s6882_s12  ;;  %3998 = vrot.lane.b32.xlu0 %v3974_v47, %s6882_s12 }
 0x540   : > { %v6802_v59 = vpop.permute.xlu0 %6801 }
 0x541   : > { %v6804_v62 = vunpack.i.h.bf16 %v6802_v59  ;;  %v6803_v0 = vunpack.i.l.bf16 %v6802_v59 }
 0x543   : > { %v4002_v1 = vsel %vm4000_vm8, %v6803_v0, %v6804_v62 }
 0x544   : > { %v6812_v54 = vpop.permute.xlu1 %6811  ;;  %v6807_v55 = vpop.permute.xlu0 %6806  ;;  %v4016_v2 = vmax.f32 %v9489_v37, %v4002_v1  ;;  %v4248_v37 = vld [vmem:[%s10312_s5 + $0x50] sm:$0xff] }
 0x545   : > { %v6814_v4 = vunpack.i.h.bf16 %v6812_v54  ;;  %v6813_v5 = vunpack.i.l.bf16 %v6812_v54  ;;  %v6809_v32 = vunpack.i.h.bf16 %v6807_v55  ;;  %v6808_v13 = vunpack.i.l.bf16 %v6807_v55 }
 0x546   : > { %4150 = vmatprep.mubr.f32.mxu0 %v4016_v2 }
 0x547   : > { %v4001_v33 = vsel %vm4000_vm8, %v6808_v13, %v6803_v0  ;;  %v4005_v31 = vsel %vm4000_vm8, %v6809_v32, %v6813_v5  ;;  %v4004_v23 = vsel %vm4000_vm8, %v6814_v4, %v6809_v32  ;;  %v6151_v13 = vld [vmem:[%s10312_s5 + $0x138] sm:$0xff] }
 0x548   : > { %v4015_v43 = vmax.f32 %v3399_v46, %v4001_v33  ;;  %v3991_v63 = vpop.permute.xlu1 %3990  ;;  %v3999_v10 = vpop.permute.xlu0 %3998  ;;  %v4020_v11 = vmax.f32 %v3408_v38, %v4005_v31  ;;  %v4019_v30 = vmax.f32 %v9520_v60, %v4004_v23  ;;  %v4240_v38 = vld [vmem:[%s10312_s5 + $0x10] sm:$0xff]  ;;  %v4238_v46 = vld [vmem:[%s10312_s5] sm:$0xff]  ;;  %v6121_v60 = vld [vmem:[%s10312_s5 + $0x78] sm:$0xff] }
 0x549   : > { %v4003_v22 = vsel %vm4000_vm8, %v6804_v62, %v3991_v63  ;;  %v4018_v25 = vmax.f32 %v3967_v58, %v3991_v63  ;;  %v4006_v27 = vsel %vm4000_vm8, %v6813_v5, %v3999_v10  ;;  %v4022_v26 = vmax.f32 %v3974_v47, %v3999_v10  ;;  %v6152_v5 = vld [vmem:[%s10312_s5 + $0x140] sm:$0xff]  ;;  %v6150_v33 = vld [vmem:[%s10312_s5 + $0x130] sm:$0xff]  ;;  %v6149_v31 = vld [vmem:[%s10312_s5 + $0x128] sm:$0xff] }
 0x54a   : > { %v4017_v24 = vmax.f32 %v9500_v3, %v4003_v22  ;;  %4151 = vmatmul.mubr.f32.vlgmr.msra.gmra.mxu0 %v4015_v43  ;;  %v4021_v35 = vmax.f32 %v9524_v45, %v4006_v27  ;;  %v6127_v3 = vld [vmem:[%s10312_s5 + $0xa8] sm:$0xff]  ;;  %v6148_v43 = vld [vmem:[%s10312_s5 + $0x120] sm:$0xff]  ;;  %v6147_v63 = vld [vmem:[%s10312_s5 + $0x118] sm:$0xff] }
 0x54b   : > { %4155 = vmatprep.mubr.f32.mxu0 %v4020_v11  ;;  %6118 = vmatprep.mubr.msk.f32.mxu1 %vm4076_vm9, %v4018_v25  ;;  %v6146_v10 = vld [vmem:[%s10312_s5 + $0x110] sm:$0xff]  ;;  %v6145_v11 = vld [vmem:[%s10312_s5 + $0x108] sm:$0xff]  ;;  %v6144_v22 = vld [vmem:[%s10312_s5 + $0x100] sm:$0xff] }
 0x54c   : > { %4226 = vmatmul.mubr.f32.vlgmr.msra.gmra.mxu1 %v4017_v24  ;;  %6511 = vmatpush3.msk.msra.mxu0 %vm795_vm3, %v6133_v52  ;;  %v6143_v25 = vld [vmem:[%s10312_s5 + $0xf8] sm:$0xff]  ;;  %v6142_v23 = vld [vmem:[%s10312_s5 + $0xf0] sm:$0xff]  ;;  %v6141_v24 = vld [vmem:[%s10312_s5 + $0xe8] sm:$0xff] }
 0x54d   : > { %6119 = vmatprep.mubr.msk.f32.mxu1 %vm4076_vm9, %v4022_v26  ;;  %6542 = vmatpush3.msk.msra.mxu1 %vm795_vm3, %v4251_v14  ;;  %v6140_v27 = vld [vmem:[%s10312_s5 + $0xe0] sm:$0xff]  ;;  %v4564_v26 = vld [vmem:[%s10313_s6 + $0xb8] sm:$0x3] }
 0x54e   : > { %4156 = vmatmul.mubr.f32.gmra.mxu0 %v4019_v30  ;;  %6543 = vmatprep.subr.mxu1 %v4250_v29  ;;  %v4562_v30 = vld [vmem:[%s10313_s6 + $0xa8] sm:$0xff] }
 0x54f   : > { %6544 = vmatpush3.msra.mxu1 %v4250_v29  ;;  %6512 = vmatprep.subr.mxu0 %v6132_v34  ;;  %v6180_v29 = vld [vmem:[%s10313_s6 + $0x178] sm:$0x3] }
 0x550   : > { %4231 = vmatmul.mubr.f32.gmra.mxu1 %v4021_v35  ;;  %6545 = vmatprep.subr.mxu1 %v4249_v21  ;;  %v6178_v35 = vld [vmem:[%s10313_s6 + $0x168] sm:$0xff] }
 0x551   : > { %6546 = vmatpush3.msra.mxu1 %v4249_v21  ;;  %6513 = vmatpush3.msra.mxu0 %v6132_v34  ;;  %v4563_v34 = vld [vmem:[%s10313_s6 + $0xb0] sm:$0x3] }
 0x552   : > { %6547 = vmatprep.subr.mxu1 %v4248_v37  ;;  %6514 = vmatprep.subr.mxu0 %v6131_v40  ;;  %v6179_v21 = vld [vmem:[%s10313_s6 + $0x170] sm:$0x3] }
 0x553   : > { %6548 = vmatpush3.msra.mxu1 %v4248_v37  ;;  %6515 = vmatpush3.msra.mxu0 %v6131_v40  ;;  %v4561_v37 = vld [vmem:[%s10313_s6 + $0xa0] sm:$0xff] }
 0x554   : > { %6549 = vmatprep.subr.mxu1 %v4247_v42  ;;  %6516 = vmatprep.subr.mxu0 %v6130_v44  ;;  %v6177_v40 = vld [vmem:[%s10313_s6 + $0x160] sm:$0xff] }
 0x555   : > { %6550 = vmatpush3.msra.mxu1 %v4247_v42  ;;  %6517 = vmatpush3.msra.mxu0 %v6130_v44  ;;  %v4560_v42 = vld [vmem:[%s10313_s6 + $0x98] sm:$0xff] }
 0x556   : > { %6551 = vmatprep.subr.mxu1 %v4246_v15  ;;  %6518 = vmatprep.subr.mxu0 %v6129_v20  ;;  %v6176_v44 = vld [vmem:[%s10313_s6 + $0x158] sm:$0xff] }
 0x557   : > { %6552 = vmatpush3.msra.mxu1 %v4246_v15  ;;  %6519 = vmatpush3.msra.mxu0 %v6129_v20  ;;  %v4559_v15 = vld [vmem:[%s10313_s6 + $0x90] sm:$0xff] }
 0x558   : > { %6553 = vmatprep.subr.mxu1 %v4245_v48  ;;  %6520 = vmatprep.subr.mxu0 %v6128_v56  ;;  %v6175_v20 = vld [vmem:[%s10313_s6 + $0x150] sm:$0xff] }
 0x559   : > { %6554 = vmatpush3.msra.mxu1 %v4245_v48  ;;  %6521 = vmatpush3.msra.mxu0 %v6128_v56  ;;  %v4558_v48 = vld [vmem:[%s10313_s6 + $0x88] sm:$0xff] }
 0x55a   : > { %6555 = vmatprep.subr.mxu1 %v4244_v49  ;;  %6522 = vmatprep.subr.mxu0 %v6127_v3  ;;  %v6174_v56 = vld [vmem:[%s10313_s6 + $0x148] sm:$0xff] }
 0x55b   : > { %6556 = vmatpush3.msra.mxu1 %v4244_v49  ;;  %6523 = vmatpush3.msra.mxu0 %v6127_v3  ;;  %v4557_v49 = vld [vmem:[%s10313_s6 + $0x80] sm:$0xff] }
 0x55c   : > { %6557 = vmatprep.subr.mxu1 %v4243_v19  ;;  %6524 = vmatprep.subr.mxu0 %v6126_v28  ;;  %v6173_v3 = vld [vmem:[%s10313_s6 + $0x140] sm:$0xff] }
 0x55d   : > { %6558 = vmatpush3.msra.mxu1 %v4243_v19  ;;  %6525 = vmatpush3.msra.mxu0 %v6126_v28  ;;  %v4556_v19 = vld [vmem:[%s10313_s6 + $0x78] sm:$0xff] }
 0x55e   : > { %6559 = vmatprep.subr.mxu1 %v4242_v7  ;;  %6526 = vmatprep.subr.mxu0 %v6125_v12  ;;  %v6172_v28 = vld [vmem:[%s10313_s6 + $0x138] sm:$0xff] }
 0x55f   : > { %6560 = vmatpush3.msra.mxu1 %v4242_v7  ;;  %6527 = vmatpush3.msra.mxu0 %v6125_v12  ;;  %v4555_v7 = vld [vmem:[%s10313_s6 + $0x70] sm:$0xff] }
 0x560   : > { %6561 = vmatprep.subr.mxu1 %v4241_v53  ;;  %6528 = vmatprep.subr.mxu0 %v6124_v8  ;;  %v6171_v12 = vld [vmem:[%s10313_s6 + $0x130] sm:$0xff] }
 0x561   : > { %6562 = vmatpush3.msra.mxu1 %v4241_v53  ;;  %6529 = vmatpush3.msra.mxu0 %v6124_v8  ;;  %v4554_v53 = vld [vmem:[%s10313_s6 + $0x68] sm:$0xff] }
 0x562   : > { %6563 = vmatprep.subr.mxu1 %v4240_v38  ;;  %6530 = vmatprep.subr.mxu0 %v6123_v41  ;;  %v6170_v8 = vld [vmem:[%s10313_s6 + $0x128] sm:$0xff] }
 0x563   : > { %6564 = vmatpush3.msra.mxu1 %v4240_v38  ;;  %6531 = vmatpush3.msra.mxu0 %v6123_v41  ;;  %v4553_v38 = vld [vmem:[%s10313_s6 + $0x60] sm:$0xff] }
 0x564   : > { %6565 = vmatprep.subr.mxu1 %v4239_v39  ;;  %6532 = vmatprep.subr.mxu0 %v6122_v6  ;;  %v6169_v41 = vld [vmem:[%s10313_s6 + $0x120] sm:$0xff] }
 0x565   : > { %6566 = vmatpush3.msra.mxu1 %v4239_v39  ;;  %6533 = vmatpush3.msra.mxu0 %v6122_v6  ;;  %v4552_v39 = vld [vmem:[%s10313_s6 + $0x58] sm:$0xff] }
 0x566   : > { %6567 = vmatprep.subr.mxu1 %v4238_v46  ;;  %6534 = vmatprep.subr.mxu0 %v6121_v60  ;;  %v6168_v6 = vld [vmem:[%s10313_s6 + $0x118] sm:$0xff] }
 0x567   : > { %6568 = vmatpush3.msra.mxu1 %v4238_v46  ;;  %6535 = vmatpush3.msra.mxu0 %v6121_v60  ;;  %v4551_v46 = vld [vmem:[%s10313_s6 + $0x50] sm:$0xff] }
 0x568   : > { %6536 = vmatprep.subr.mxu0 %v6120_v16  ;;  %6181 = vmatprep.subr.msk.mxu1 %vm4595_vm11, %v6180_v29  ;;  %v6167_v60 = vld [vmem:[%s10313_s6 + $0x110] sm:$0xff] }
 0x569   : > { %6537 = vmatpush3.msra.mxu0 %v6120_v16  ;;  %v4550_v16 = vld [vmem:[%s10313_s6 + $0x48] sm:$0xff]  ;;  %v6205_v29 = vld [vmem:[%s10313_s6 + $0x210] sm:$0xff] }
 0x56a   : > { %6572 = vmatprep.subr.msk.mxu0 %vm795_vm3, %v6153_v36 }
 0x60a   : > { %v6344_v18 = vpop.f32.mrf.mxu0 }
 0x60c   : > { %v6345_v45 = vpop.f32.mrf.mxu0  ;;  %v4227_v50 = vpop.f32.mrf.mxu1 }
 0x60d   : > { %v6346_v51 = vadd.f32 %v6345_v45, %v6344_v18  ;;  %v4549_v18 = vld [vmem:[%s10313_s6 + $0x40] sm:$0xff] }
 0x60e   : > { %v6347_v9 = vpop.f32.mrf.mxu0  ;;  %v4229_v61 = vpop.f32.mrf.mxu1  ;;  %v6165_v45 = vld [vmem:[%s10313_s6 + $0x100] sm:$0xff] }
 0x60f   : > { %v4228_v14 = vadd.f32 %v6346_v51, %v4227_v50  ;;  %v4548_v50 = vld [vmem:[%s10313_s6 + $0x38] sm:$0xff]  ;;  %v6163_v61 = vld [vmem:[%s10313_s6 + $0xf0] sm:$0xff] }
 0x610   : > { %v6348_v52 = vpop.f32.mrf.mxu0  ;;  %v4232_v57 = vpop.f32.mrf.mxu1  ;;  %v6164_v51 = vld [vmem:[%s10313_s6 + $0xf8] sm:$0xff] }
 0x611   : > { %v4236_v58 = vmax.f32 %v4228_v14, 0.0  ;;  %v6349_v47 = vadd.f32 %v6348_v52, %v6347_v9  ;;  %v4547_v9 = vld [vmem:[%s10313_s6 + $0x30] sm:$0xff]  ;;  %v4546_v14 = vld [vmem:[%s10313_s6 + $0x28] sm:$0xff] }
 0x612   : > { %v4234_v59 = vpop.f32.mrf.mxu1  ;;  %v6162_v52 = vld [vmem:[%s10313_s6 + $0xe8] sm:$0xff] }
 0x613   : > { %v4233_v62 = vadd.f32 %v6349_v47, %v4232_v57  ;;  %6569 = vmatprep.mubr.msk.f32.mxu1 %vm4272_vm10, %v4236_v58  ;;  %v4269_v1 = vrot.slane %v4236_v58, 1  ;;  %v4452_v2 = vrot.slane %v4236_v58, 2  ;;  %v4545_v57 = vld [vmem:[%s10313_s6 + $0x20] sm:$0xff]  ;;  %v4544_v47 = vld [vmem:[%s10313_s6 + $0x18] sm:$0xff] }
 0x614   : > { %v6161_v58 = vld [vmem:[%s10313_s6 + $0xe0] sm:$0xff]  ;;  %v6160_v59 = vld [vmem:[%s10313_s6 + $0xd8] sm:$0xff] }
 0x615   : > { %v4237_v0 = vmax.f32 %v4233_v62, 0.0  ;;  %v4543_v62 = vld [vmem:[%s10313_s6 + $0x10] sm:$0xff] }
 0x617   : > { %v4270_v54 = vrot.slane %v4237_v0, 1  ;;  %v4453_v55 = vrot.slane %v4237_v0, 2  ;;  %6570 = vmatmul.mubr.msk.f32.vlgmr.msra.gmra.mxu1 %vm4272_vm10, %v4237_v0  ;;  %v6159_v0 = vld [vmem:[%s10313_s6 + $0xd0] sm:$0xff] }
 0x618   : > { %4666 = vmatprep.mubr.f32.mxu1 %v6881_v17  ;;  %6182 = vmatpush1.msk.msra.mxu1 %vm4595_vm11, %v6179_v21  ;;  %v6202_v21 = vld [vmem:[%s10313_s6 + $0x1f8] sm:$0xff] }
 0x619   : > { %v4271_v4 = vsel %vm390_vm1, %v4269_v1, %v4270_v54  ;;  %v4454_v32 = vsel %vm795_vm3, %v4452_v2, %v4453_v55  ;;  %4612 = vmatprep.subr.mxu1 %v6178_v35  ;;  %v4542_v1 = vld [vmem:[%s10313_s6 + $0x8] sm:$0xff]  ;;  %v6157_v2 = vld [vmem:[%s10313_s6 + $0xc0] sm:$0xff]  ;;  %v6201_v35 = vld [vmem:[%s10313_s6 + $0x1f0] sm:$0xff] }
 0x61a   : > { %6538 = vmatprep.mubr.msk.f32.mxu0 %vm4272_vm10, %v4271_v4  ;;  %4613 = vmatpush1.msra.mxu1 %v6177_v40  ;;  %v6210_v4 = vld [vmem:[%s10313_s6 + $0x238] sm:$0x3]  ;;  %v6199_v40 = vld [vmem:[%s10313_s6 + $0x1e0] sm:$0xff] }
 0x61b   : > { %6539 = vmatmul.mubr.msk.f32.vlgmr.msra.gmra.mxu0 %vm4272_vm10, %v4270_v54  ;;  %4614 = vmatprep.subr.mxu1 %v6176_v44  ;;  %v6158_v54 = vld [vmem:[%s10313_s6 + $0xc8] sm:$0xff]  ;;  %v6197_v44 = vld [vmem:[%s10313_s6 + $0x1d0] sm:$0xff] }
 0x61c   : > { %6573 = vmatpush3.msk.msra.mxu0 %vm795_vm3, %v6153_v36  ;;  %6600 = vmatprep.mubr.msk.f32.mxu0 %vm4272_vm10, %v4454_v32  ;;  %v6166_v36 = vld [vmem:[%s10313_s6 + $0x108] sm:$0xff] }
 0x61d   : > { %6574 = vmatprep.subr.mxu0 %v6152_v5  ;;  %4615 = vmatpush1.msra.mxu1 %v6175_v20  ;;  %v6196_v20 = vld [vmem:[%s10313_s6 + $0x1c8] sm:$0xff] }
 0x61e   : > { %6575 = vmatpush3.msra.mxu0 %v6152_v5  ;;  %4616 = vmatprep.subr.mxu1 %v6174_v56 }
 0x61f   : > { %6576 = vmatprep.subr.mxu0 %v6151_v13  ;;  %4617 = vmatpush1.msra.mxu1 %v6173_v3  ;;  %v6193_v3 = vld [vmem:[%s10313_s6 + $0x1b0] sm:$0xff] }
 0x620   : > { %6577 = vmatpush3.msra.mxu0 %v6151_v13  ;;  %4618 = vmatprep.subr.mxu1 %v6172_v28  ;;  %v6191_v28 = vld [vmem:[%s10313_s6 + $0x1a0] sm:$0xff] }
 0x621   : > { %6578 = vmatprep.subr.mxu0 %v6150_v33  ;;  %4619 = vmatpush1.msra.mxu1 %v6171_v12  ;;  %v6190_v12 = vld [vmem:[%s10313_s6 + $0x198] sm:$0xff] }
 0x622   : > { %6579 = vmatpush3.msra.mxu0 %v6150_v33  ;;  %4620 = vmatprep.subr.mxu1 %v6170_v8 }
 0x623   : > { %6580 = vmatprep.subr.mxu0 %v6149_v31  ;;  %4621 = vmatpush1.msra.mxu1 %v6169_v41  ;;  %v6187_v41 = vld [vmem:[%s10313_s6 + $0x180] sm:$0xff] }
 0x624   : > { %6581 = vmatpush3.msra.mxu0 %v6149_v31  ;;  %4622 = vmatprep.subr.mxu1 %v6168_v6 }
 0x625   : > { %6582 = vmatprep.subr.mxu0 %v6148_v43  ;;  %4623 = vmatpush1.msra.mxu1 %v6167_v60  ;;  %v4877_v60 = vld [vmem:[%s10314_s7 + $0x68] sm:$0xff] }
 0x626   : > { %6583 = vmatpush3.msra.mxu0 %v6148_v43  ;;  %4624 = vmatprep.subr.mxu1 %v6166_v36  ;;  %v4875_v36 = vld [vmem:[%s10314_s7 + $0x58] sm:$0xff] }
 0x627   : > { %6584 = vmatprep.subr.mxu0 %v6147_v63  ;;  %4625 = vmatpush1.msra.mxu1 %v6165_v45  ;;  %v4873_v45 = vld [vmem:[%s10314_s7 + $0x48] sm:$0xff] }
 0x628   : > { %6585 = vmatpush3.msra.mxu0 %v6147_v63  ;;  %4626 = vmatprep.subr.mxu1 %v6164_v51  ;;  %v4871_v51 = vld [vmem:[%s10314_s7 + $0x38] sm:$0xff] }
 0x629   : > { %6586 = vmatprep.subr.mxu0 %v6146_v10  ;;  %4627 = vmatpush1.msra.mxu1 %v6163_v61  ;;  %v4869_v61 = vld [vmem:[%s10314_s7 + $0x28] sm:$0xff] }
 0x62a   : > { %6587 = vmatpush3.msra.mxu0 %v6146_v10  ;;  %4628 = vmatprep.subr.mxu1 %v6162_v52  ;;  %v4867_v52 = vld [vmem:[%s10314_s7 + $0x18] sm:$0xff] }
 0x62b   : > { %6588 = vmatprep.subr.mxu0 %v6145_v11  ;;  %4629 = vmatpush1.msra.mxu1 %v6161_v58  ;;  %v4865_v58 = vld [vmem:[%s10314_s7 + $0x8] sm:$0xff] }
 0x62c   : > { %6589 = vmatpush3.msra.mxu0 %v6145_v11  ;;  %4630 = vmatprep.subr.mxu1 %v6160_v59  ;;  %v4881_v59 = vld [vmem:[%s10314_s7 + $0x88] sm:$0xf] }
 0x62d   : > { %6590 = vmatprep.subr.mxu0 %v6144_v22  ;;  %4631 = vmatpush1.msra.mxu1 %v6159_v0  ;;  %v6224_v0 = vld [vmem:[%s10315_s8 + $0x88] sm:$0x3f] }
 0x62e   : > { %6591 = vmatpush3.msra.mxu0 %v6144_v22  ;;  %4632 = vmatprep.subr.mxu1 %v6158_v54  ;;  %v4879_v22 = vld [vmem:[%s10314_s7 + $0x78] sm:$0xff] }
 0x62f   : > { %6592 = vmatprep.subr.mxu0 %v6143_v25  ;;  %4633 = vmatpush1.msra.mxu1 %v6157_v2  ;;  %v6222_v54 = vld [vmem:[%s10315_s8 + $0x78] sm:$0xff]  ;;  %v6220_v2 = vld [vmem:[%s10315_s8 + $0x68] sm:$0xff] }
 0x630   : > { %6593 = vmatpush3.msra.mxu0 %v6143_v25  ;;  %6211 = vmatprep.subr.msk.mxu1 %vm4595_vm11, %v6210_v4  ;;  %v6219_v4 = vld [vmem:[%s10315_s8 + $0x60] sm:$0xff] }
 0x631   : > { %6594 = vmatprep.subr.mxu0 %v6142_v23 }
 0x632   : > { %6595 = vmatpush3.msra.mxu0 %v6142_v23  ;;  %v6209_v23 = vld [vmem:[%s10313_s6 + $0x230] sm:$0x3] }
 0x633   : > { %6596 = vmatprep.subr.mxu0 %v6141_v24 }
 0x634   : > { %6597 = vmatpush3.msra.mxu0 %v6141_v24  ;;  %v6208_v24 = vld [vmem:[%s10313_s6 + $0x228] sm:$0xff] }
 0x635   : > { %6598 = vmatprep.subr.mxu0 %v6140_v27 }
 0x636   : > { %6599 = vmatpush3.msra.mxu0 %v6140_v27  ;;  %v6207_v27 = vld [vmem:[%s10313_s6 + $0x220] sm:$0xff] }
 0x637   : > { %6601 = vmatmul.mubr.msk.f32.vlgmr.msra.gmra.mxu0 %vm4272_vm10, %v4453_v55  ;;  %6184 = vmatprep.subr.msk.mxu0 %vm4595_vm11, %v4564_v26  ;;  %v4541_v55 = vld [vmem:[%s10313_s6] sm:$0xff]  ;;  %v6206_v26 = vld [vmem:[%s10313_s6 + $0x218] sm:$0xff] }
 0x638   : > { %4745 = vmatprep.mubr.f32.mxu0 %v6881_v17  ;;  %6185 = vmatpush1.msk.msra.mxu0 %vm4595_vm11, %v4563_v34  ;;  %v6203_v34 = vld [vmem:[%s10313_s6 + $0x200] sm:$0xff] }
 0x639   : > { %4691 = vmatprep.subr.mxu0 %v4562_v30  ;;  %v6204_v30 = vld [vmem:[%s10313_s6 + $0x208] sm:$0xff] }
 0x63a   : > { %4692 = vmatpush1.msra.mxu0 %v4561_v37  ;;  %v6200_v37 = vld [vmem:[%s10313_s6 + $0x1e8] sm:$0xff] }
 0x63b   : > { %4693 = vmatprep.subr.mxu0 %v4560_v42  ;;  %v6198_v42 = vld [vmem:[%s10313_s6 + $0x1d8] sm:$0xff] }
 0x63c   : > { %4694 = vmatpush1.msra.mxu0 %v4559_v15 }
 0x63d   : > { %4695 = vmatprep.subr.mxu0 %v4558_v48  ;;  %v6195_v48 = vld [vmem:[%s10313_s6 + $0x1c0] sm:$0xff] }
 0x63e   : > { %4696 = vmatpush1.msra.mxu0 %v4557_v49  ;;  %v6194_v49 = vld [vmem:[%s10313_s6 + $0x1b8] sm:$0xff] }
 0x63f   : > { %4697 = vmatprep.subr.mxu0 %v4556_v19  ;;  %v6192_v19 = vld [vmem:[%s10313_s6 + $0x1a8] sm:$0xff] }
 0x640   : > { %4698 = vmatpush1.msra.mxu0 %v4555_v7 }
 0x641   : > { %4699 = vmatprep.subr.mxu0 %v4554_v53  ;;  %v6189_v53 = vld [vmem:[%s10313_s6 + $0x190] sm:$0xff] }
 0x642   : > { %4700 = vmatpush1.msra.mxu0 %v4553_v38  ;;  %v6188_v38 = vld [vmem:[%s10313_s6 + $0x188] sm:$0xff] }
 0x643   : > { %4701 = vmatprep.subr.mxu0 %v4552_v39 }
 0x644   : > { %4702 = vmatpush1.msra.mxu0 %v4551_v46  ;;  %v4878_v46 = vld [vmem:[%s10314_s7 + $0x70] sm:$0xff] }
 0x645   : > { %4703 = vmatprep.subr.mxu0 %v4550_v16  ;;  %v4876_v16 = vld [vmem:[%s10314_s7 + $0x60] sm:$0xff] }
 0x646   : > { %4704 = vmatpush1.msra.mxu0 %v4549_v18  ;;  %v4874_v18 = vld [vmem:[%s10314_s7 + $0x50] sm:$0xff] }
 0x647   : > { %4705 = vmatprep.subr.mxu0 %v4548_v50  ;;  %v4872_v50 = vld [vmem:[%s10314_s7 + $0x40] sm:$0xff] }
 0x648   : > { %4706 = vmatpush1.msra.mxu0 %v4547_v9  ;;  %v4870_v9 = vld [vmem:[%s10314_s7 + $0x30] sm:$0xff] }
 0x649   : > { %4707 = vmatprep.subr.mxu0 %v4546_v14  ;;  %v4868_v14 = vld [vmem:[%s10314_s7 + $0x20] sm:$0xff] }
 0x64a   : > { %4708 = vmatpush1.msra.mxu0 %v4545_v57  ;;  %v4866_v57 = vld [vmem:[%s10314_s7 + $0x10] sm:$0xff] }
 0x64b   : > { %4709 = vmatprep.subr.mxu0 %v4544_v47  ;;  %v4864_v47 = vld [vmem:[%s10314_s7] sm:$0xff] }
 0x64c   : > { %4710 = vmatpush1.msra.mxu0 %v4543_v62  ;;  %v4880_v62 = vld [vmem:[%s10314_s7 + $0x80] sm:$0xff] }
 0x64d   : > { %4711 = vmatprep.subr.mxu0 %v4542_v1  ;;  %v6223_v1 = vld [vmem:[%s10315_s8 + $0x80] sm:$0xff] }
 0x64e   : > { %4712 = vmatpush1.msra.mxu0 %v4541_v55  ;;  %v6221_v55 = vld [vmem:[%s10315_s8 + $0x70] sm:$0xff] }
 0x64f   : > { %4889 = vmatprep.subr.mxu0 %v6881_v17 }
 0x6d7   : > { %v6571_v32 = vpop.f32.mrf.mxu1 }
 0x6d9   : > { %v4428_v33 = vpop.f32.mrf.mxu1 }
 0x6db   : > { %v6540_v5 = vpop.f32.mrf.mxu0 }
 0x6dc   : > { %v4434_v15 = vadd.f32 %v6571_v32, %v6540_v5  ;;  %v6218_v5 = vld [vmem:[%s10315_s8 + $0x58] sm:$0xff] }
 0x6dd   : > { %v4346_v13 = vpop.f32.mrf.mxu0 }
 0x6de   : > { %v4429_v43 = vadd.f32 %v4428_v33, %v4346_v13 }
 0x6f7   : > { %v6602_v31 = vpop.f32.mrf.mxu0 }
 0x6f8   : > { %v4538_v56 = vadd.f32 %v6602_v31, %v4434_v15 }
 0x6f9   : > { %v4528_v63 = vpop.f32.mrf.mxu0 }
 0x6fa   : > { %v4537_v10 = vadd.f32 %v4528_v63, %v4429_v43  ;;  %v4540_v7 = vmax.f32 %v4538_v56, 0.0 }
 0x6fc   : > { %v4539_v11 = vmax.f32 %v4537_v10, 0.0  ;;  %v4779_v39 = vrot.slane %v4540_v7, 2  ;;  %v6258_v7 = vld [vmem:[%s10315_s8 + $0x158] sm:$0xff] }
 0x6fe   : > { %v4591_v25 = vrot.slane %v4539_v11, 1  ;;  %6186 = vmatmul.mubr.msk.f32.vlgmr.msra.gmra.mxu0 %vm4592_vm12, %v4539_v11  ;;  %v4778_v8 = vrot.slane %v4539_v11, 2 }
 0x6ff   : > { %4890 = vmatpush1.msra.mxu0 %v4879_v22 }
 0x700   : > { %6183 = vmatmul.mubr.msk.f32.vlgmr.msra.gmra.mxu1 %vm4592_vm12, %v4591_v25  ;;  %4891 = vmatprep.subr.mxu0 %v6881_v17  ;;  %v4780_v6 = vsel %vm795_vm3, %v4778_v8, %v4779_v39  ;;  %v4965_v8 = vld [vmem:[%s10315_s8 + $0x28] sm:$0xff]  ;;  %v6255_v39 = vld [vmem:[%s10315_s8 + $0x140] sm:$0xff] }
 0x701   : > { %6212 = vmatpush1.msk.msra.mxu1 %vm4595_vm11, %v6209_v23  ;;  %4853 = vmatprep.mubr.f32.mxu1 %v6881_v17 }
 0x702   : > { %4799 = vmatprep.subr.mxu1 %v6208_v24  ;;  %4892 = vmatpush1.msra.mxu0 %v4878_v46  ;;  %v6254_v46 = vld [vmem:[%s10315_s8 + $0x138] sm:$0xff] }
 0x703   : > { %4800 = vmatpush1.msra.mxu1 %v6207_v27  ;;  %4893 = vmatprep.subr.mxu0 %v6881_v17  ;;  %v6237_v27 = vld [vmem:[%s10315_s8 + $0xd0] sm:$0x3f] }
 0x704   : > { %4801 = vmatprep.subr.mxu1 %v6206_v26  ;;  %4894 = vmatpush1.msra.mxu0 %v4877_v60  ;;  %v6236_v26 = vld [vmem:[%s10315_s8 + $0xc8] sm:$0xff]  ;;  %v4962_v60 = vld [vmem:[%s10315_s8 + $0x10] sm:$0xff] }
 0x705   : > { %4802 = vmatpush1.msra.mxu1 %v6205_v29  ;;  %4895 = vmatprep.subr.mxu0 %v6881_v17  ;;  %v6235_v29 = vld [vmem:[%s10315_s8 + $0xc0] sm:$0xff] }
 0x706   : > { %4803 = vmatprep.subr.mxu1 %v6204_v30  ;;  %4896 = vmatpush1.msra.mxu0 %v4876_v16  ;;  %v6234_v30 = vld [vmem:[%s10315_s8 + $0xb8] sm:$0xff]  ;;  %v6253_v16 = vld [vmem:[%s10315_s8 + $0x130] sm:$0xff] }
 0x707   : > { %4804 = vmatpush1.msra.mxu1 %v6203_v34  ;;  %4897 = vmatprep.subr.mxu0 %v6881_v17  ;;  %v6233_v34 = vld [vmem:[%s10315_s8 + $0xb0] sm:$0xff] }
 0x708   : > { %4805 = vmatprep.subr.mxu1 %v6202_v21  ;;  %4898 = vmatpush1.msra.mxu0 %v4875_v36  ;;  %v6232_v21 = vld [vmem:[%s10315_s8 + $0xa8] sm:$0xff] }
 0x709   : > { %4806 = vmatpush1.msra.mxu1 %v6201_v35  ;;  %4899 = vmatprep.subr.mxu0 %v6881_v17  ;;  %v6231_v35 = vld [vmem:[%s10315_s8 + $0xa0] sm:$0xff]  ;;  %v4961_v36 = vld [vmem:[%s10315_s8 + $0x8] sm:$0xff] }
 0x70a   : > { %4807 = vmatprep.subr.mxu1 %v6200_v37  ;;  %4900 = vmatpush1.msra.mxu0 %v4874_v18  ;;  %v6217_v37 = vld [vmem:[%s10315_s8 + $0x50] sm:$0xff]  ;;  %v6252_v18 = vld [vmem:[%s10315_s8 + $0x128] sm:$0xff] }
 0x70b   : > { %4808 = vmatpush1.msra.mxu1 %v6199_v40  ;;  %4901 = vmatprep.subr.mxu0 %v6881_v17  ;;  %v6230_v40 = vld [vmem:[%s10315_s8 + $0x98] sm:$0xff] }
 0x70c   : > { %4809 = vmatprep.subr.mxu1 %v6198_v42  ;;  %4902 = vmatpush1.msra.mxu0 %v4873_v45  ;;  %v6216_v42 = vld [vmem:[%s10315_s8 + $0x48] sm:$0xff]  ;;  %v4960_v45 = vld [vmem:[%s10315_s8] sm:$0xff] }
 0x70d   : > { %4810 = vmatpush1.msra.mxu1 %v6197_v44  ;;  %4903 = vmatprep.subr.mxu0 %v6881_v17  ;;  %v6229_v44 = vld [vmem:[%s10315_s8 + $0x90] sm:$0xff] }
 0x70e   : > { %4811 = vmatprep.subr.mxu1 %v6196_v20  ;;  %4904 = vmatpush1.msra.mxu0 %v4872_v50  ;;  %v6251_v50 = vld [vmem:[%s10315_s8 + $0x120] sm:$0xff] }
 0x70f   : > { %4812 = vmatpush1.msra.mxu1 %v6195_v48  ;;  %4905 = vmatprep.subr.mxu0 %v6881_v17 }
 0x710   : > { %4813 = vmatprep.subr.mxu1 %v6194_v49  ;;  %4906 = vmatpush1.msra.mxu0 %v4871_v51  ;;  %v4968_v49 = vld [vmem:[%s10315_s8 + $0x40] sm:$0x3f] }
 0x711   : > { %4814 = vmatpush1.msra.mxu1 %v6193_v3  ;;  %4907 = vmatprep.subr.mxu0 %v6881_v17 }
 0x712   : > { %4815 = vmatprep.subr.mxu1 %v6192_v19  ;;  %4908 = vmatpush1.msra.mxu0 %v4870_v9  ;;  %v6259_v19 = vld [vmem:[%s10315_s8 + $0x160] sm:$0x3f]  ;;  %v6248_v9 = vld [vmem:[%s10315_s8 + $0x118] sm:$0x3f] }
 0x713   : > { %4816 = vmatpush1.msra.mxu1 %v6191_v28  ;;  %4909 = vmatprep.subr.mxu0 %v6881_v17  ;;  %v4967_v28 = vld [vmem:[%s10315_s8 + $0x38] sm:$0xff] }
 0x714   : > { %4817 = vmatprep.subr.mxu1 %v6190_v12  ;;  %4910 = vmatpush1.msra.mxu0 %v4869_v61  ;;  %v4966_v12 = vld [vmem:[%s10315_s8 + $0x30] sm:$0xff] }
 0x715   : > { %4818 = vmatpush1.msra.mxu1 %v6189_v53  ;;  %4911 = vmatprep.subr.mxu0 %v6881_v17  ;;  %v6257_v53 = vld [vmem:[%s10315_s8 + $0x150] sm:$0xff] }
 0x716   : > { %4819 = vmatprep.subr.mxu1 %v6188_v38  ;;  %4912 = vmatpush1.msra.mxu0 %v4868_v14  ;;  %v6256_v38 = vld [vmem:[%s10315_s8 + $0x148] sm:$0xff]  ;;  %v6281_v61 = vld [vmem:[%s10315_s8 + $0x1f0] sm:$0x3f] }
 0x717   : > { %4820 = vmatpush1.msra.mxu1 %v6187_v41  ;;  %4913 = vmatprep.subr.mxu0 %v6881_v17  ;;  %v4964_v41 = vld [vmem:[%s10315_s8 + $0x20] sm:$0xff]  ;;  %v6247_v14 = vld [vmem:[%s10315_s8 + $0x110] sm:$0xff] }
 0x718   : > { %6213 = vmatmul.mubr.msk.f32.vlgmr.msra.gmra.mxu1 %vm4592_vm12, %v4780_v6  ;;  %6603 = vmatprep.subr.mxu1 %v6881_v17  ;;  %v4963_v6 = vld [vmem:[%s10315_s8 + $0x18] sm:$0xff] }
 0x719   : > { %4914 = vmatpush1.msra.mxu0 %v4867_v52  ;;  %6604 = vmatpush3.msk.msra.mxu1 %vm795_vm3, %v6224_v0  ;;  %v6280_v52 = vld [vmem:[%s10315_s8 + $0x1e8] sm:$0xff]  ;;  %v6277_v0 = vld [vmem:[%s10315_s8 + $0x1d0] sm:$0xff] }
 0x71a   : > { %4915 = vmatprep.subr.mxu0 %v6881_v17  ;;  %6605 = vmatprep.subr.mxu1 %v6881_v17 }
 0x71b   : > { %4916 = vmatpush1.msra.mxu0 %v4866_v57  ;;  %6606 = vmatpush3.msra.mxu1 %v6223_v1  ;;  %v6246_v57 = vld [vmem:[%s10315_s8 + $0x108] sm:$0xff]  ;;  %v6243_v1 = vld [vmem:[%s10315_s8 + $0xf0] sm:$0xff] }
 0x71c   : > { %4917 = vmatprep.subr.mxu0 %v6881_v17  ;;  %6607 = vmatprep.subr.mxu1 %v6881_v17 }
 0x71d   : > { %4918 = vmatpush1.msra.mxu0 %v4865_v58  ;;  %6608 = vmatpush3.msra.mxu1 %v6222_v54  ;;  %v6279_v58 = vld [vmem:[%s10315_s8 + $0x1e0] sm:$0xff]  ;;  %v6276_v54 = vld [vmem:[%s10315_s8 + $0x1c8] sm:$0xff] }
 0x71e   : > { %4919 = vmatprep.subr.mxu0 %v6881_v17  ;;  %6609 = vmatprep.subr.mxu1 %v6881_v17 }
 0x71f   : > { %4920 = vmatpush1.msra.mxu0 %v4864_v47  ;;  %6610 = vmatpush3.msra.mxu1 %v6221_v55  ;;  %v6245_v47 = vld [vmem:[%s10315_s8 + $0x100] sm:$0xff]  ;;  %v6242_v55 = vld [vmem:[%s10315_s8 + $0xe8] sm:$0xff] }
 0x720   : > { %4949 = vmatprep.subr.mxu0 %v6881_v17  ;;  %6611 = vmatprep.subr.mxu1 %v6881_v17 }
 0x721   : > { %6214 = vmatpush2.msk.msra.mxu0 %vm407_vm0, %v4881_v59  ;;  %6612 = vmatpush3.msra.mxu1 %v6220_v2  ;;  %v6278_v59 = vld [vmem:[%s10315_s8 + $0x1d8] sm:$0xff]  ;;  %v6275_v2 = vld [vmem:[%s10315_s8 + $0x1c0] sm:$0xff]  ;;  %vm5567_vm0 = vcmask 73728  }
 0x722   : > { %4951 = vmatprep.subr.mxu0 %v6881_v17  ;;  %6613 = vmatprep.subr.mxu1 %v6881_v17 }
 0x723   : > { %4952 = vmatpush2.msra.mxu0 %v4880_v62  ;;  %6614 = vmatpush3.msra.mxu1 %v6219_v4  ;;  %v6244_v62 = vld [vmem:[%s10315_s8 + $0xf8] sm:$0xff]  ;;  %v6241_v4 = vld [vmem:[%s10315_s8 + $0xe0] sm:$0xff] }
 0x724   : > { %6645 = vmatprep.subr.mxu0 %v6881_v17  ;;  %6615 = vmatprep.subr.mxu1 %v6881_v17 }
 0x725   : > { %6616 = vmatpush3.msra.mxu1 %v6218_v5  ;;  %6621 = vmatprep.mubr.msk.f32.mxu1 %vm6883_vm14, %v6881_v17  ;;  %v6274_v5 = vld [vmem:[%s10315_s8 + $0x1b8] sm:$0xff] }
 0x726   : > { %6617 = vmatprep.subr.mxu1 %v6881_v17 }
 0x727   : > { %6618 = vmatpush3.msra.mxu1 %v6217_v37 }
 0x728   : > { %6619 = vmatprep.subr.mxu1 %v6881_v17 }
 0x729   : > { %6620 = vmatpush3.msra.mxu1 %v6216_v42 }
 0x72a   : > { %6624 = vmatprep.subr.mxu1 %v6881_v17 }
 0x7be   : > { %v4747_v13 = vpop.f32.mrf.mxu0 }
 0x7c0   : > { %v4668_v32 = vpop.f32.mrf.mxu1  ;;  %v4749_v43 = vpop.f32.mrf.mxu0 }
 0x7c1   : > { %v4748_v31 = vadd.f32 %v4747_v13, %v4668_v32  ;;  %v6240_v32 = vld [vmem:[%s10315_s8 + $0xd8] sm:$0xff]  ;;  %v6273_v13 = vld [vmem:[%s10315_s8 + $0x1b0] sm:$0xff] }
 0x7c2   : > { %v4670_v33 = vpop.f32.mrf.mxu1 }
 0x7c3   : > { %v4750_v10 = vadd.f32 %v4749_v43, %v4670_v33 }
 0x7d8   : > { %v4855_v63 = vpop.f32.mrf.mxu1 }
 0x7d9   : > { %v4860_v11 = vadd.f32 %v4855_v63, %v4748_v31  ;;  %v6270_v31 = vld [vmem:[%s10315_s8 + $0x1a8] sm:$0x3f]  ;;  %v6269_v63 = vld [vmem:[%s10315_s8 + $0x1a0] sm:$0xff] }
 0x7da   : > { %v4857_v22 = vpop.f32.mrf.mxu1 }
 0x7db   : > { %v4861_v25 = vadd.f32 %v4857_v22, %v4750_v10  ;;  %v4862_v24 = vmax.f32 %v4860_v11, 0.0  ;;  %v6268_v10 = vld [vmem:[%s10315_s8 + $0x198] sm:$0xff]  ;;  %v6267_v11 = vld [vmem:[%s10315_s8 + $0x190] sm:$0xff]  ;;  %v6266_v22 = vld [vmem:[%s10315_s8 + $0x188] sm:$0xff] }
 0x7dd   : > { %v4863_v23 = vmax.f32 %v4861_v25, 0.0  ;;  %v6265_v25 = vld [vmem:[%s10315_s8 + $0x180] sm:$0xff] }
 0x7df   : > { %6215 = vmatprep.mubr.msk.f32.mxu0 %vm4882_vm13, %v4863_v23  ;;  %v6264_v23 = vld [vmem:[%s10315_s8 + $0x178] sm:$0xff] }
 0x7e0   : > { %4954 = vmatmul.mubr.f32.vlgmr.msra.gmra.mxu0 %v4862_v24  ;;  %v6263_v24 = vld [vmem:[%s10315_s8 + $0x170] sm:$0xff] }
 0x7e1   : > { %6646 = vmatpush3.msk.msra.mxu0 %vm795_vm3, %v6237_v27  ;;  %6663 = vmatprep.mubr.msk.f32.mxu0 %vm6883_vm14, %v6881_v17  ;;  %v6262_v27 = vld [vmem:[%s10315_s8 + $0x168] sm:$0xff] }
 0x7e2   : > { %6647 = vmatprep.subr.mxu0 %v6881_v17 }
 0x7e3   : > { %6648 = vmatpush3.msra.mxu0 %v6236_v26 }
 0x7e4   : > { %6649 = vmatprep.subr.mxu0 %v6881_v17 }
 0x7e5   : > { %6650 = vmatpush3.msra.mxu0 %v6235_v29 }
 0x7e6   : > { %6651 = vmatprep.subr.mxu0 %v6881_v17 }
 0x7e7   : > { %6652 = vmatpush3.msra.mxu0 %v6234_v30 }
 0x7e8   : > { %6653 = vmatprep.subr.mxu0 %v6881_v17 }
 0x7e9   : > { %6654 = vmatpush3.msra.mxu0 %v6233_v34 }
 0x7ea   : > { %6655 = vmatprep.subr.mxu0 %v6881_v17 }
 0x7eb   : > { %6656 = vmatpush3.msra.mxu0 %v6232_v21 }
 0x7ec   : > { %6657 = vmatprep.subr.mxu0 %v6881_v17 }
 0x7ed   : > { %6658 = vmatpush3.msra.mxu0 %v6231_v35 }
 0x7ee   : > { %6659 = vmatprep.subr.mxu0 %v6881_v17 }
 0x7ef   : > { %6660 = vmatpush3.msra.mxu0 %v6230_v40 }
 0x7f0   : > { %6661 = vmatprep.subr.mxu0 %v6881_v17 }
 0x7f1   : > { %6662 = vmatpush3.msra.mxu0 %v6229_v44 }
 0x7f2   : > { %6687 = vmatprep.subr.mxu0 %v6881_v17 }
 0x8a0   : > { %v4955_v15 = vpop.f32.mrf.mxu0 }
 0x8a1   : > { %v10061_v20 = vmax.f32 %v4955_v15, 0.0 }
 0x8a2   : > { %v4957_v48 = vpop.f32.mrf.mxu0 }
 0x8a3   : > { %v4980_v56 = vrot.slane %v10061_v20, 1  ;;  %v5142_v3 = vrot.slane %v10061_v20, 2  ;;  %v5316_v51 = vrot.slane %v10061_v20, 4  ;;  %v5229_v33 = vrot.slane %v10061_v20, 3 }
 0x8a4   : > { %v5490_v43 = vrot.slane %v10061_v20, 6  ;;  %v5403_v26 = vrot.slane %v10061_v20, 5 }
 0x8a5   : > { %6622 = vmatmul.mubr.msk.f32.vlgmr.msra.gmra.mxu1 %vm4981_vm15, %v4980_v56  ;;  %6664 = vmatmul.mubr.msk.f32.vlgmr.msra.gmra.mxu0 %vm4981_vm15, %v5142_v3 }
 0x8a6   : > { %6625 = vmatpush3.msk.msra.mxu1 %vm795_vm3, %v4968_v49  ;;  %6688 = vmatpush3.msk.msra.mxu0 %vm795_vm3, %v6259_v19 }
 0x8a7   : > { %6626 = vmatprep.subr.mxu1 %v6881_v17  ;;  %6689 = vmatprep.subr.mxu0 %v6881_v17 }
 0x8a8   : > { %6627 = vmatpush3.msra.mxu1 %v4967_v28  ;;  %6690 = vmatpush3.msra.mxu0 %v6258_v7 }
 0x8a9   : > { %6628 = vmatprep.subr.mxu1 %v6881_v17  ;;  %6691 = vmatprep.subr.mxu0 %v6881_v17 }
 0x8aa   : > { %6629 = vmatpush3.msra.mxu1 %v4966_v12  ;;  %6692 = vmatpush3.msra.mxu0 %v6257_v53 }
 0x8ab   : > { %6630 = vmatprep.subr.mxu1 %v6881_v17  ;;  %6693 = vmatprep.subr.mxu0 %v6881_v17 }
 0x8ac   : > { %6631 = vmatpush3.msra.mxu1 %v4965_v8  ;;  %6694 = vmatpush3.msra.mxu0 %v6256_v38 }
 0x8ad   : > { %6632 = vmatprep.subr.mxu1 %v6881_v17  ;;  %6695 = vmatprep.subr.mxu0 %v6881_v17 }
 0x8ae   : > { %6633 = vmatpush3.msra.mxu1 %v4964_v41  ;;  %6696 = vmatpush3.msra.mxu0 %v6255_v39 }
 0x8af   : > { %6634 = vmatprep.subr.mxu1 %v6881_v17  ;;  %6697 = vmatprep.subr.mxu0 %v6881_v17 }
 0x8b0   : > { %6635 = vmatpush3.msra.mxu1 %v4963_v6  ;;  %6698 = vmatpush3.msra.mxu0 %v6254_v46 }
 0x8b1   : > { %6636 = vmatprep.subr.mxu1 %v6881_v17  ;;  %6699 = vmatprep.subr.mxu0 %v6881_v17 }
 0x8b2   : > { %6637 = vmatpush3.msra.mxu1 %v4962_v60  ;;  %6700 = vmatpush3.msra.mxu0 %v6253_v16 }
 0x8b3   : > { %6638 = vmatprep.subr.mxu1 %v6881_v17  ;;  %6701 = vmatprep.subr.mxu0 %v6881_v17 }
 0x8b4   : > { %6639 = vmatpush3.msra.mxu1 %v4961_v36  ;;  %6702 = vmatpush3.msra.mxu0 %v6252_v18 }
 0x8b5   : > { %6640 = vmatprep.subr.mxu1 %v6881_v17  ;;  %6703 = vmatprep.subr.mxu0 %v6881_v17 }
 0x8b6   : > { %6641 = vmatpush3.msra.mxu1 %v4960_v45  ;;  %6642 = vmatprep.mubr.msk.f32.mxu1 %vm6883_vm14, %v6881_v17 }
 0x8b7   : > { %6704 = vmatpush3.msra.mxu0 %v6251_v50  ;;  %6705 = vmatprep.mubr.msk.f32.mxu0 %vm6883_vm14, %v6881_v17 }
 0x8b8   : > { %6643 = vmatmul.mubr.msk.f32.vlgmr.msra.gmra.mxu1 %vm4981_vm15, %v10061_v20  ;;  %6666 = vmatprep.subr.mxu1 %v6881_v17 }
 0x8b9   : > { %6706 = vmatmul.mubr.msk.f32.vlgmr.msra.gmra.mxu0 %vm4981_vm15, %v5316_v51  ;;  %6729 = vmatprep.subr.mxu0 %v6881_v17 }
 0x8ba   : > { %6667 = vmatpush3.msk.msra.mxu1 %vm795_vm3, %v6248_v9  ;;  %6730 = vmatpush3.msk.msra.mxu0 %vm795_vm3, %v6281_v61 }
 0x8bb   : > { %6668 = vmatprep.subr.mxu1 %v6881_v17  ;;  %6731 = vmatprep.subr.mxu0 %v6881_v17 }
 0x8bc   : > { %6669 = vmatpush3.msra.mxu1 %v6247_v14  ;;  %6732 = vmatpush3.msra.mxu0 %v6280_v52 }
 0x8bd   : > { %6670 = vmatprep.subr.mxu1 %v6881_v17  ;;  %6733 = vmatprep.subr.mxu0 %v6881_v17 }
 0x8be   : > { %6671 = vmatpush3.msra.mxu1 %v6246_v57  ;;  %6734 = vmatpush3.msra.mxu0 %v6279_v58 }
 0x8bf   : > { %6672 = vmatprep.subr.mxu1 %v6881_v17  ;;  %6735 = vmatprep.subr.mxu0 %v6881_v17 }
 0x8c0   : > { %6673 = vmatpush3.msra.mxu1 %v6245_v47  ;;  %6736 = vmatpush3.msra.mxu0 %v6278_v59 }
 0x8c1   : > { %6674 = vmatprep.subr.mxu1 %v6881_v17  ;;  %6737 = vmatprep.subr.mxu0 %v6881_v17 }
 0x8c2   : > { %6675 = vmatpush3.msra.mxu1 %v6244_v62  ;;  %6738 = vmatpush3.msra.mxu0 %v6277_v0 }
 0x8c3   : > { %6676 = vmatprep.subr.mxu1 %v6881_v17  ;;  %6739 = vmatprep.subr.mxu0 %v6881_v17 }
 0x8c4   : > { %6677 = vmatpush3.msra.mxu1 %v6243_v1  ;;  %6740 = vmatpush3.msra.mxu0 %v6276_v54 }
 0x8c5   : > { %6678 = vmatprep.subr.mxu1 %v6881_v17  ;;  %6741 = vmatprep.subr.mxu0 %v6881_v17 }
 0x8c6   : > { %6679 = vmatpush3.msra.mxu1 %v6242_v55  ;;  %6742 = vmatpush3.msra.mxu0 %v6275_v2 }
 0x8c7   : > { %6680 = vmatprep.subr.mxu1 %v6881_v17  ;;  %6743 = vmatprep.subr.mxu0 %v6881_v17 }
 0x8c8   : > { %6681 = vmatpush3.msra.mxu1 %v6241_v4  ;;  %6744 = vmatpush3.msra.mxu0 %v6274_v5 }
 0x8c9   : > { %6682 = vmatprep.subr.mxu1 %v6881_v17  ;;  %6745 = vmatprep.subr.mxu0 %v6881_v17 }
 0x8ca   : > { %6683 = vmatpush3.msra.mxu1 %v6240_v32  ;;  %6684 = vmatprep.mubr.msk.f32.mxu1 %vm6883_vm14, %v6881_v17 }
 0x8cb   : > { %6746 = vmatpush3.msra.mxu0 %v6273_v13  ;;  %6747 = vmatprep.mubr.msk.f32.mxu0 %vm6883_vm14, %v6881_v17 }
 0x8cc   : > { %6685 = vmatmul.mubr.msk.f32.vlgmr.msra.gmra.mxu1 %vm4981_vm15, %v5229_v33  ;;  %6708 = vmatprep.subr.mxu1 %v6881_v17 }
 0x8cd   : > { %6748 = vmatmul.mubr.msk.f32.vlgmr.msra.gmra.mxu0 %vm4981_vm15, %v5490_v43  ;;  %6709 = vmatpush3.msk.msra.mxu1 %vm795_vm3, %v6270_v31 }
 0x8ce   : > { %6710 = vmatprep.subr.mxu1 %v6881_v17  ;;  %6726 = vmatprep.mubr.msk.f32.mxu1 %vm6883_vm14, %v6881_v17 }
 0x8cf   : > { %6711 = vmatpush3.msra.mxu1 %v6269_v63 }
 0x8d0   : > { %6712 = vmatprep.subr.mxu1 %v6881_v17 }
 0x8d1   : > { %6713 = vmatpush3.msra.mxu1 %v6268_v10 }
 0x8d2   : > { %6714 = vmatprep.subr.mxu1 %v6881_v17 }
 0x8d3   : > { %6715 = vmatpush3.msra.mxu1 %v6267_v11 }
 0x8d4   : > { %6716 = vmatprep.subr.mxu1 %v6881_v17 }
 0x8d5   : > { %6717 = vmatpush3.msra.mxu1 %v6266_v22 }
 0x8d6   : > { %6718 = vmatprep.subr.mxu1 %v6881_v17 }
 0x8d7   : > { %6719 = vmatpush3.msra.mxu1 %v6265_v25 }
 0x8d8   : > { %6720 = vmatprep.subr.mxu1 %v6881_v17 }
 0x8d9   : > { %6721 = vmatpush3.msra.mxu1 %v6264_v23 }
 0x8da   : > { %6722 = vmatprep.subr.mxu1 %v6881_v17 }
 0x8db   : > { %6723 = vmatpush3.msra.mxu1 %v6263_v24 }
 0x8dc   : > { %6724 = vmatprep.subr.mxu1 %v6881_v17 }
 0x8dd   : > { %6725 = vmatpush3.msra.mxu1 %v6262_v27 }
 0x8de   : > { %6727 = vmatmul.mubr.msk.f32.vlgmr.msra.gmra.mxu1 %vm4981_vm15, %v5403_v26 }
 0x965   : > { %v5053_v29 = vpop.f32.mrf.mxu1  ;;  %v5214_v30 = vpop.f32.mrf.mxu0 }
 0x967   : > { %v6623_v34 = vpop.f32.mrf.mxu1  ;;  %v6665_v21 = vpop.f32.mrf.mxu0 }
 0x978   : > { %v5128_v35 = vpop.f32.mrf.mxu1 }
 0x979   : > { %v5388_v37 = vpop.f32.mrf.mxu0  ;;  %v5129_v49 = vadd.f32 %v5128_v35, %v5053_v29 }
 0x97a   : > { %v6644_v40 = vpop.f32.mrf.mxu1 }
 0x97b   : > { %v6707_v42 = vpop.f32.mrf.mxu0  ;;  %v5218_v3 = vadd.f32 %v5214_v30, %v5129_v49 }
 0x98c   : > { %v5301_v44 = vpop.f32.mrf.mxu1 }
 0x98d   : > { %v5562_v15 = vpop.f32.mrf.mxu0  ;;  %v5305_v17 = vadd.f32 %v5301_v44, %v5218_v3 }
 0x98e   : > { %v6686_v48 = vpop.f32.mrf.mxu1 }
 0x98f   : > { %v6749_v56 = vpop.f32.mrf.mxu0  ;;  %v5392_v19 = vadd.f32 %v5388_v37, %v5305_v17 }
 0x99e   : > { %v5475_v20 = vpop.f32.mrf.mxu1 }
 0x99f   : > { %v5479_v28 = vadd.f32 %v5475_v20, %v5392_v19 }
 0x9a0   : > { %v6728_v7 = vpop.f32.mrf.mxu1 }
 0x9a1   : > { %v5566_v12 = vadd.f32 %v5562_v15, %v5479_v28 }
 0x9a3   : > { %v5568_v53 = vsel %vm5567_vm0, %v5566_v12, -inf }
 0x9a4   : > { %5569 = vmax.xlane.f32.xlu1 %v5568_v53 }
 0xa2d   : > { %v5570_v8 = vpop.xlane.xlu1 %5569 }
 0xa2e   : > { %v5571_v38 = vsub.f32 %v5566_v12, %v5570_v8 }
 0xa30   : > { %v5572_v41 = vmul.f32 1.442695, %v5571_v38 }
 0xa32   : > { %6815 = vpow2.f32 %v5572_v41 }
 0xa3f   : > { %v6816_v39 = vpop.eup %6815 }
 0xa40   : > { %v5574_v6 = vsel %vm5567_vm0, %v6816_v39, 0.0 }
 0xa41   : > { %5575 = vadd.xlane.f32.xlu0 %v5574_v6 }
 0xaca   : > { %v5576_v46 = vpop.xlane.xlu0 %5575 }
 0xacb   : > { %6817 = vlog2.f32 %v5576_v46 }
 0xad8   : > { %v6818_v60 = vpop.eup %6817 }
 0xad9   : > { %v5578_v16 = vmul.f32 0.6931472, %v6818_v60 }
 0xadb   : > { %v5579_v36 = vsub.f32 %v5571_v38, %v5578_v16 }
 0xadd   : > { %5580 = vst.msk [vmem:[%s351_s29] sm:$0x1] %vm5567_vm0, %v5579_v36 }
 0xade   : > { %6832 = shalt.err (!%p6829_p3)
}
 0xadf   : > { %s6833_s22 = scalar_lea.hbm %s5592_s18, 16  ;;  %s6837_s29 = scalar_lea.hbm %s10317_s10, 32 }
 0xae0   : > { %p6834_p4 = scmp.ne.s32.totalorder %s5592_s18, %s6833_s22  ;;  %p6838_p9 = scmp.lt.s32.totalorder %s5592_s18, %s10317_s10 }
 0xae1   : > { %p6839_p10 = scmp.lt.s32.totalorder %s6837_s29, %s6833_s22 }
 0xae2   : > { %p6835_p7 = pnand %p6834_p4, %p6978_p5 }
 0xae3   : > { %p6840_p11 = por %p6839_p10, %p6838_p9 }
 0xae4   : > { %p6836_p8 = pneg %p6835_p7 }
 0xae6   : > { %p6841_p12 = pnand %p6840_p11, %p6836_p8 }
 0xae8   : > { %6844 = shalt.err (!%p6841_p12)
}
 0xae9   : > { %6758 = dma.vmem_to_hbm [thread:$0]  (%p6978_p5), %s5595_s30, 16, %s5592_s18, %s5582_s20  }
 0xaea PF: > { %p6764_p13 = scmp.ge.s32.totalorder %s6879_s16, 2  ;;  %s5606_s21 = sand.u32 1, %s6867_s13  }
 0xaeb   : > { %s5607_s25 = scalar_lea.sflag [#allocation3], %s5606_s21 }
 0xaec   : > { %p6761_p0 = pnand %p6764_p13, %p6982_p6 }
 0xaee   : > { %p6762_p1 = pneg %p6761_p0 }
 0xaf0   : > { %6862 = dma.done.wait (%p6762_p1), %s5607_s25, 16  }
 0xaf1   : > { %6864 = vsyncadd (%p6762_p1), %s5607_s25, 4294967280  ;;  %s10321_s27 = sld [smem:[#allocation5_spill]]  ;;  %p20_p2 = scmp.ge.s32.totalorder %s6965_s19, 4  }
 0xaf2   : > { %s10322_s13 = smov %s6871_s14  ;;  %s10323_s14 = smov %s6875_s15 }
 0xaf3   : > { %s10325_s16 = smov %s6965_s19  ;;  %22 = sbr.rel (!%p20_p2) target bundleno = 3 (0x3), region = 111 }
 0xaf7   : > { %s10324_s15 = smov %s10321_s27 }
 0xaf8   :  { %5611 = vsyncpa [#allocation3], 1 }
 0xaf9   :  { %5613 = vsyncpa [#allocation3 + $0x1], 1 }

</bundles_post_ra>
